<compile_context>
chip_gen: v6e
topology: v6e:2x2x1
jax: 0.10.0
libtpu: 0.0.40
codegen_flags: <defaults>
</compile_context>

<pallas_src>
import functools
import math

import jax
import jax.numpy as jnp
from jax.experimental import pallas as pl
from jax.experimental.pallas import tpu as pltpu


def _mha_kernel(*refs, num_heads, head_dim, has_prior, has_mask):
    """One grid step: a tile of TB batch elements, full T_q / T_kv / D."""
    it = iter(refs)
    xq_ref = next(it)                                  # (TB, Tq, D)   bf16
    xk_ref = next(it)                                  # (TB, Tkv, D)  bf16
    xv_ref = next(it)                                  # (TB, Tkv, D)  bf16
    prior_ref = next(it) if has_prior else None        # (TB, Tq, Tkv) f32
    pw_ref = next(it) if has_prior else None           # (1,) f32, SMEM scalar
    mask_ref = next(it) if has_mask else None          # (TB, 1, Tkv) f32, 1.0 == PAD
    wq_ref, bq_ref = next(it), next(it)                # (D, D) bf16 (scale folded), (1, D) f32
    wk_ref, bk_ref = next(it), next(it)
    wv_ref, bv_ref = next(it), next(it)
    wo_ref, bo_ref = next(it), next(it)                # (H, Dk, D) bf16, (1, D) f32
    out_ref = next(it)                                 # (TB, Tq, D)      f32
    attn_ref = next(it)                                # (TB, H, Tq, Tkv)
    assert next(it, None) is None

    H, Dk = num_heads, head_dim
    TB, Tq, D = xq_ref.shape
    Tkv = xk_ref.shape[1]
    f32, bf16 = jnp.float32, jnp.bfloat16

    # ---- Q/K/V projections: one fat (TB*T, D) @ (D, D) bf16 matmul each ----
    # (1/sqrt(d_k) is already folded into Wq / bq by the wrapper.)
    xq2 = xq_ref[...].reshape(TB * Tq, D)
    xk2 = xk_ref[...].reshape(TB * Tkv, D)
    xv2 = xv_ref[...].reshape(TB * Tkv, D)
    q = jnp.dot(xq2, wq_ref[...], preferred_element_type=f32) + bq_ref[...]
    k = jnp.dot(xk2, wk_ref[...], preferred_element_type=f32) + bk_ref[...]
    v = jnp.dot(xv2, wv_ref[...], preferred_element_type=f32) + bv_ref[...]

    # bf16 MXU operands for BOTH attention matmuls (f32 accumulation); cast
    # once here, not per head.
    q3 = q.astype(bf16).reshape(TB, Tq, D)
    k3 = k.astype(bf16).reshape(TB, Tkv, D)
    v3 = v.astype(bf16).reshape(TB, Tkv, D)

    # Hoisted: computed once per batch tile, not per head.
    if has_mask:
        score_bias = jnp.where(mask_ref[...] > 0.5, -jnp.inf, 0.0)   # (TB, 1, Tkv)
    if has_prior:
        pw = pw_ref[0]
        one_minus_pw = 1.0 - pw
        pw_prior = pw * prior_ref[...]                               # (TB, Tq, Tkv)

    # Per head.  Note: the attention einsums are batched dot_generals, so each
    # score / PV matmul has M = Tq regardless of TB (TB only fattens the
    # projection matmuls above).
    for h in range(H):
        lo = h * Dk
        hi = lo + Dk
        s = jnp.einsum("bqd,bkd->bqk", q3[:, :, lo:hi], k3[:, :, lo:hi],
                       preferred_element_type=f32)                   # (TB, Tq, Tkv)
        if has_mask:
            s = s + score_bias                                       # -inf == masked_fill
        m = jnp.max(s, axis=-1, keepdims=True)
        e = jnp.exp(s - m)
        # Exact reciprocal so the returned attention weights stay normalized
        # (the approx EUP reciprocal would leave ~1e-3 row-sum error).
        w = e * pl.reciprocal(jnp.sum(e, axis=-1, keepdims=True))
        if has_prior:
            w = one_minus_pw * w + pw_prior                          # prior blending
        attn_ref[:, h, :, :] = w.astype(attn_ref.dtype)              # dense (Tq,Tkv) slabs

        ctx = jnp.einsum("bqk,bkd->bqd", w.astype(bf16), v3[:, :, lo:hi],
                         preferred_element_type=f32)                 # (TB, Tq, Dk)
        # Output projection folded into the head loop: per-head (Dk, D) row
        # block of Wo^T selected on a *leading* dim (no lane slicing, no ctx
        # scratch round trip / masked partial stores).
        part = jnp.dot(ctx.astype(bf16).reshape(TB * Tq, Dk), wo_ref[h],
                       preferred_element_type=f32)                   # (TB*Tq, D)
        if h == 0:
            out_ref[...] = (part + bo_ref[...]).reshape(TB, Tq, D)
        else:
            out_ref[...] = out_ref[...] + part.reshape(TB, Tq, D)


def _vmem_capacity_bytes():
    try:
        cap = getattr(pltpu.get_tpu_info(), "vmem_capacity_bytes", None)
        if cap:
            return int(cap)
    except Exception:
        pass
    return 64 * 2**20        # conservative (v7x-sized) fallback


def _num_tensorcores():
    """Best-effort TensorCore count per chip (heuristic; perf-only decision)."""
    try:
        info = pltpu.get_tpu_info()
        for name in ("num_cores", "core_count", "num_tensorcores"):
            val = getattr(info, name, None)
            if val:
                return int(val)
    except Exception:
        pass
    try:
        kind = jax.devices()[0].device_kind.lower()
    except Exception:
        return 1
    if any(tag in kind for tag in ("v4", "v5p", "7")):
        return 2
    return 1


def _vmem_estimate_bytes(tb, t_q, t_kv, d, h, has_prior, has_mask,
                         attn_bytes=4, single_buffer_weights=True):
    """Per-step VMEM footprint: pipelined blocks + weights + in-kernel temps."""
    dk = d // h
    blocks = (2 * tb * t_q * d            # x_q (bf16)
              + 2 * 2 * tb * t_kv * d     # x_k, x_v (bf16)
              + 4 * tb * t_q * d          # out (f32)
              + attn_bytes * tb * h * t_q * t_kv)
    if has_prior:
        blocks += 4 * tb * t_q * t_kv
    if has_mask:
        blocks += 4 * tb * t_kv
    pipelined = 2 * blocks                # double-buffered by the pipeline
    wbytes = 4 * 2 * d * d + 4 * 4 * d    # 4x W (bf16) + 4x bias (f32)
    weights = wbytes if single_buffer_weights else 2 * wbytes
    t_sum = t_q + 2 * t_kv
    temps = (4 * tb * t_sum * d           # q/k/v f32 projection results
             + 2 * tb * t_sum * d         # q/k/v bf16 copies
             + 2 * (3 * 4 * tb * t_q * t_kv    # s / e / w (f32), ~2 heads live
                    + 2 * tb * t_q * t_kv      # w bf16 for the P.V matmul
                    + 6 * tb * t_q * dk))      # ctx f32 + bf16
    if has_prior:
        temps += 4 * tb * t_q * t_kv      # hoisted pw * prior
    return pipelined + weights + temps


def prepare_mha_params(params, num_heads):
    """One-off weight re-layout (transpose, bf16 cast, scale fold, per-head Wo).

    Hoisted out of my_mha_forward so these extra HBM passes don't run before
    every kernel launch.
    """
    d = params["wq"].shape[0]
    h = num_heads
    dk = d // h
    assert dk * h == d, "embed_dim must be divisible by num_heads"
    inv_scale = 1.0 / math.sqrt(dk)
    f32, bf16 = jnp.float32, jnp.bfloat16
    return {
        "num_heads": h,
        # nn.Linear computes x @ W^T + b, so pass W^T; 1/sqrt(d_k) folded into Wq/bq.
        "wq_t": (params["wq"].T * inv_scale).astype(bf16),
        "bq": (params["bq"] * inv_scale).astype(f32).reshape(1, d),
        "wk_t": params["wk"].T.astype(bf16),
        "bk": params["bk"].astype(f32).reshape(1, d),
        "wv_t": params["wv"].T.astype(bf16),
        "bv": params["bv"].astype(f32).reshape(1, d),
        # Wo^T re-laid out as (H, Dk, D): per-head leading-dim indexing in-kernel.
        "wo_h": params["wo"].T.reshape(h, dk, d).astype(bf16),
        "bo": params["bo"].astype(f32).reshape(1, d),
        # sigmoid(prior_weight) stays traced (jit-safe): SMEM scalar input.
        "prior_gate": jax.nn.sigmoid(params["prior_weight"]).astype(f32).reshape(1),
    }


def my_mha_forward(prep, x_q, x_k, x_v, prior_attn=None, padding_mask=None,
                   *, block_b=None, attn_dtype=jnp.float32):
    """Pallas forward of MyMHA. Returns (out [B,Tq,D], attn_weights [B,H,Tq,Tkv])."""
    B, t_q, d = x_q.shape
    t_kv = x_k.shape[1]
    h = prep["num_heads"]
    dk = d // h
    has_prior = prior_attn is not None
    has_mask = padding_mask is not None
    f32, bf16 = jnp.float32, jnp.bfloat16
    attn_bytes = jnp.dtype(attn_dtype).itemsize

    vmem_cap = _vmem_capacity_bytes()
    budget = int(0.78 * vmem_cap)          # ~100 MiB on v5e/v6e, ~50 MiB on v7x

    # --- batch tile: target >= 512 projection rows per grid step, VMEM
    # --- permitting; cap so multi-TensorCore chips get >= 1 step per core.
    if block_b is None:
        block_b = max(1, 512 // max(t_q, 1))
    block_b = max(1, min(block_b, B))
    n_tc = _num_tensorcores()
    if n_tc > 1:
        block_b = max(1, min(block_b, -(-B // n_tc)))
    while block_b > 1 and _vmem_estimate_bytes(
            block_b, t_q, t_kv, d, h, has_prior, has_mask, attn_bytes) > budget:
        block_b = (block_b + 1) // 2
    # Prefer a tile that divides B (skips the jnp.pad batch copy) unless that
    # would shrink the tile by more than half.
    if B % block_b != 0:
        div = block_b
        while div > 1 and B % div != 0:
            div -= 1
        if 2 * div >= block_b:
            block_b = div
    num_blocks = -(-B // block_b)
    b_pad = num_blocks * block_b

    def pad_b(a):
        if a.shape[0] == b_pad:
            return a
        return jnp.pad(a, ((0, b_pad - a.shape[0]),) + ((0, 0),) * (a.ndim - 1))

    xq = pad_b(x_q.astype(bf16))
    xk = pad_b(x_k.astype(bf16))
    xv = pad_b(x_v.astype(bf16))

    bmap3 = lambda i: (i, 0, 0)
    bmap4 = lambda i: (i, 0, 0, 0)
    cmap2 = lambda i: (0, 0)
    cmap3 = lambda i: (0, 0, 0)

    x_specs = [
        pl.BlockSpec((block_b, t_q, d), bmap3),
        pl.BlockSpec((block_b, t_kv, d), bmap3),
        pl.BlockSpec((block_b, t_kv, d), bmap3),
    ]
    args = [xq, xk, xv]
    opt_specs = []
    if has_prior:
        opt_specs.append(pl.BlockSpec((block_b, t_q, t_kv), bmap3))
        args.append(pad_b(prior_attn.astype(f32)))
        opt_specs.append(pl.BlockSpec(memory_space=pltpu.MemorySpace.SMEM))
        args.append(prep["prior_gate"])
    if has_mask:
        opt_specs.append(pl.BlockSpec((block_b, 1, t_kv), bmap3))
        args.append(pad_b(padding_mask.astype(f32).reshape(B, 1, t_kv)))
    args += [prep["wq_t"], prep["bq"], prep["wk_t"], prep["bk"],
             prep["wv_t"], prep["bv"], prep["wo_h"], prep["bo"]]

    kernel = functools.partial(_mha_kernel, num_heads=h, head_dim=dk,
                               has_prior=has_prior, has_mask=has_mask)

    def run(single_buffer_weights):
        # Weights / biases have a constant index map: single-buffer them to
        # halve their VMEM footprint (fall back to default if unsupported).
        wkw = dict(pipeline_mode=pl.Buffered(1)) if single_buffer_weights else {}
        w_specs = []
        for _ in range(3):                                   # Wq, Wk, Wv (+ biases)
            w_specs.append(pl.BlockSpec((d, d), cmap2, **wkw))
            w_specs.append(pl.BlockSpec((1, d), cmap2, **wkw))
        w_specs.append(pl.BlockSpec((h, dk, d), cmap3, **wkw))  # per-head Wo
        w_specs.append(pl.BlockSpec((1, d), cmap2, **wkw))
        vmem_est = _vmem_estimate_bytes(
            block_b, t_q, t_kv, d, h, has_prior, has_mask, attn_bytes,
            single_buffer_weights=single_buffer_weights)
        vmem_limit = int(min(0.85 * vmem_cap, max(32 * 2**20, 1.5 * vmem_est)))
        return pl.pallas_call(
            kernel,
            grid=(num_blocks,),
            in_specs=x_specs + opt_specs + w_specs,
            out_specs=(
                pl.BlockSpec((block_b, t_q, d), bmap3),
                pl.BlockSpec((block_b, h, t_q, t_kv), bmap4),
            ),
            out_shape=(
                jax.ShapeDtypeStruct((b_pad, t_q, d), f32),
                jax.ShapeDtypeStruct((b_pad, h, t_q, t_kv), attn_dtype),
            ),
            compiler_params=pltpu.CompilerParams(
                dimension_semantics=("parallel",),
                vmem_limit_bytes=vmem_limit),
        )(*args)

    try:
        out, attn = run(True)
    except Exception:
        out, attn = run(False)

    return out[:B], attn[:B]


def _reference(params, x_q, x_k, x_v, prior_attn, padding_mask, num_heads):
    """Pure-JAX f32 replica of the torch forward, for verification."""
    B, t_q, d = x_q.shape
    t_kv = x_k.shape[1]
    h = num_heads
    dk = d // h
    q = x_q @ params["wq"].T + params["bq"]
    k = x_k @ params["wk"].T + params["bk"]
    v = x_v @ params["wv"].T + params["bv"]
    q = q.reshape(B, t_q, h, dk).transpose(0, 2, 1, 3)
    k = k.reshape(B, t_kv, h, dk).transpose(0, 2, 1, 3)
    v = v.reshape(B, t_kv, h, dk).transpose(0, 2, 1, 3)
    scores = jnp.einsum("bhqd,bhkd->bhqk", q, k) / math.sqrt(dk)
    if padding_mask is not None:
        scores = jnp.where(padding_mask[:, None, None, :], -jnp.inf, scores)
    attn = jax.nn.softmax(scores, axis=-1)
    if prior_attn is not None:
        pw = jax.nn.sigmoid(params["prior_weight"])
        attn = (1.0 - pw) * attn + pw * prior_attn[:, None, :, :]
    ctx = jnp.einsum("bhqk,bhkd->bhqd", attn, v)
    ctx = ctx.transpose(0, 2, 1, 3).reshape(B, t_q, d)
    out = ctx @ params["wo"].T + params["bo"]
    return out, attn


if __name__ == "__main__":
    B, T_q, T_kv, D, H = 2, 8, 16, 32, 4

    key = jax.random.PRNGKey(0)
    ks = jax.random.split(key, 14)
    s = 1.0 / math.sqrt(D)
    u = lambda k, shape: jax.random.uniform(k, shape, jnp.float32, -s, s)
    params = {
        "wq": u(ks[0], (D, D)), "bq": u(ks[1], (D,)),
        "wk": u(ks[2], (D, D)), "bk": u(ks[3], (D,)),
        "wv": u(ks[4], (D, D)), "bv": u(ks[5], (D,)),
        "wo": u(ks[6], (D, D)), "bo": u(ks[7], (D,)),
        "prior_weight": jnp.asarray(0.0, jnp.float32),  # torch init: nn.Parameter(0.0)
    }
    prep = prepare_mha_params(params, H)   # one-off weight re-layout / bf16 cast

    x_q = jax.random.normal(ks[8], (B, T_q, D), jnp.float32)
    x_k = jax.random.normal(ks[9], (B, T_kv, D), jnp.float32)
    x_v = jax.random.normal(ks[10], (B, T_kv, D), jnp.float32)
    prior = jax.random.uniform(ks[11], (B, T_q, T_kv), jnp.float32, 0.0, 1.0)
    prior = prior / jnp.sum(prior, axis=-1, keepdims=True)
    # padding mask: True == PAD; pad out the last 3 keys of batch element 1.
    padding_mask = jnp.zeros((B, T_kv), bool).at[1, T_kv - 3:].set(True)

    # Case 1: prior + padding mask (exercises every branch of the torch forward).
    out1, attn1 = my_mha_forward(prep, x_q, x_k, x_v, prior_attn=prior,
                                 padding_mask=padding_mask)
    out1, attn1 = jax.block_until_ready((out1, attn1))
    ref_out1, ref_attn1 = _reference(params, x_q, x_k, x_v, prior, padding_mask, H)

    # Case 2: no prior, no mask (optional-input code path, no dead DMAs).
    out2, attn2 = my_mha_forward(prep, x_q, x_k, x_v)
    out2, attn2 = jax.block_until_ready((out2, attn2))
    ref_out2, ref_attn2 = _reference(params, x_q, x_k, x_v, None, None, H)

    assert out1.shape == (B, T_q, D) and attn1.shape == (B, H, T_q, T_kv)
    assert out2.shape == (B, T_q, D) and attn2.shape == (B, H, T_q, T_kv)
    # Tolerance accounts for bf16 MXU operands (now also on Q/K for the score
    # matmul) versus the pure-f32 XLA reference.
    tol = dict(atol=2.5e-2, rtol=2.5e-2)
    assert jnp.allclose(out1, ref_out1, **tol), "case 1: output mismatch"
    assert jnp.allclose(attn1, ref_attn1, **tol), "case 1: attn weights mismatch"
    assert jnp.allclose(out2, ref_out2, **tol), "case 2: output mismatch"
    assert jnp.allclose(attn2, ref_attn2, **tol), "case 2: attn weights mismatch"

    print("KERNEL_OK")
</pallas_src>

<mosaic_0001>
module attributes {stable_mosaic.version = 11 : i64} {
  func.func @_mha_kernel(%arg0: i32, %arg1: memref<2x8x32xbf16, #tpu.memory_space<vmem>>, %arg2: memref<2x16x32xbf16, #tpu.memory_space<vmem>>, %arg3: memref<2x16x32xbf16, #tpu.memory_space<vmem>>, %arg4: memref<2x8x16xf32, #tpu.memory_space<vmem>>, %arg5: memref<1xf32, #tpu.memory_space<smem>>, %arg6: memref<2x1x16xf32, #tpu.memory_space<vmem>>, %arg7: memref<32x32xbf16, #tpu.memory_space<vmem>>, %arg8: memref<1x32xf32, #tpu.memory_space<vmem>>, %arg9: memref<32x32xbf16, #tpu.memory_space<vmem>>, %arg10: memref<1x32xf32, #tpu.memory_space<vmem>>, %arg11: memref<32x32xbf16, #tpu.memory_space<vmem>>, %arg12: memref<1x32xf32, #tpu.memory_space<vmem>>, %arg13: memref<4x8x32xbf16, #tpu.memory_space<vmem>>, %arg14: memref<1x32xf32, #tpu.memory_space<vmem>>, %arg15: memref<2x8x32xf32, #tpu.memory_space<vmem>>, %arg16: memref<2x4x8x16xf32, #tpu.memory_space<vmem>>) attributes {dimension_semantics = [#tpu.dimension_semantics<parallel>], iteration_bounds = array<i64: 1>, scalar_prefetch = 0 : i64, scratch_operands = 0 : i64, tpu.core_type = #tpu.core_type<tc>, window_params = [{transform_indices = @transform_0, window_bounds = array<i64: 2, 8, 32>}, {transform_indices = @transform_1, window_bounds = array<i64: 2, 16, 32>}, {transform_indices = @transform_2, window_bounds = array<i64: 2, 16, 32>}, {transform_indices = @transform_3, window_bounds = array<i64: 2, 8, 16>}, {transform_indices = @transform_4, window_bounds = array<i64: 1>}, {transform_indices = @transform_5, window_bounds = array<i64: 2, 1, 16>}, {pipeline_mode = #tpu.pipeline_mode<synchronous>, transform_indices = @transform_6, window_bounds = array<i64: 32, 32>}, {pipeline_mode = #tpu.pipeline_mode<synchronous>, transform_indices = @transform_7, window_bounds = array<i64: 1, 32>}, {pipeline_mode = #tpu.pipeline_mode<synchronous>, transform_indices = @transform_8, window_bounds = array<i64: 32, 32>}, {pipeline_mode = #tpu.pipeline_mode<synchronous>, transform_indices = @transform_9, window_bounds = array<i64: 1, 32>}, {pipeline_mode = #tpu.pipeline_mode<synchronous>, transform_indices = @transform_10, window_bounds = array<i64: 32, 32>}, {pipeline_mode = #tpu.pipeline_mode<synchronous>, transform_indices = @transform_11, window_bounds = array<i64: 1, 32>}, {pipeline_mode = #tpu.pipeline_mode<synchronous>, transform_indices = @transform_12, window_bounds = array<i64: 4, 8, 32>}, {pipeline_mode = #tpu.pipeline_mode<synchronous>, transform_indices = @transform_13, window_bounds = array<i64: 1, 32>}, {transform_indices = @transform_14, window_bounds = array<i64: 2, 8, 32>}, {transform_indices = @transform_15, window_bounds = array<i64: 2, 4, 8, 16>}]} {
    %c0 = arith.constant 0 : index
    %c0_0 = arith.constant 0 : index
    %c0_1 = arith.constant 0 : index
    %0 = vector.load %arg1[%c0, %c0_0, %c0_1] : memref<2x8x32xbf16, #tpu.memory_space<vmem>>, vector<2x8x32xbf16>
    %1 = vector.shape_cast %0 : vector<2x8x32xbf16> to vector<16x32xbf16>
    %c0_2 = arith.constant 0 : index
    %c0_3 = arith.constant 0 : index
    %c0_4 = arith.constant 0 : index
    %2 = vector.load %arg2[%c0_2, %c0_3, %c0_4] : memref<2x16x32xbf16, #tpu.memory_space<vmem>>, vector<2x16x32xbf16>
    %3 = vector.shape_cast %2 : vector<2x16x32xbf16> to vector<32x32xbf16>
    %c0_5 = arith.constant 0 : index
    %c0_6 = arith.constant 0 : index
    %c0_7 = arith.constant 0 : index
    %4 = vector.load %arg3[%c0_5, %c0_6, %c0_7] : memref<2x16x32xbf16, #tpu.memory_space<vmem>>, vector<2x16x32xbf16>
    %5 = vector.shape_cast %4 : vector<2x16x32xbf16> to vector<32x32xbf16>
    %c0_8 = arith.constant 0 : index
    %c0_9 = arith.constant 0 : index
    %6 = vector.load %arg7[%c0_8, %c0_9] : memref<32x32xbf16, #tpu.memory_space<vmem>>, vector<32x32xbf16>
    %cst = arith.constant dense<0.000000e+00> : vector<16x32xf32>
    %7 = tpu.matmul %1, %6, %cst {dimension_numbers = #tpu.dot_dimension_numbers<[1], [0], [0], [1], [0, 0, 1, 1], [], []>} : vector<16x32xbf16>, vector<32x32xbf16>, vector<16x32xf32> -> vector<16x32xf32>
    %c0_10 = arith.constant 0 : index
    %c0_11 = arith.constant 0 : index
    %8 = vector.load %arg8[%c0_10, %c0_11] : memref<1x32xf32, #tpu.memory_space<vmem>>, vector<1x32xf32>
    %9 = vector.broadcast %8 : vector<1x32xf32> to vector<16x32xf32>
    %10 = arith.addf %7, %9 : vector<16x32xf32>
    %c0_12 = arith.constant 0 : index
    %c0_13 = arith.constant 0 : index
    %11 = vector.load %arg9[%c0_12, %c0_13] : memref<32x32xbf16, #tpu.memory_space<vmem>>, vector<32x32xbf16>
    %cst_14 = arith.constant dense<0.000000e+00> : vector<32x32xf32>
    %12 = tpu.matmul %3, %11, %cst_14 {dimension_numbers = #tpu.dot_dimension_numbers<[1], [0], [0], [1], [0, 0, 1, 1], [], []>} : vector<32x32xbf16>, vector<32x32xbf16>, vector<32x32xf32> -> vector<32x32xf32>
    %c0_15 = arith.constant 0 : index
    %c0_16 = arith.constant 0 : index
    %13 = vector.load %arg10[%c0_15, %c0_16] : memref<1x32xf32, #tpu.memory_space<vmem>>, vector<1x32xf32>
    %14 = vector.broadcast %13 : vector<1x32xf32> to vector<32x32xf32>
    %15 = arith.addf %12, %14 : vector<32x32xf32>
    %c0_17 = arith.constant 0 : index
    %c0_18 = arith.constant 0 : index
    %16 = vector.load %arg11[%c0_17, %c0_18] : memref<32x32xbf16, #tpu.memory_space<vmem>>, vector<32x32xbf16>
    %cst_19 = arith.constant dense<0.000000e+00> : vector<32x32xf32>
    %17 = tpu.matmul %5, %16, %cst_19 {dimension_numbers = #tpu.dot_dimension_numbers<[1], [0], [0], [1], [0, 0, 1, 1], [], []>} : vector<32x32xbf16>, vector<32x32xbf16>, vector<32x32xf32> -> vector<32x32xf32>
    %c0_20 = arith.constant 0 : index
    %c0_21 = arith.constant 0 : index
    %18 = vector.load %arg12[%c0_20, %c0_21] : memref<1x32xf32, #tpu.memory_space<vmem>>, vector<1x32xf32>
    %19 = vector.broadcast %18 : vector<1x32xf32> to vector<32x32xf32>
    %20 = arith.addf %17, %19 : vector<32x32xf32>
    %21 = arith.truncf %10 : vector<16x32xf32> to vector<16x32xbf16>
    %22 = vector.shape_cast %21 : vector<16x32xbf16> to vector<2x8x32xbf16>
    %23 = arith.truncf %15 : vector<32x32xf32> to vector<32x32xbf16>
    %24 = vector.shape_cast %23 : vector<32x32xbf16> to vector<2x16x32xbf16>
    %25 = arith.truncf %20 : vector<32x32xf32> to vector<32x32xbf16>
    %26 = vector.shape_cast %25 : vector<32x32xbf16> to vector<2x16x32xbf16>
    %c0_22 = arith.constant 0 : index
    %c0_23 = arith.constant 0 : index
    %c0_24 = arith.constant 0 : index
    %27 = vector.load %arg6[%c0_22, %c0_23, %c0_24] : memref<2x1x16xf32, #tpu.memory_space<vmem>>, vector<2x1x16xf32>
    %cst_25 = arith.constant 5.000000e-01 : f32
    %28 = vector.broadcast %cst_25 : f32 to vector<2x1x16xf32>
    %29 = arith.cmpf ogt, %27, %28 : vector<2x1x16xf32>
    %cst_26 = arith.constant 0xFF800000 : f32
    %cst_27 = arith.constant 0.000000e+00 : f32
    %30 = vector.broadcast %cst_26 : f32 to vector<2x1x16xf32>
    %31 = vector.broadcast %cst_27 : f32 to vector<2x1x16xf32>
    %32 = arith.select %29, %30, %31 : vector<2x1x16xi1>, vector<2x1x16xf32>
    %c0_28 = arith.constant 0 : index
    %33 = memref.load %arg5[%c0_28] : memref<1xf32, #tpu.memory_space<smem>>
    %cst_29 = arith.constant 1.000000e+00 : f32
    %34 = arith.subf %cst_29, %33 : f32
    %c0_30 = arith.constant 0 : index
    %c0_31 = arith.constant 0 : index
    %c0_32 = arith.constant 0 : index
    %35 = vector.load %arg4[%c0_30, %c0_31, %c0_32] : memref<2x8x16xf32, #tpu.memory_space<vmem>>, vector<2x8x16xf32>
    %36 = vector.broadcast %33 : f32 to vector<2x8x16xf32>
    %37 = arith.mulf %36, %35 : vector<2x8x16xf32>
    %38 = vector.extract_strided_slice %22 {offsets = [0, 0, 0], sizes = [2, 8, 8], strides = [1, 1, 1]} : vector<2x8x32xbf16> to vector<2x8x8xbf16>
    %39 = vector.extract_strided_slice %24 {offsets = [0, 0, 0], sizes = [2, 16, 8], strides = [1, 1, 1]} : vector<2x16x32xbf16> to vector<2x16x8xbf16>
    "tpu.trace_start"() <{level = 10 : i32, message = "bqd,bkd->bqk"}> : () -> ()
    %cst_33 = arith.constant dense<0.000000e+00> : vector<2x8x16xf32>
    %40 = tpu.matmul %38, %39, %cst_33 {dimension_numbers = #tpu.dot_dimension_numbers<[2], [2], [1], [1], [0, 0, 0, 1, 1, 1], [0], [0]>} : vector<2x8x8xbf16>, vector<2x16x8xbf16>, vector<2x8x16xf32> -> vector<2x8x16xf32>
    "tpu.trace_stop"() : () -> ()
    %41 = vector.broadcast %32 : vector<2x1x16xf32> to vector<2x8x16xf32>
    %42 = arith.addf %40, %41 : vector<2x8x16xf32>
    %cst_34 = arith.constant dense<0xFF800000> : vector<2x8xf32>
    %43 = vector.multi_reduction <maximumf>, %42, %cst_34 [2] : vector<2x8x16xf32> to vector<2x8xf32>
    %44 = vector.shape_cast %43 : vector<2x8xf32> to vector<2x8x1xf32>
    %45 = vector.broadcast %44 : vector<2x8x1xf32> to vector<2x8x16xf32>
    %46 = arith.subf %42, %45 : vector<2x8x16xf32>
    %47 = math.exp %46 : vector<2x8x16xf32>
    %cst_35 = arith.constant dense<0.000000e+00> : vector<2x8xf32>
    %48 = vector.multi_reduction <add>, %47, %cst_35 [2] : vector<2x8x16xf32> to vector<2x8xf32>
    %49 = vector.shape_cast %48 : vector<2x8xf32> to vector<2x8x1xf32>
    %50 = tpu.reciprocal %49 : vector<2x8x1xf32> -> vector<2x8x1xf32>
    %51 = vector.broadcast %50 : vector<2x8x1xf32> to vector<2x8x16xf32>
    %52 = arith.mulf %47, %51 : vector<2x8x16xf32>
    %53 = vector.broadcast %34 : f32 to vector<2x8x16xf32>
    %54 = arith.mulf %53, %52 : vector<2x8x16xf32>
    %55 = arith.addf %54, %37 : vector<2x8x16xf32>
    %c0_36 = arith.constant 0 : index
    %c0_37 = arith.constant 0 : index
    %c0_38 = arith.constant 0 : index
    %c0_39 = arith.constant 0 : index
    %56 = vector.load %arg16[%c0_36, %c0_37, %c0_38, %c0_39] : memref<2x4x8x16xf32, #tpu.memory_space<vmem>>, vector<2x1x8x16xf32>
    %57 = vector.shape_cast %56 : vector<2x1x8x16xf32> to vector<2x8x16xf32>
    %58 = vector.shape_cast %55 : vector<2x8x16xf32> to vector<2x1x8x16xf32>
    tpu.vector_store %arg16[%c0_36, %c0_37, %c0_38, %c0_39], %58 {strides = array<i32>} : memref<2x4x8x16xf32, #tpu.memory_space<vmem>>, vector<2x1x8x16xf32>,
    %59 = arith.truncf %55 : vector<2x8x16xf32> to vector<2x8x16xbf16>
    %60 = vector.extract_strided_slice %26 {offsets = [0, 0, 0], sizes = [2, 16, 8], strides = [1, 1, 1]} : vector<2x16x32xbf16> to vector<2x16x8xbf16>
    "tpu.trace_start"() <{level = 10 : i32, message = "bqk,bkd->bqd"}> : () -> ()
    %cst_40 = arith.constant dense<0.000000e+00> : vector<2x8x8xf32>
    %61 = tpu.matmul %59, %60, %cst_40 {dimension_numbers = #tpu.dot_dimension_numbers<[2], [1], [1], [2], [0, 0, 0, 1, 1, 2], [0], [0]>} : vector<2x8x16xbf16>, vector<2x16x8xbf16>, vector<2x8x8xf32> -> vector<2x8x8xf32>
    "tpu.trace_stop"() : () -> ()
    %62 = arith.truncf %61 : vector<2x8x8xf32> to vector<2x8x8xbf16>
    %63 = vector.shape_cast %62 : vector<2x8x8xbf16> to vector<16x8xbf16>
    %c0_41 = arith.constant 0 : index
    %c0_42 = arith.constant 0 : index
    %c0_43 = arith.constant 0 : index
    %64 = vector.load %arg13[%c0_41, %c0_42, %c0_43] : memref<4x8x32xbf16, #tpu.memory_space<vmem>>, vector<1x8x32xbf16>
    %65 = vector.shape_cast %64 : vector<1x8x32xbf16> to vector<8x32xbf16>
    %cst_44 = arith.constant dense<0.000000e+00> : vector<16x32xf32>
    %66 = tpu.matmul %63, %65, %cst_44 {dimension_numbers = #tpu.dot_dimension_numbers<[1], [0], [0], [1], [0, 0, 1, 1], [], []>} : vector<16x8xbf16>, vector<8x32xbf16>, vector<16x32xf32> -> vector<16x32xf32>
    %c0_45 = arith.constant 0 : index
    %c0_46 = arith.constant 0 : index
    %67 = vector.load %arg14[%c0_45, %c0_46] : memref<1x32xf32, #tpu.memory_space<vmem>>, vector<1x32xf32>
    %68 = vector.broadcast %67 : vector<1x32xf32> to vector<16x32xf32>
    %69 = arith.addf %66, %68 : vector<16x32xf32>
    %70 = vector.shape_cast %69 : vector<16x32xf32> to vector<2x8x32xf32>
    %c0_47 = arith.constant 0 : index
    %c0_48 = arith.constant 0 : index
    %c0_49 = arith.constant 0 : index
    %71 = vector.load %arg15[%c0_47, %c0_48, %c0_49] : memref<2x8x32xf32, #tpu.memory_space<vmem>>, vector<2x8x32xf32>
    tpu.vector_store %arg15[%c0_47, %c0_48, %c0_49], %70 {strides = array<i32>} : memref<2x8x32xf32, #tpu.memory_space<vmem>>, vector<2x8x32xf32>,
    %72 = vector.extract_strided_slice %22 {offsets = [0, 0, 8], sizes = [2, 8, 8], strides = [1, 1, 1]} : vector<2x8x32xbf16> to vector<2x8x8xbf16>
    %73 = vector.extract_strided_slice %24 {offsets = [0, 0, 8], sizes = [2, 16, 8], strides = [1, 1, 1]} : vector<2x16x32xbf16> to vector<2x16x8xbf16>
    "tpu.trace_start"() <{level = 10 : i32, message = "bqd,bkd->bqk"}> : () -> ()
    %cst_50 = arith.constant dense<0.000000e+00> : vector<2x8x16xf32>
    %74 = tpu.matmul %72, %73, %cst_50 {dimension_numbers = #tpu.dot_dimension_numbers<[2], [2], [1], [1], [0, 0, 0, 1, 1, 1], [0], [0]>} : vector<2x8x8xbf16>, vector<2x16x8xbf16>, vector<2x8x16xf32> -> vector<2x8x16xf32>
    "tpu.trace_stop"() : () -> ()
    %75 = vector.broadcast %32 : vector<2x1x16xf32> to vector<2x8x16xf32>
    %76 = arith.addf %74, %75 : vector<2x8x16xf32>
    %cst_51 = arith.constant dense<0xFF800000> : vector<2x8xf32>
    %77 = vector.multi_reduction <maximumf>, %76, %cst_51 [2] : vector<2x8x16xf32> to vector<2x8xf32>
    %78 = vector.shape_cast %77 : vector<2x8xf32> to vector<2x8x1xf32>
    %79 = vector.broadcast %78 : vector<2x8x1xf32> to vector<2x8x16xf32>
    %80 = arith.subf %76, %79 : vector<2x8x16xf32>
    %81 = math.exp %80 : vector<2x8x16xf32>
    %cst_52 = arith.constant dense<0.000000e+00> : vector<2x8xf32>
    %82 = vector.multi_reduction <add>, %81, %cst_52 [2] : vector<2x8x16xf32> to vector<2x8xf32>
    %83 = vector.shape_cast %82 : vector<2x8xf32> to vector<2x8x1xf32>
    %84 = tpu.reciprocal %83 : vector<2x8x1xf32> -> vector<2x8x1xf32>
    %85 = vector.broadcast %84 : vector<2x8x1xf32> to vector<2x8x16xf32>
    %86 = arith.mulf %81, %85 : vector<2x8x16xf32>
    %87 = vector.broadcast %34 : f32 to vector<2x8x16xf32>
    %88 = arith.mulf %87, %86 : vector<2x8x16xf32>
    %89 = arith.addf %88, %37 : vector<2x8x16xf32>
    %c0_53 = arith.constant 0 : index
    %c1 = arith.constant 1 : index
    %c0_54 = arith.constant 0 : index
    %c0_55 = arith.constant 0 : index
    %90 = vector.load %arg16[%c0_53, %c1, %c0_54, %c0_55] : memref<2x4x8x16xf32, #tpu.memory_space<vmem>>, vector<2x1x8x16xf32>
    %91 = vector.shape_cast %90 : vector<2x1x8x16xf32> to vector<2x8x16xf32>
    %92 = vector.shape_cast %89 : vector<2x8x16xf32> to vector<2x1x8x16xf32>
    tpu.vector_store %arg16[%c0_53, %c1, %c0_54, %c0_55], %92 {strides = array<i32>} : memref<2x4x8x16xf32, #tpu.memory_space<vmem>>, vector<2x1x8x16xf32>,
    %93 = arith.truncf %89 : vector<2x8x16xf32> to vector<2x8x16xbf16>
    %94 = vector.extract_strided_slice %26 {offsets = [0, 0, 8], sizes = [2, 16, 8], strides = [1, 1, 1]} : vector<2x16x32xbf16> to vector<2x16x8xbf16>
    "tpu.trace_start"() <{level = 10 : i32, message = "bqk,bkd->bqd"}> : () -> ()
    %cst_56 = arith.constant dense<0.000000e+00> : vector<2x8x8xf32>
    %95 = tpu.matmul %93, %94, %cst_56 {dimension_numbers = #tpu.dot_dimension_numbers<[2], [1], [1], [2], [0, 0, 0, 1, 1, 2], [0], [0]>} : vector<2x8x16xbf16>, vector<2x16x8xbf16>, vector<2x8x8xf32> -> vector<2x8x8xf32>
    "tpu.trace_stop"() : () -> ()
    %96 = arith.truncf %95 : vector<2x8x8xf32> to vector<2x8x8xbf16>
    %97 = vector.shape_cast %96 : vector<2x8x8xbf16> to vector<16x8xbf16>
    %c1_57 = arith.constant 1 : index
    %c0_58 = arith.constant 0 : index
    %c0_59 = arith.constant 0 : index
    %98 = vector.load %arg13[%c1_57, %c0_58, %c0_59] : memref<4x8x32xbf16, #tpu.memory_space<vmem>>, vector<1x8x32xbf16>
    %99 = vector.shape_cast %98 : vector<1x8x32xbf16> to vector<8x32xbf16>
    %cst_60 = arith.constant dense<0.000000e+00> : vector<16x32xf32>
    %100 = tpu.matmul %97, %99, %cst_60 {dimension_numbers = #tpu.dot_dimension_numbers<[1], [0], [0], [1], [0, 0, 1, 1], [], []>} : vector<16x8xbf16>, vector<8x32xbf16>, vector<16x32xf32> -> vector<16x32xf32>
    %c0_61 = arith.constant 0 : index
    %c0_62 = arith.constant 0 : index
    %c0_63 = arith.constant 0 : index
    %101 = vector.load %arg15[%c0_61, %c0_62, %c0_63] : memref<2x8x32xf32, #tpu.memory_space<vmem>>, vector<2x8x32xf32>
    %102 = vector.shape_cast %100 : vector<16x32xf32> to vector<2x8x32xf32>
    %103 = arith.addf %101, %102 : vector<2x8x32xf32>
    %c0_64 = arith.constant 0 : index
    %c0_65 = arith.constant 0 : index
    %c0_66 = arith.constant 0 : index
    %104 = vector.load %arg15[%c0_64, %c0_65, %c0_66] : memref<2x8x32xf32, #tpu.memory_space<vmem>>, vector<2x8x32xf32>
    tpu.vector_store %arg15[%c0_64, %c0_65, %c0_66], %103 {strides = array<i32>} : memref<2x8x32xf32, #tpu.memory_space<vmem>>, vector<2x8x32xf32>,
    %105 = vector.extract_strided_slice %22 {offsets = [0, 0, 16], sizes = [2, 8, 8], strides = [1, 1, 1]} : vector<2x8x32xbf16> to vector<2x8x8xbf16>
    %106 = vector.extract_strided_slice %24 {offsets = [0, 0, 16], sizes = [2, 16, 8], strides = [1, 1, 1]} : vector<2x16x32xbf16> to vector<2x16x8xbf16>
    "tpu.trace_start"() <{level = 10 : i32, message = "bqd,bkd->bqk"}> : () -> ()
    %cst_67 = arith.constant dense<0.000000e+00> : vector<2x8x16xf32>
    %107 = tpu.matmul %105, %106, %cst_67 {dimension_numbers = #tpu.dot_dimension_numbers<[2], [2], [1], [1], [0, 0, 0, 1, 1, 1], [0], [0]>} : vector<2x8x8xbf16>, vector<2x16x8xbf16>, vector<2x8x16xf32> -> vector<2x8x16xf32>
    "tpu.trace_stop"() : () -> ()
    %108 = vector.broadcast %32 : vector<2x1x16xf32> to vector<2x8x16xf32>
    %109 = arith.addf %107, %108 : vector<2x8x16xf32>
    %cst_68 = arith.constant dense<0xFF800000> : vector<2x8xf32>
    %110 = vector.multi_reduction <maximumf>, %109, %cst_68 [2] : vector<2x8x16xf32> to vector<2x8xf32>
    %111 = vector.shape_cast %110 : vector<2x8xf32> to vector<2x8x1xf32>
    %112 = vector.broadcast %111 : vector<2x8x1xf32> to vector<2x8x16xf32>
    %113 = arith.subf %109, %112 : vector<2x8x16xf32>
    %114 = math.exp %113 : vector<2x8x16xf32>
    %cst_69 = arith.constant dense<0.000000e+00> : vector<2x8xf32>
    %115 = vector.multi_reduction <add>, %114, %cst_69 [2] : vector<2x8x16xf32> to vector<2x8xf32>
    %116 = vector.shape_cast %115 : vector<2x8xf32> to vector<2x8x1xf32>
    %117 = tpu.reciprocal %116 : vector<2x8x1xf32> -> vector<2x8x1xf32>
    %118 = vector.broadcast %117 : vector<2x8x1xf32> to vector<2x8x16xf32>
    %119 = arith.mulf %114, %118 : vector<2x8x16xf32>
    %120 = vector.broadcast %34 : f32 to vector<2x8x16xf32>
    %121 = arith.mulf %120, %119 : vector<2x8x16xf32>
    %122 = arith.addf %121, %37 : vector<2x8x16xf32>
    %c0_70 = arith.constant 0 : index
    %c2 = arith.constant 2 : index
    %c0_71 = arith.constant 0 : index
    %c0_72 = arith.constant 0 : index
    %123 = vector.load %arg16[%c0_70, %c2, %c0_71, %c0_72] : memref<2x4x8x16xf32, #tpu.memory_space<vmem>>, vector<2x1x8x16xf32>
    %124 = vector.shape_cast %123 : vector<2x1x8x16xf32> to vector<2x8x16xf32>
    %125 = vector.shape_cast %122 : vector<2x8x16xf32> to vector<2x1x8x16xf32>
    tpu.vector_store %arg16[%c0_70, %c2, %c0_71, %c0_72], %125 {strides = array<i32>} : memref<2x4x8x16xf32, #tpu.memory_space<vmem>>, vector<2x1x8x16xf32>,
    %126 = arith.truncf %122 : vector<2x8x16xf32> to vector<2x8x16xbf16>
    %127 = vector.extract_strided_slice %26 {offsets = [0, 0, 16], sizes = [2, 16, 8], strides = [1, 1, 1]} : vector<2x16x32xbf16> to vector<2x16x8xbf16>
    "tpu.trace_start"() <{level = 10 : i32, message = "bqk,bkd->bqd"}> : () -> ()
    %cst_73 = arith.constant dense<0.000000e+00> : vector<2x8x8xf32>
    %128 = tpu.matmul %126, %127, %cst_73 {dimension_numbers = #tpu.dot_dimension_numbers<[2], [1], [1], [2], [0, 0, 0, 1, 1, 2], [0], [0]>} : vector<2x8x16xbf16>, vector<2x16x8xbf16>, vector<2x8x8xf32> -> vector<2x8x8xf32>
    "tpu.trace_stop"() : () -> ()
    %129 = arith.truncf %128 : vector<2x8x8xf32> to vector<2x8x8xbf16>
    %130 = vector.shape_cast %129 : vector<2x8x8xbf16> to vector<16x8xbf16>
    %c2_74 = arith.constant 2 : index
    %c0_75 = arith.constant 0 : index
    %c0_76 = arith.constant 0 : index
    %131 = vector.load %arg13[%c2_74, %c0_75, %c0_76] : memref<4x8x32xbf16, #tpu.memory_space<vmem>>, vector<1x8x32xbf16>
    %132 = vector.shape_cast %131 : vector<1x8x32xbf16> to vector<8x32xbf16>
    %cst_77 = arith.constant dense<0.000000e+00> : vector<16x32xf32>
    %133 = tpu.matmul %130, %132, %cst_77 {dimension_numbers = #tpu.dot_dimension_numbers<[1], [0], [0], [1], [0, 0, 1, 1], [], []>} : vector<16x8xbf16>, vector<8x32xbf16>, vector<16x32xf32> -> vector<16x32xf32>
    %c0_78 = arith.constant 0 : index
    %c0_79 = arith.constant 0 : index
    %c0_80 = arith.constant 0 : index
    %134 = vector.load %arg15[%c0_78, %c0_79, %c0_80] : memref<2x8x32xf32, #tpu.memory_space<vmem>>, vector<2x8x32xf32>
    %135 = vector.shape_cast %133 : vector<16x32xf32> to vector<2x8x32xf32>
    %136 = arith.addf %134, %135 : vector<2x8x32xf32>
    %c0_81 = arith.constant 0 : index
    %c0_82 = arith.constant 0 : index
    %c0_83 = arith.constant 0 : index
    %137 = vector.load %arg15[%c0_81, %c0_82, %c0_83] : memref<2x8x32xf32, #tpu.memory_space<vmem>>, vector<2x8x32xf32>
    tpu.vector_store %arg15[%c0_81, %c0_82, %c0_83], %136 {strides = array<i32>} : memref<2x8x32xf32, #tpu.memory_space<vmem>>, vector<2x8x32xf32>,
    %138 = vector.extract_strided_slice %22 {offsets = [0, 0, 24], sizes = [2, 8, 8], strides = [1, 1, 1]} : vector<2x8x32xbf16> to vector<2x8x8xbf16>
    %139 = vector.extract_strided_slice %24 {offsets = [0, 0, 24], sizes = [2, 16, 8], strides = [1, 1, 1]} : vector<2x16x32xbf16> to vector<2x16x8xbf16>
    "tpu.trace_start"() <{level = 10 : i32, message = "bqd,bkd->bqk"}> : () -> ()
    %cst_84 = arith.constant dense<0.000000e+00> : vector<2x8x16xf32>
    %140 = tpu.matmul %138, %139, %cst_84 {dimension_numbers = #tpu.dot_dimension_numbers<[2], [2], [1], [1], [0, 0, 0, 1, 1, 1], [0], [0]>} : vector<2x8x8xbf16>, vector<2x16x8xbf16>, vector<2x8x16xf32> -> vector<2x8x16xf32>
    "tpu.trace_stop"() : () -> ()
    %141 = vector.broadcast %32 : vector<2x1x16xf32> to vector<2x8x16xf32>
    %142 = arith.addf %140, %141 : vector<2x8x16xf32>
    %cst_85 = arith.constant dense<0xFF800000> : vector<2x8xf32>
    %143 = vector.multi_reduction <maximumf>, %142, %cst_85 [2] : vector<2x8x16xf32> to vector<2x8xf32>
    %144 = vector.shape_cast %143 : vector<2x8xf32> to vector<2x8x1xf32>
    %145 = vector.broadcast %144 : vector<2x8x1xf32> to vector<2x8x16xf32>
    %146 = arith.subf %142, %145 : vector<2x8x16xf32>
    %147 = math.exp %146 : vector<2x8x16xf32>
    %cst_86 = arith.constant dense<0.000000e+00> : vector<2x8xf32>
    %148 = vector.multi_reduction <add>, %147, %cst_86 [2] : vector<2x8x16xf32> to vector<2x8xf32>
    %149 = vector.shape_cast %148 : vector<2x8xf32> to vector<2x8x1xf32>
    %150 = tpu.reciprocal %149 : vector<2x8x1xf32> -> vector<2x8x1xf32>
    %151 = vector.broadcast %150 : vector<2x8x1xf32> to vector<2x8x16xf32>
    %152 = arith.mulf %147, %151 : vector<2x8x16xf32>
    %153 = vector.broadcast %34 : f32 to vector<2x8x16xf32>
    %154 = arith.mulf %153, %152 : vector<2x8x16xf32>
    %155 = arith.addf %154, %37 : vector<2x8x16xf32>
    %c0_87 = arith.constant 0 : index
    %c3 = arith.constant 3 : index
    %c0_88 = arith.constant 0 : index
    %c0_89 = arith.constant 0 : index
    %156 = vector.load %arg16[%c0_87, %c3, %c0_88, %c0_89] : memref<2x4x8x16xf32, #tpu.memory_space<vmem>>, vector<2x1x8x16xf32>
    %157 = vector.shape_cast %156 : vector<2x1x8x16xf32> to vector<2x8x16xf32>
    %158 = vector.shape_cast %155 : vector<2x8x16xf32> to vector<2x1x8x16xf32>
    tpu.vector_store %arg16[%c0_87, %c3, %c0_88, %c0_89], %158 {strides = array<i32>} : memref<2x4x8x16xf32, #tpu.memory_space<vmem>>, vector<2x1x8x16xf32>,
    %159 = arith.truncf %155 : vector<2x8x16xf32> to vector<2x8x16xbf16>
    %160 = vector.extract_strided_slice %26 {offsets = [0, 0, 24], sizes = [2, 16, 8], strides = [1, 1, 1]} : vector<2x16x32xbf16> to vector<2x16x8xbf16>
    "tpu.trace_start"() <{level = 10 : i32, message = "bqk,bkd->bqd"}> : () -> ()
    %cst_90 = arith.constant dense<0.000000e+00> : vector<2x8x8xf32>
    %161 = tpu.matmul %159, %160, %cst_90 {dimension_numbers = #tpu.dot_dimension_numbers<[2], [1], [1], [2], [0, 0, 0, 1, 1, 2], [0], [0]>} : vector<2x8x16xbf16>, vector<2x16x8xbf16>, vector<2x8x8xf32> -> vector<2x8x8xf32>
    "tpu.trace_stop"() : () -> ()
    %162 = arith.truncf %161 : vector<2x8x8xf32> to vector<2x8x8xbf16>
    %163 = vector.shape_cast %162 : vector<2x8x8xbf16> to vector<16x8xbf16>
    %c3_91 = arith.constant 3 : index
    %c0_92 = arith.constant 0 : index
    %c0_93 = arith.constant 0 : index
    %164 = vector.load %arg13[%c3_91, %c0_92, %c0_93] : memref<4x8x32xbf16, #tpu.memory_space<vmem>>, vector<1x8x32xbf16>
    %165 = vector.shape_cast %164 : vector<1x8x32xbf16> to vector<8x32xbf16>
    %cst_94 = arith.constant dense<0.000000e+00> : vector<16x32xf32>
    %166 = tpu.matmul %163, %165, %cst_94 {dimension_numbers = #tpu.dot_dimension_numbers<[1], [0], [0], [1], [0, 0, 1, 1], [], []>} : vector<16x8xbf16>, vector<8x32xbf16>, vector<16x32xf32> -> vector<16x32xf32>
    %c0_95 = arith.constant 0 : index
    %c0_96 = arith.constant 0 : index
    %c0_97 = arith.constant 0 : index
    %167 = vector.load %arg15[%c0_95, %c0_96, %c0_97] : memref<2x8x32xf32, #tpu.memory_space<vmem>>, vector<2x8x32xf32>
    %168 = vector.shape_cast %166 : vector<16x32xf32> to vector<2x8x32xf32>
    %169 = arith.addf %167, %168 : vector<2x8x32xf32>
    %c0_98 = arith.constant 0 : index
    %c0_99 = arith.constant 0 : index
    %c0_100 = arith.constant 0 : index
    %170 = vector.load %arg15[%c0_98, %c0_99, %c0_100] : memref<2x8x32xf32, #tpu.memory_space<vmem>>, vector<2x8x32xf32>
    tpu.vector_store %arg15[%c0_98, %c0_99, %c0_100], %169 {strides = array<i32>} : memref<2x8x32xf32, #tpu.memory_space<vmem>>, vector<2x8x32xf32>,
    return
  }
  func.func @transform_0(%arg0: i32) -> (i32, i32, i32) {
    %c0_i32 = arith.constant 0 : i32
    %c0_i32_0 = arith.constant 0 : i32
    %c0_i32_1 = arith.constant 0 : i32
    return %arg0, %c0_i32, %c0_i32_0 : i32, i32, i32
  }
  func.func @transform_1(%arg0: i32) -> (i32, i32, i32) {
    %c0_i32 = arith.constant 0 : i32
    %c0_i32_0 = arith.constant 0 : i32
    %c0_i32_1 = arith.constant 0 : i32
    return %arg0, %c0_i32, %c0_i32_0 : i32, i32, i32
  }
  func.func @transform_2(%arg0: i32) -> (i32, i32, i32) {
    %c0_i32 = arith.constant 0 : i32
    %c0_i32_0 = arith.constant 0 : i32
    %c0_i32_1 = arith.constant 0 : i32
    return %arg0, %c0_i32, %c0_i32_0 : i32, i32, i32
  }
  func.func @transform_3(%arg0: i32) -> (i32, i32, i32) {
    %c0_i32 = arith.constant 0 : i32
    %c0_i32_0 = arith.constant 0 : i32
    %c0_i32_1 = arith.constant 0 : i32
    return %arg0, %c0_i32, %c0_i32_0 : i32, i32, i32
  }
  func.func @transform_4(%arg0: i32) -> i32 {
    %c0_i32 = arith.constant 0 : i32
    %c0_i32_0 = arith.constant 0 : i32
    return %c0_i32 : i32
  }
  func.func @transform_5(%arg0: i32) -> (i32, i32, i32) {
    %c0_i32 = arith.constant 0 : i32
    %c0_i32_0 = arith.constant 0 : i32
    %c0_i32_1 = arith.constant 0 : i32
    return %arg0, %c0_i32, %c0_i32_0 : i32, i32, i32
  }
  func.func @transform_6(%arg0: i32) -> (i32, i32) {
    %c0_i32 = arith.constant 0 : i32
    %c0_i32_0 = arith.constant 0 : i32
    %c0_i32_1 = arith.constant 0 : i32
    return %c0_i32, %c0_i32_0 : i32, i32
  }
  func.func @transform_7(%arg0: i32) -> (i32, i32) {
    %c0_i32 = arith.constant 0 : i32
    %c0_i32_0 = arith.constant 0 : i32
    %c0_i32_1 = arith.constant 0 : i32
    return %c0_i32, %c0_i32_0 : i32, i32
  }
  func.func @transform_8(%arg0: i32) -> (i32, i32) {
    %c0_i32 = arith.constant 0 : i32
    %c0_i32_0 = arith.constant 0 : i32
    %c0_i32_1 = arith.constant 0 : i32
    return %c0_i32, %c0_i32_0 : i32, i32
  }
  func.func @transform_9(%arg0: i32) -> (i32, i32) {
    %c0_i32 = arith.constant 0 : i32
    %c0_i32_0 = arith.constant 0 : i32
    %c0_i32_1 = arith.constant 0 : i32
    return %c0_i32, %c0_i32_0 : i32, i32
  }
  func.func @transform_10(%arg0: i32) -> (i32, i32) {
    %c0_i32 = arith.constant 0 : i32
    %c0_i32_0 = arith.constant 0 : i32
    %c0_i32_1 = arith.constant 0 : i32
    return %c0_i32, %c0_i32_0 : i32, i32
  }
  func.func @transform_11(%arg0: i32) -> (i32, i32) {
    %c0_i32 = arith.constant 0 : i32
    %c0_i32_0 = arith.constant 0 : i32
    %c0_i32_1 = arith.constant 0 : i32
    return %c0_i32, %c0_i32_0 : i32, i32
  }
  func.func @transform_12(%arg0: i32) -> (i32, i32, i32) {
    %c0_i32 = arith.constant 0 : i32
    %c0_i32_0 = arith.constant 0 : i32
    %c0_i32_1 = arith.constant 0 : i32
    %c0_i32_2 = arith.constant 0 : i32
    return %c0_i32, %c0_i32_0, %c0_i32_1 : i32, i32, i32
  }
  func.func @transform_13(%arg0: i32) -> (i32, i32) {
    %c0_i32 = arith.constant 0 : i32
    %c0_i32_0 = arith.constant 0 : i32
    %c0_i32_1 = arith.constant 0 : i32
    return %c0_i32, %c0_i32_0 : i32, i32
  }
  func.func @transform_14(%arg0: i32) -> (i32, i32, i32) {
    %c0_i32 = arith.constant 0 : i32
    %c0_i32_0 = arith.constant 0 : i32
    %c0_i32_1 = arith.constant 0 : i32
    return %arg0, %c0_i32, %c0_i32_0 : i32, i32, i32
  }
  func.func @transform_15(%arg0: i32) -> (i32, i32, i32, i32) {
    %c0_i32 = arith.constant 0 : i32
    %c0_i32_0 = arith.constant 0 : i32
    %c0_i32_1 = arith.constant 0 : i32
    %c0_i32_2 = arith.constant 0 : i32
    return %arg0, %c0_i32, %c0_i32_0, %c0_i32_1 : i32, i32, i32, i32
  }
}

module attributes {stable_mosaic.version = 11 : i64} {
  func.func @_mha_kernel(%arg0: i32, %arg1: memref<2x8x32xbf16, #tpu.memory_space<vmem>>, %arg2: memref<2x16x32xbf16, #tpu.memory_space<vmem>>, %arg3: memref<2x16x32xbf16, #tpu.memory_space<vmem>>, %arg4: memref<2x8x16xf32, #tpu.memory_space<vmem>>, %arg5: memref<1xf32, #tpu.memory_space<smem>>, %arg6: memref<2x1x16xf32, #tpu.memory_space<vmem>>, %arg7: memref<32x32xbf16, #tpu.memory_space<vmem>>, %arg8: memref<1x32xf32, #tpu.memory_space<vmem>>, %arg9: memref<32x32xbf16, #tpu.memory_space<vmem>>, %arg10: memref<1x32xf32, #tpu.memory_space<vmem>>, %arg11: memref<32x32xbf16, #tpu.memory_space<vmem>>, %arg12: memref<1x32xf32, #tpu.memory_space<vmem>>, %arg13: memref<4x8x32xbf16, #tpu.memory_space<vmem>>, %arg14: memref<1x32xf32, #tpu.memory_space<vmem>>, %arg15: memref<2x8x32xf32, #tpu.memory_space<vmem>>, %arg16: memref<2x4x8x16xf32, #tpu.memory_space<vmem>>) attributes {dimension_semantics = [#tpu.dimension_semantics<parallel>], iteration_bounds = array<i64: 1>, scalar_prefetch = 0 : i64, scratch_operands = 0 : i64, tpu.core_type = #tpu.core_type<tc>, window_params = [{transform_indices = @transform_0, window_bounds = array<i64: 2, 8, 32>}, {transform_indices = @transform_1, window_bounds = array<i64: 2, 16, 32>}, {transform_indices = @transform_2, window_bounds = array<i64: 2, 16, 32>}, {transform_indices = @transform_3, window_bounds = array<i64: 2, 8, 16>}, {transform_indices = @transform_4, window_bounds = array<i64: 1>}, {transform_indices = @transform_5, window_bounds = array<i64: 2, 1, 16>}, {pipeline_mode = #tpu.pipeline_mode<synchronous>, transform_indices = @transform_6, window_bounds = array<i64: 32, 32>}, {pipeline_mode = #tpu.pipeline_mode<synchronous>, transform_indices = @transform_7, window_bounds = array<i64: 1, 32>}, {pipeline_mode = #tpu.pipeline_mode<synchronous>, transform_indices = @transform_8, window_bounds = array<i64: 32, 32>}, {pipeline_mode = #tpu.pipeline_mode<synchronous>, transform_indices = @transform_9, window_bounds = array<i64: 1, 32>}, {pipeline_mode = #tpu.pipeline_mode<synchronous>, transform_indices = @transform_10, window_bounds = array<i64: 32, 32>}, {pipeline_mode = #tpu.pipeline_mode<synchronous>, transform_indices = @transform_11, window_bounds = array<i64: 1, 32>}, {pipeline_mode = #tpu.pipeline_mode<synchronous>, transform_indices = @transform_12, window_bounds = array<i64: 4, 8, 32>}, {pipeline_mode = #tpu.pipeline_mode<synchronous>, transform_indices = @transform_13, window_bounds = array<i64: 1, 32>}, {transform_indices = @transform_14, window_bounds = array<i64: 2, 8, 32>}, {transform_indices = @transform_15, window_bounds = array<i64: 2, 4, 8, 16>}]} {
    %c0 = arith.constant 0 : index
    %c0_0 = arith.constant 0 : index
    %c0_1 = arith.constant 0 : index
    %0 = vector.load %arg1[%c0, %c0_0, %c0_1] : memref<2x8x32xbf16, #tpu.memory_space<vmem>>, vector<2x8x32xbf16>
    %1 = vector.shape_cast %0 : vector<2x8x32xbf16> to vector<16x32xbf16>
    %c0_2 = arith.constant 0 : index
    %c0_3 = arith.constant 0 : index
    %c0_4 = arith.constant 0 : index
    %2 = vector.load %arg2[%c0_2, %c0_3, %c0_4] : memref<2x16x32xbf16, #tpu.memory_space<vmem>>, vector<2x16x32xbf16>
    %3 = vector.shape_cast %2 : vector<2x16x32xbf16> to vector<32x32xbf16>
    %c0_5 = arith.constant 0 : index
    %c0_6 = arith.constant 0 : index
    %c0_7 = arith.constant 0 : index
    %4 = vector.load %arg3[%c0_5, %c0_6, %c0_7] : memref<2x16x32xbf16, #tpu.memory_space<vmem>>, vector<2x16x32xbf16>
    %5 = vector.shape_cast %4 : vector<2x16x32xbf16> to vector<32x32xbf16>
    %c0_8 = arith.constant 0 : index
    %c0_9 = arith.constant 0 : index
    %6 = vector.load %arg7[%c0_8, %c0_9] : memref<32x32xbf16, #tpu.memory_space<vmem>>, vector<32x32xbf16>
    %cst = arith.constant dense<0.000000e+00> : vector<16x32xf32>
    %7 = tpu.matmul %1, %6, %cst {dimension_numbers = #tpu.dot_dimension_numbers<[1], [0], [0], [1], [0, 0, 1, 1], [], []>} : vector<16x32xbf16>, vector<32x32xbf16>, vector<16x32xf32> -> vector<16x32xf32>
    %c0_10 = arith.constant 0 : index
    %c0_11 = arith.constant 0 : index
    %8 = vector.load %arg8[%c0_10, %c0_11] : memref<1x32xf32, #tpu.memory_space<vmem>>, vector<1x32xf32>
    %9 = vector.broadcast %8 : vector<1x32xf32> to vector<16x32xf32>
    %10 = arith.addf %7, %9 : vector<16x32xf32>
    %c0_12 = arith.constant 0 : index
    %c0_13 = arith.constant 0 : index
    %11 = vector.load %arg9[%c0_12, %c0_13] : memref<32x32xbf16, #tpu.memory_space<vmem>>, vector<32x32xbf16>
    %cst_14 = arith.constant dense<0.000000e+00> : vector<32x32xf32>
    %12 = tpu.matmul %3, %11, %cst_14 {dimension_numbers = #tpu.dot_dimension_numbers<[1], [0], [0], [1], [0, 0, 1, 1], [], []>} : vector<32x32xbf16>, vector<32x32xbf16>, vector<32x32xf32> -> vector<32x32xf32>
    %c0_15 = arith.constant 0 : index
    %c0_16 = arith.constant 0 : index
    %13 = vector.load %arg10[%c0_15, %c0_16] : memref<1x32xf32, #tpu.memory_space<vmem>>, vector<1x32xf32>
    %14 = vector.broadcast %13 : vector<1x32xf32> to vector<32x32xf32>
    %15 = arith.addf %12, %14 : vector<32x32xf32>
    %c0_17 = arith.constant 0 : index
    %c0_18 = arith.constant 0 : index
    %16 = vector.load %arg11[%c0_17, %c0_18] : memref<32x32xbf16, #tpu.memory_space<vmem>>, vector<32x32xbf16>
    %cst_19 = arith.constant dense<0.000000e+00> : vector<32x32xf32>
    %17 = tpu.matmul %5, %16, %cst_19 {dimension_numbers = #tpu.dot_dimension_numbers<[1], [0], [0], [1], [0, 0, 1, 1], [], []>} : vector<32x32xbf16>, vector<32x32xbf16>, vector<32x32xf32> -> vector<32x32xf32>
    %c0_20 = arith.constant 0 : index
    %c0_21 = arith.constant 0 : index
    %18 = vector.load %arg12[%c0_20, %c0_21] : memref<1x32xf32, #tpu.memory_space<vmem>>, vector<1x32xf32>
    %19 = vector.broadcast %18 : vector<1x32xf32> to vector<32x32xf32>
    %20 = arith.addf %17, %19 : vector<32x32xf32>
    %21 = arith.truncf %10 : vector<16x32xf32> to vector<16x32xbf16>
    %22 = vector.shape_cast %21 : vector<16x32xbf16> to vector<2x8x32xbf16>
    %23 = arith.truncf %15 : vector<32x32xf32> to vector<32x32xbf16>
    %24 = vector.shape_cast %23 : vector<32x32xbf16> to vector<2x16x32xbf16>
    %25 = arith.truncf %20 : vector<32x32xf32> to vector<32x32xbf16>
    %26 = vector.shape_cast %25 : vector<32x32xbf16> to vector<2x16x32xbf16>
    %c0_22 = arith.constant 0 : index
    %c0_23 = arith.constant 0 : index
    %c0_24 = arith.constant 0 : index
    %27 = vector.load %arg6[%c0_22, %c0_23, %c0_24] : memref<2x1x16xf32, #tpu.memory_space<vmem>>, vector<2x1x16xf32>
    %cst_25 = arith.constant 5.000000e-01 : f32
    %28 = vector.broadcast %cst_25 : f32 to vector<2x1x16xf32>
    %29 = arith.cmpf ogt, %27, %28 : vector<2x1x16xf32>
    %cst_26 = arith.constant 0xFF800000 : f32
    %cst_27 = arith.constant 0.000000e+00 : f32
    %30 = vector.broadcast %cst_26 : f32 to vector<2x1x16xf32>
    %31 = vector.broadcast %cst_27 : f32 to vector<2x1x16xf32>
    %32 = arith.select %29, %30, %31 : vector<2x1x16xi1>, vector<2x1x16xf32>
    %c0_28 = arith.constant 0 : index
    %33 = memref.load %arg5[%c0_28] : memref<1xf32, #tpu.memory_space<smem>>
    %cst_29 = arith.constant 1.000000e+00 : f32
    %34 = arith.subf %cst_29, %33 : f32
    %c0_30 = arith.constant 0 : index
    %c0_31 = arith.constant 0 : index
    %c0_32 = arith.constant 0 : index
    %35 = vector.load %arg4[%c0_30, %c0_31, %c0_32] : memref<2x8x16xf32, #tpu.memory_space<vmem>>, vector<2x8x16xf32>
    %36 = vector.broadcast %33 : f32 to vector<2x8x16xf32>
    %37 = arith.mulf %36, %35 : vector<2x8x16xf32>
    %38 = vector.extract_strided_slice %22 {offsets = [0, 0, 0], sizes = [2, 8, 8], strides = [1, 1, 1]} : vector<2x8x32xbf16> to vector<2x8x8xbf16>
    %39 = vector.extract_strided_slice %24 {offsets = [0, 0, 0], sizes = [2, 16, 8], strides = [1, 1, 1]} : vector<2x16x32xbf16> to vector<2x16x8xbf16>
    "tpu.trace_start"() <{level = 10 : i32, message = "bqd,bkd->bqk"}> : () -> ()
    %cst_33 = arith.constant dense<0.000000e+00> : vector<2x8x16xf32>
    %40 = tpu.matmul %38, %39, %cst_33 {dimension_numbers = #tpu.dot_dimension_numbers<[2], [2], [1], [1], [0, 0, 0, 1, 1, 1], [0], [0]>} : vector<2x8x8xbf16>, vector<2x16x8xbf16>, vector<2x8x16xf32> -> vector<2x8x16xf32>
    "tpu.trace_stop"() : () -> ()
    %41 = vector.broadcast %32 : vector<2x1x16xf32> to vector<2x8x16xf32>
    %42 = arith.addf %40, %41 : vector<2x8x16xf32>
    %cst_34 = arith.constant dense<0xFF800000> : vector<2x8xf32>
    %43 = vector.multi_reduction <maximumf>, %42, %cst_34 [2] : vector<2x8x16xf32> to vector<2x8xf32>
    %44 = vector.shape_cast %43 : vector<2x8xf32> to vector<2x8x1xf32>
    %45 = vector.broadcast %44 : vector<2x8x1xf32> to vector<2x8x16xf32>
    %46 = arith.subf %42, %45 : vector<2x8x16xf32>
    %47 = math.exp %46 : vector<2x8x16xf32>
    %cst_35 = arith.constant dense<0.000000e+00> : vector<2x8xf32>
    %48 = vector.multi_reduction <add>, %47, %cst_35 [2] : vector<2x8x16xf32> to vector<2x8xf32>
    %49 = vector.shape_cast %48 : vector<2x8xf32> to vector<2x8x1xf32>
    %50 = tpu.reciprocal %49 : vector<2x8x1xf32> -> vector<2x8x1xf32>
    %51 = vector.broadcast %50 : vector<2x8x1xf32> to vector<2x8x16xf32>
    %52 = arith.mulf %47, %51 : vector<2x8x16xf32>
    %53 = vector.broadcast %34 : f32 to vector<2x8x16xf32>
    %54 = arith.mulf %53, %52 : vector<2x8x16xf32>
    %55 = arith.addf %54, %37 : vector<2x8x16xf32>
    %c0_36 = arith.constant 0 : index
    %c0_37 = arith.constant 0 : index
    %c0_38 = arith.constant 0 : index
    %c0_39 = arith.constant 0 : index
    %56 = vector.load %arg16[%c0_36, %c0_37, %c0_38, %c0_39] : memref<2x4x8x16xf32, #tpu.memory_space<vmem>>, vector<2x1x8x16xf32>
    %57 = vector.shape_cast %56 : vector<2x1x8x16xf32> to vector<2x8x16xf32>
    %58 = vector.shape_cast %55 : vector<2x8x16xf32> to vector<2x1x8x16xf32>
    tpu.vector_store %arg16[%c0_36, %c0_37, %c0_38, %c0_39], %58 {strides = array<i32>} : memref<2x4x8x16xf32, #tpu.memory_space<vmem>>, vector<2x1x8x16xf32>,
    %59 = arith.truncf %55 : vector<2x8x16xf32> to vector<2x8x16xbf16>
    %60 = vector.extract_strided_slice %26 {offsets = [0, 0, 0], sizes = [2, 16, 8], strides = [1, 1, 1]} : vector<2x16x32xbf16> to vector<2x16x8xbf16>
    "tpu.trace_start"() <{level = 10 : i32, message = "bqk,bkd->bqd"}> : () -> ()
    %cst_40 = arith.constant dense<0.000000e+00> : vector<2x8x8xf32>
    %61 = tpu.matmul %59, %60, %cst_40 {dimension_numbers = #tpu.dot_dimension_numbers<[2], [1], [1], [2], [0, 0, 0, 1, 1, 2], [0], [0]>} : vector<2x8x16xbf16>, vector<2x16x8xbf16>, vector<2x8x8xf32> -> vector<2x8x8xf32>
    "tpu.trace_stop"() : () -> ()
    %62 = arith.truncf %61 : vector<2x8x8xf32> to vector<2x8x8xbf16>
    %63 = vector.shape_cast %62 : vector<2x8x8xbf16> to vector<16x8xbf16>
    %c0_41 = arith.constant 0 : index
    %c0_42 = arith.constant 0 : index
    %c0_43 = arith.constant 0 : index
    %64 = vector.load %arg13[%c0_41, %c0_42, %c0_43] : memref<4x8x32xbf16, #tpu.memory_space<vmem>>, vector<1x8x32xbf16>
    %65 = vector.shape_cast %64 : vector<1x8x32xbf16> to vector<8x32xbf16>
    %cst_44 = arith.constant dense<0.000000e+00> : vector<16x32xf32>
    %66 = tpu.matmul %63, %65, %cst_44 {dimension_numbers = #tpu.dot_dimension_numbers<[1], [0], [0], [1], [0, 0, 1, 1], [], []>} : vector<16x8xbf16>, vector<8x32xbf16>, vector<16x32xf32> -> vector<16x32xf32>
    %c0_45 = arith.constant 0 : index
    %c0_46 = arith.constant 0 : index
    %67 = vector.load %arg14[%c0_45, %c0_46] : memref<1x32xf32, #tpu.memory_space<vmem>>, vector<1x32xf32>
    %68 = vector.broadcast %67 : vector<1x32xf32> to vector<16x32xf32>
    %69 = arith.addf %66, %68 : vector<16x32xf32>
    %70 = vector.shape_cast %69 : vector<16x32xf32> to vector<2x8x32xf32>
    %c0_47 = arith.constant 0 : index
    %c0_48 = arith.constant 0 : index
    %c0_49 = arith.constant 0 : index
    %71 = vector.load %arg15[%c0_47, %c0_48, %c0_49] : memref<2x8x32xf32, #tpu.memory_space<vmem>>, vector<2x8x32xf32>
    tpu.vector_store %arg15[%c0_47, %c0_48, %c0_49], %70 {strides = array<i32>} : memref<2x8x32xf32, #tpu.memory_space<vmem>>, vector<2x8x32xf32>,
    %72 = vector.extract_strided_slice %22 {offsets = [0, 0, 8], sizes = [2, 8, 8], strides = [1, 1, 1]} : vector<2x8x32xbf16> to vector<2x8x8xbf16>
    %73 = vector.extract_strided_slice %24 {offsets = [0, 0, 8], sizes = [2, 16, 8], strides = [1, 1, 1]} : vector<2x16x32xbf16> to vector<2x16x8xbf16>
    "tpu.trace_start"() <{level = 10 : i32, message = "bqd,bkd->bqk"}> : () -> ()
    %cst_50 = arith.constant dense<0.000000e+00> : vector<2x8x16xf32>
    %74 = tpu.matmul %72, %73, %cst_50 {dimension_numbers = #tpu.dot_dimension_numbers<[2], [2], [1], [1], [0, 0, 0, 1, 1, 1], [0], [0]>} : vector<2x8x8xbf16>, vector<2x16x8xbf16>, vector<2x8x16xf32> -> vector<2x8x16xf32>
    "tpu.trace_stop"() : () -> ()
    %75 = vector.broadcast %32 : vector<2x1x16xf32> to vector<2x8x16xf32>
    %76 = arith.addf %74, %75 : vector<2x8x16xf32>
    %cst_51 = arith.constant dense<0xFF800000> : vector<2x8xf32>
    %77 = vector.multi_reduction <maximumf>, %76, %cst_51 [2] : vector<2x8x16xf32> to vector<2x8xf32>
    %78 = vector.shape_cast %77 : vector<2x8xf32> to vector<2x8x1xf32>
    %79 = vector.broadcast %78 : vector<2x8x1xf32> to vector<2x8x16xf32>
    %80 = arith.subf %76, %79 : vector<2x8x16xf32>
    %81 = math.exp %80 : vector<2x8x16xf32>
    %cst_52 = arith.constant dense<0.000000e+00> : vector<2x8xf32>
    %82 = vector.multi_reduction <add>, %81, %cst_52 [2] : vector<2x8x16xf32> to vector<2x8xf32>
    %83 = vector.shape_cast %82 : vector<2x8xf32> to vector<2x8x1xf32>
    %84 = tpu.reciprocal %83 : vector<2x8x1xf32> -> vector<2x8x1xf32>
    %85 = vector.broadcast %84 : vector<2x8x1xf32> to vector<2x8x16xf32>
    %86 = arith.mulf %81, %85 : vector<2x8x16xf32>
    %87 = vector.broadcast %34 : f32 to vector<2x8x16xf32>
    %88 = arith.mulf %87, %86 : vector<2x8x16xf32>
    %89 = arith.addf %88, %37 : vector<2x8x16xf32>
    %c0_53 = arith.constant 0 : index
    %c1 = arith.constant 1 : index
    %c0_54 = arith.constant 0 : index
    %c0_55 = arith.constant 0 : index
    %90 = vector.load %arg16[%c0_53, %c1, %c0_54, %c0_55] : memref<2x4x8x16xf32, #tpu.memory_space<vmem>>, vector<2x1x8x16xf32>
    %91 = vector.shape_cast %90 : vector<2x1x8x16xf32> to vector<2x8x16xf32>
    %92 = vector.shape_cast %89 : vector<2x8x16xf32> to vector<2x1x8x16xf32>
    tpu.vector_store %arg16[%c0_53, %c1, %c0_54, %c0_55], %92 {strides = array<i32>} : memref<2x4x8x16xf32, #tpu.memory_space<vmem>>, vector<2x1x8x16xf32>,
    %93 = arith.truncf %89 : vector<2x8x16xf32> to vector<2x8x16xbf16>
    %94 = vector.extract_strided_slice %26 {offsets = [0, 0, 8], sizes = [2, 16, 8], strides = [1, 1, 1]} : vector<2x16x32xbf16> to vector<2x16x8xbf16>
    "tpu.trace_start"() <{level = 10 : i32, message = "bqk,bkd->bqd"}> : () -> ()
    %cst_56 = arith.constant dense<0.000000e+00> : vector<2x8x8xf32>
    %95 = tpu.matmul %93, %94, %cst_56 {dimension_numbers = #tpu.dot_dimension_numbers<[2], [1], [1], [2], [0, 0, 0, 1, 1, 2], [0], [0]>} : vector<2x8x16xbf16>, vector<2x16x8xbf16>, vector<2x8x8xf32> -> vector<2x8x8xf32>
    "tpu.trace_stop"() : () -> ()
    %96 = arith.truncf %95 : vector<2x8x8xf32> to vector<2x8x8xbf16>
    %97 = vector.shape_cast %96 : vector<2x8x8xbf16> to vector<16x8xbf16>
    %c1_57 = arith.constant 1 : index
    %c0_58 = arith.constant 0 : index
    %c0_59 = arith.constant 0 : index
    %98 = vector.load %arg13[%c1_57, %c0_58, %c0_59] : memref<4x8x32xbf16, #tpu.memory_space<vmem>>, vector<1x8x32xbf16>
    %99 = vector.shape_cast %98 : vector<1x8x32xbf16> to vector<8x32xbf16>
    %cst_60 = arith.constant dense<0.000000e+00> : vector<16x32xf32>
    %100 = tpu.matmul %97, %99, %cst_60 {dimension_numbers = #tpu.dot_dimension_numbers<[1], [0], [0], [1], [0, 0, 1, 1], [], []>} : vector<16x8xbf16>, vector<8x32xbf16>, vector<16x32xf32> -> vector<16x32xf32>
    %c0_61 = arith.constant 0 : index
    %c0_62 = arith.constant 0 : index
    %c0_63 = arith.constant 0 : index
    %101 = vector.load %arg15[%c0_61, %c0_62, %c0_63] : memref<2x8x32xf32, #tpu.memory_space<vmem>>, vector<2x8x32xf32>
    %102 = vector.shape_cast %100 : vector<16x32xf32> to vector<2x8x32xf32>
    %103 = arith.addf %101, %102 : vector<2x8x32xf32>
    %c0_64 = arith.constant 0 : index
    %c0_65 = arith.constant 0 : index
    %c0_66 = arith.constant 0 : index
    %104 = vector.load %arg15[%c0_64, %c0_65, %c0_66] : memref<2x8x32xf32, #tpu.memory_space<vmem>>, vector<2x8x32xf32>
    tpu.vector_store %arg15[%c0_64, %c0_65, %c0_66], %103 {strides = array<i32>} : memref<2x8x32xf32, #tpu.memory_space<vmem>>, vector<2x8x32xf32>,
    %105 = vector.extract_strided_slice %22 {offsets = [0, 0, 16], sizes = [2, 8, 8], strides = [1, 1, 1]} : vector<2x8x32xbf16> to vector<2x8x8xbf16>
    %106 = vector.extract_strided_slice %24 {offsets = [0, 0, 16], sizes = [2, 16, 8], strides = [1, 1, 1]} : vector<2x16x32xbf16> to vector<2x16x8xbf16>
    "tpu.trace_start"() <{level = 10 : i32, message = "bqd,bkd->bqk"}> : () -> ()
    %cst_67 = arith.constant dense<0.000000e+00> : vector<2x8x16xf32>
    %107 = tpu.matmul %105, %106, %cst_67 {dimension_numbers = #tpu.dot_dimension_numbers<[2], [2], [1], [1], [0, 0, 0, 1, 1, 1], [0], [0]>} : vector<2x8x8xbf16>, vector<2x16x8xbf16>, vector<2x8x16xf32> -> vector<2x8x16xf32>
    "tpu.trace_stop"() : () -> ()
    %108 = vector.broadcast %32 : vector<2x1x16xf32> to vector<2x8x16xf32>
    %109 = arith.addf %107, %108 : vector<2x8x16xf32>
    %cst_68 = arith.constant dense<0xFF800000> : vector<2x8xf32>
    %110 = vector.multi_reduction <maximumf>, %109, %cst_68 [2] : vector<2x8x16xf32> to vector<2x8xf32>
    %111 = vector.shape_cast %110 : vector<2x8xf32> to vector<2x8x1xf32>
    %112 = vector.broadcast %111 : vector<2x8x1xf32> to vector<2x8x16xf32>
    %113 = arith.subf %109, %112 : vector<2x8x16xf32>
    %114 = math.exp %113 : vector<2x8x16xf32>
    %cst_69 = arith.constant dense<0.000000e+00> : vector<2x8xf32>
    %115 = vector.multi_reduction <add>, %114, %cst_69 [2] : vector<2x8x16xf32> to vector<2x8xf32>
    %116 = vector.shape_cast %115 : vector<2x8xf32> to vector<2x8x1xf32>
    %117 = tpu.reciprocal %116 : vector<2x8x1xf32> -> vector<2x8x1xf32>
    %118 = vector.broadcast %117 : vector<2x8x1xf32> to vector<2x8x16xf32>
    %119 = arith.mulf %114, %118 : vector<2x8x16xf32>
    %120 = vector.broadcast %34 : f32 to vector<2x8x16xf32>
    %121 = arith.mulf %120, %119 : vector<2x8x16xf32>
    %122 = arith.addf %121, %37 : vector<2x8x16xf32>
    %c0_70 = arith.constant 0 : index
    %c2 = arith.constant 2 : index
    %c0_71 = arith.constant 0 : index
    %c0_72 = arith.constant 0 : index
    %123 = vector.load %arg16[%c0_70, %c2, %c0_71, %c0_72] : memref<2x4x8x16xf32, #tpu.memory_space<vmem>>, vector<2x1x8x16xf32>
    %124 = vector.shape_cast %123 : vector<2x1x8x16xf32> to vector<2x8x16xf32>
    %125 = vector.shape_cast %122 : vector<2x8x16xf32> to vector<2x1x8x16xf32>
    tpu.vector_store %arg16[%c0_70, %c2, %c0_71, %c0_72], %125 {strides = array<i32>} : memref<2x4x8x16xf32, #tpu.memory_space<vmem>>, vector<2x1x8x16xf32>,
    %126 = arith.truncf %122 : vector<2x8x16xf32> to vector<2x8x16xbf16>
    %127 = vector.extract_strided_slice %26 {offsets = [0, 0, 16], sizes = [2, 16, 8], strides = [1, 1, 1]} : vector<2x16x32xbf16> to vector<2x16x8xbf16>
    "tpu.trace_start"() <{level = 10 : i32, message = "bqk,bkd->bqd"}> : () -> ()
    %cst_73 = arith.constant dense<0.000000e+00> : vector<2x8x8xf32>
    %128 = tpu.matmul %126, %127, %cst_73 {dimension_numbers = #tpu.dot_dimension_numbers<[2], [1], [1], [2], [0, 0, 0, 1, 1, 2], [0], [0]>} : vector<2x8x16xbf16>, vector<2x16x8xbf16>, vector<2x8x8xf32> -> vector<2x8x8xf32>
    "tpu.trace_stop"() : () -> ()
    %129 = arith.truncf %128 : vector<2x8x8xf32> to vector<2x8x8xbf16>
    %130 = vector.shape_cast %129 : vector<2x8x8xbf16> to vector<16x8xbf16>
    %c2_74 = arith.constant 2 : index
    %c0_75 = arith.constant 0 : index
    %c0_76 = arith.constant 0 : index
    %131 = vector.load %arg13[%c2_74, %c0_75, %c0_76] : memref<4x8x32xbf16, #tpu.memory_space<vmem>>, vector<1x8x32xbf16>
    %132 = vector.shape_cast %131 : vector<1x8x32xbf16> to vector<8x32xbf16>
    %cst_77 = arith.constant dense<0.000000e+00> : vector<16x32xf32>
    %133 = tpu.matmul %130, %132, %cst_77 {dimension_numbers = #tpu.dot_dimension_numbers<[1], [0], [0], [1], [0, 0, 1, 1], [], []>} : vector<16x8xbf16>, vector<8x32xbf16>, vector<16x32xf32> -> vector<16x32xf32>
    %c0_78 = arith.constant 0 : index
    %c0_79 = arith.constant 0 : index
    %c0_80 = arith.constant 0 : index
    %134 = vector.load %arg15[%c0_78, %c0_79, %c0_80] : memref<2x8x32xf32, #tpu.memory_space<vmem>>, vector<2x8x32xf32>
    %135 = vector.shape_cast %133 : vector<16x32xf32> to vector<2x8x32xf32>
    %136 = arith.addf %134, %135 : vector<2x8x32xf32>
    %c0_81 = arith.constant 0 : index
    %c0_82 = arith.constant 0 : index
    %c0_83 = arith.constant 0 : index
    %137 = vector.load %arg15[%c0_81, %c0_82, %c0_83] : memref<2x8x32xf32, #tpu.memory_space<vmem>>, vector<2x8x32xf32>
    tpu.vector_store %arg15[%c0_81, %c0_82, %c0_83], %136 {strides = array<i32>} : memref<2x8x32xf32, #tpu.memory_space<vmem>>, vector<2x8x32xf32>,
    %138 = vector.extract_strided_slice %22 {offsets = [0, 0, 24], sizes = [2, 8, 8], strides = [1, 1, 1]} : vector<2x8x32xbf16> to vector<2x8x8xbf16>
    %139 = vector.extract_strided_slice %24 {offsets = [0, 0, 24], sizes = [2, 16, 8], strides = [1, 1, 1]} : vector<2x16x32xbf16> to vector<2x16x8xbf16>
    "tpu.trace_start"() <{level = 10 : i32, message = "bqd,bkd->bqk"}> : () -> ()
    %cst_84 = arith.constant dense<0.000000e+00> : vector<2x8x16xf32>
    %140 = tpu.matmul %138, %139, %cst_84 {dimension_numbers = #tpu.dot_dimension_numbers<[2], [2], [1], [1], [0, 0, 0, 1, 1, 1], [0], [0]>} : vector<2x8x8xbf16>, vector<2x16x8xbf16>, vector<2x8x16xf32> -> vector<2x8x16xf32>
    "tpu.trace_stop"() : () -> ()
    %141 = vector.broadcast %32 : vector<2x1x16xf32> to vector<2x8x16xf32>
    %142 = arith.addf %140, %141 : vector<2x8x16xf32>
    %cst_85 = arith.constant dense<0xFF800000> : vector<2x8xf32>
    %143 = vector.multi_reduction <maximumf>, %142, %cst_85 [2] : vector<2x8x16xf32> to vector<2x8xf32>
    %144 = vector.shape_cast %143 : vector<2x8xf32> to vector<2x8x1xf32>
    %145 = vector.broadcast %144 : vector<2x8x1xf32> to vector<2x8x16xf32>
    %146 = arith.subf %142, %145 : vector<2x8x16xf32>
    %147 = math.exp %146 : vector<2x8x16xf32>
    %cst_86 = arith.constant dense<0.000000e+00> : vector<2x8xf32>
    %148 = vector.multi_reduction <add>, %147, %cst_86 [2] : vector<2x8x16xf32> to vector<2x8xf32>
    %149 = vector.shape_cast %148 : vector<2x8xf32> to vector<2x8x1xf32>
    %150 = tpu.reciprocal %149 : vector<2x8x1xf32> -> vector<2x8x1xf32>
    %151 = vector.broadcast %150 : vector<2x8x1xf32> to vector<2x8x16xf32>
    %152 = arith.mulf %147, %151 : vector<2x8x16xf32>
    %153 = vector.broadcast %34 : f32 to vector<2x8x16xf32>
    %154 = arith.mulf %153, %152 : vector<2x8x16xf32>
    %155 = arith.addf %154, %37 : vector<2x8x16xf32>
    %c0_87 = arith.constant 0 : index
    %c3 = arith.constant 3 : index
    %c0_88 = arith.constant 0 : index
    %c0_89 = arith.constant 0 : index
    %156 = vector.load %arg16[%c0_87, %c3, %c0_88, %c0_89] : memref<2x4x8x16xf32, #tpu.memory_space<vmem>>, vector<2x1x8x16xf32>
    %157 = vector.shape_cast %156 : vector<2x1x8x16xf32> to vector<2x8x16xf32>
    %158 = vector.shape_cast %155 : vector<2x8x16xf32> to vector<2x1x8x16xf32>
    tpu.vector_store %arg16[%c0_87, %c3, %c0_88, %c0_89], %158 {strides = array<i32>} : memref<2x4x8x16xf32, #tpu.memory_space<vmem>>, vector<2x1x8x16xf32>,
    %159 = arith.truncf %155 : vector<2x8x16xf32> to vector<2x8x16xbf16>
    %160 = vector.extract_strided_slice %26 {offsets = [0, 0, 24], sizes = [2, 16, 8], strides = [1, 1, 1]} : vector<2x16x32xbf16> to vector<2x16x8xbf16>
    "tpu.trace_start"() <{level = 10 : i32, message = "bqk,bkd->bqd"}> : () -> ()
    %cst_90 = arith.constant dense<0.000000e+00> : vector<2x8x8xf32>
    %161 = tpu.matmul %159, %160, %cst_90 {dimension_numbers = #tpu.dot_dimension_numbers<[2], [1], [1], [2], [0, 0, 0, 1, 1, 2], [0], [0]>} : vector<2x8x16xbf16>, vector<2x16x8xbf16>, vector<2x8x8xf32> -> vector<2x8x8xf32>
    "tpu.trace_stop"() : () -> ()
    %162 = arith.truncf %161 : vector<2x8x8xf32> to vector<2x8x8xbf16>
    %163 = vector.shape_cast %162 : vector<2x8x8xbf16> to vector<16x8xbf16>
    %c3_91 = arith.constant 3 : index
    %c0_92 = arith.constant 0 : index
    %c0_93 = arith.constant 0 : index
    %164 = vector.load %arg13[%c3_91, %c0_92, %c0_93] : memref<4x8x32xbf16, #tpu.memory_space<vmem>>, vector<1x8x32xbf16>
    %165 = vector.shape_cast %164 : vector<1x8x32xbf16> to vector<8x32xbf16>
    %cst_94 = arith.constant dense<0.000000e+00> : vector<16x32xf32>
    %166 = tpu.matmul %163, %165, %cst_94 {dimension_numbers = #tpu.dot_dimension_numbers<[1], [0], [0], [1], [0, 0, 1, 1], [], []>} : vector<16x8xbf16>, vector<8x32xbf16>, vector<16x32xf32> -> vector<16x32xf32>
    %c0_95 = arith.constant 0 : index
    %c0_96 = arith.constant 0 : index
    %c0_97 = arith.constant 0 : index
    %167 = vector.load %arg15[%c0_95, %c0_96, %c0_97] : memref<2x8x32xf32, #tpu.memory_space<vmem>>, vector<2x8x32xf32>
    %168 = vector.shape_cast %166 : vector<16x32xf32> to vector<2x8x32xf32>
    %169 = arith.addf %167, %168 : vector<2x8x32xf32>
    %c0_98 = arith.constant 0 : index
    %c0_99 = arith.constant 0 : index
    %c0_100 = arith.constant 0 : index
    %170 = vector.load %arg15[%c0_98, %c0_99, %c0_100] : memref<2x8x32xf32, #tpu.memory_space<vmem>>, vector<2x8x32xf32>
    tpu.vector_store %arg15[%c0_98, %c0_99, %c0_100], %169 {strides = array<i32>} : memref<2x8x32xf32, #tpu.memory_space<vmem>>, vector<2x8x32xf32>,
    return
  }
  func.func @transform_0(%arg0: i32) -> (i32, i32, i32) {
    %c0_i32 = arith.constant 0 : i32
    %c0_i32_0 = arith.constant 0 : i32
    %c0_i32_1 = arith.constant 0 : i32
    return %arg0, %c0_i32, %c0_i32_0 : i32, i32, i32
  }
  func.func @transform_1(%arg0: i32) -> (i32, i32, i32) {
    %c0_i32 = arith.constant 0 : i32
    %c0_i32_0 = arith.constant 0 : i32
    %c0_i32_1 = arith.constant 0 : i32
    return %arg0, %c0_i32, %c0_i32_0 : i32, i32, i32
  }
  func.func @transform_2(%arg0: i32) -> (i32, i32, i32) {
    %c0_i32 = arith.constant 0 : i32
    %c0_i32_0 = arith.constant 0 : i32
    %c0_i32_1 = arith.constant 0 : i32
    return %arg0, %c0_i32, %c0_i32_0 : i32, i32, i32
  }
  func.func @transform_3(%arg0: i32) -> (i32, i32, i32) {
    %c0_i32 = arith.constant 0 : i32
    %c0_i32_0 = arith.constant 0 : i32
    %c0_i32_1 = arith.constant 0 : i32
    return %arg0, %c0_i32, %c0_i32_0 : i32, i32, i32
  }
  func.func @transform_4(%arg0: i32) -> i32 {
    %c0_i32 = arith.constant 0 : i32
    %c0_i32_0 = arith.constant 0 : i32
    return %c0_i32 : i32
  }
  func.func @transform_5(%arg0: i32) -> (i32, i32, i32) {
    %c0_i32 = arith.constant 0 : i32
    %c0_i32_0 = arith.constant 0 : i32
    %c0_i32_1 = arith.constant 0 : i32
    return %arg0, %c0_i32, %c0_i32_0 : i32, i32, i32
  }
  func.func @transform_6(%arg0: i32) -> (i32, i32) {
    %c0_i32 = arith.constant 0 : i32
    %c0_i32_0 = arith.constant 0 : i32
    %c0_i32_1 = arith.constant 0 : i32
    return %c0_i32, %c0_i32_0 : i32, i32
  }
  func.func @transform_7(%arg0: i32) -> (i32, i32) {
    %c0_i32 = arith.constant 0 : i32
    %c0_i32_0 = arith.constant 0 : i32
    %c0_i32_1 = arith.constant 0 : i32
    return %c0_i32, %c0_i32_0 : i32, i32
  }
  func.func @transform_8(%arg0: i32) -> (i32, i32) {
    %c0_i32 = arith.constant 0 : i32
    %c0_i32_0 = arith.constant 0 : i32
    %c0_i32_1 = arith.constant 0 : i32
    return %c0_i32, %c0_i32_0 : i32, i32
  }
  func.func @transform_9(%arg0: i32) -> (i32, i32) {
    %c0_i32 = arith.constant 0 : i32
    %c0_i32_0 = arith.constant 0 : i32
    %c0_i32_1 = arith.constant 0 : i32
    return %c0_i32, %c0_i32_0 : i32, i32
  }
  func.func @transform_10(%arg0: i32) -> (i32, i32) {
    %c0_i32 = arith.constant 0 : i32
    %c0_i32_0 = arith.constant 0 : i32
    %c0_i32_1 = arith.constant 0 : i32
    return %c0_i32, %c0_i32_0 : i32, i32
  }
  func.func @transform_11(%arg0: i32) -> (i32, i32) {
    %c0_i32 = arith.constant 0 : i32
    %c0_i32_0 = arith.constant 0 : i32
    %c0_i32_1 = arith.constant 0 : i32
    return %c0_i32, %c0_i32_0 : i32, i32
  }
  func.func @transform_12(%arg0: i32) -> (i32, i32, i32) {
    %c0_i32 = arith.constant 0 : i32
    %c0_i32_0 = arith.constant 0 : i32
    %c0_i32_1 = arith.constant 0 : i32
    %c0_i32_2 = arith.constant 0 : i32
    return %c0_i32, %c0_i32_0, %c0_i32_1 : i32, i32, i32
  }
  func.func @transform_13(%arg0: i32) -> (i32, i32) {
    %c0_i32 = arith.constant 0 : i32
    %c0_i32_0 = arith.constant 0 : i32
    %c0_i32_1 = arith.constant 0 : i32
    return %c0_i32, %c0_i32_0 : i32, i32
  }
  func.func @transform_14(%arg0: i32) -> (i32, i32, i32) {
    %c0_i32 = arith.constant 0 : i32
    %c0_i32_0 = arith.constant 0 : i32
    %c0_i32_1 = arith.constant 0 : i32
    return %arg0, %c0_i32, %c0_i32_0 : i32, i32, i32
  }
  func.func @transform_15(%arg0: i32) -> (i32, i32, i32, i32) {
    %c0_i32 = arith.constant 0 : i32
    %c0_i32_0 = arith.constant 0 : i32
    %c0_i32_1 = arith.constant 0 : i32
    %c0_i32_2 = arith.constant 0 : i32
    return %arg0, %c0_i32, %c0_i32_0, %c0_i32_1 : i32, i32, i32, i32
  }
}

</mosaic_0001>

<bundles_post_ra>
// kernel: tpu_custom_call.1
= control target key start
LH: loop header
LB: loop body
LE: loop exit
PB: predicated region body
PF: predicated region fallthrough
CT: control target
= control target key end

     0   :  { %22 = vsyncpa [#allocation4], 0  ;;  %s2588_s0 = inlined_call_operand.hbm [shape: bf16[2,8,32], index: 0, kind: input, shape index: {}]   ;;  %s2589_s1 = inlined_call_operand.hbm [shape: bf16[2,16,32], index: 1, kind: input, shape index: {}]   ;;  %s2590_s2 = inlined_call_operand.hbm [shape: bf16[2,16,32], index: 2, kind: input, shape index: {}]   ;;  %s2591_s3 = inlined_call_operand.hbm [shape: f32[2,8,16], index: 3, kind: input, shape index: {}]   ;;  %s2592_s4 = inlined_call_operand.<no memory space> [shape: f32[1], index: 4, kind: input, shape index: {}]   ;;  %s2593_s5 = inlined_call_operand.vmem [shape: f32[2,1,16], index: 5, kind: input, shape index: {}]   ;;  %s2594_s6 = inlined_call_operand.hbm [shape: bf16[32,32], index: 6, kind: input, shape index: {}]   ;;  %s2595_s7 = inlined_call_operand.hbm [shape: f32[1,32], index: 7, kind: input, shape index: {}]   ;;  %s2596_s8 = inlined_call_operand.hbm [shape: bf16[32,32], index: 8, kind: input, shape index: {}]   ;;  %s2597_s9 = inlined_call_operand.hbm [shape: f32[1,32], index: 9, kind: input, shape index: {}]   ;;  %s2598_s10 = inlined_call_operand.vmem [shape: bf16[32,32], index: 10, kind: input, shape index: {}]   ;;  %s2599_s11 = inlined_call_operand.vmem [shape: f32[1,32], index: 11, kind: input, shape index: {}]   ;;  %s2600_s12 = inlined_call_operand.hbm [shape: bf16[4,8,32], index: 12, kind: input, shape index: {}]   ;;  %s2601_s13 = inlined_call_operand.vmem [shape: f32[1,32], index: 13, kind: input, shape index: {}]   ;;  %s2602_s14 = inlined_call_operand.hbm [shape: f32[2,8,32], index: 14, kind: output, shape index: {0}]   ;;  %s2603_s15 = inlined_call_operand.hbm [shape: f32[2,4,8,16], index: 15, kind: output, shape index: {1}]  }
   0x1   :  { %23 = vsyncpa [#allocation7], 0 }
   0x2   :  { %24 = vsyncpa [#allocation10], 0 }
   0x3   :  { %25 = vsyncpa [#allocation13], 0 }
   0x4   :  { %26 = vsyncpa [#allocation16], 0 }
   0x5   :  { %27 = vsyncpa [#allocation5], 0 }
   0x6   :  { %28 = vsyncpa [#allocation20], 0  ;;  %s2181_s18 = smov [#allocation6]   ;;  %s2182_s20 = smov [#allocation9]  }
   0x7   :  { %s46_s19 = sshll.u32 %s2181_s18, 4  ;;  %s70_s21 = sshll.u32 %s2182_s20, 4  ;;  %s47_s19 = int_to_ptr.vmem [resolvable:$true] %s46_s19  ;;  %s71_s21 = int_to_ptr.vmem [resolvable:$true] %s70_s21 }
   0x8   :  { %s1955_s22 = scalar_lea.vmem %s47_s19, 256  ;;  %p1960_p1 = scmp.lt.s32.totalorder %s47_s19, %s47_s19 }
   0x9   :  { %p1956_p0 = scmp.ne.s32.totalorder %s47_s19, %s1955_s22  ;;  %p1961_p2 = scmp.lt.s32.totalorder %s1955_s22, %s1955_s22 }
   0xb   :  { %p1962_p3 = por %p1961_p2, %p1960_p1 }
   0xd   :  { %p1963_p4 = pnand %p1962_p3, %p1956_p0 }
   0xf   :  { %1966 = shalt.err (!%p1963_p4)
}
  0x10   :  { %s2183_s23 = smov 64   ;;  %s2184_s24 = smov 4  }
  0x11   :  { %52 = dma.hbm_to_vmem [thread:$0]  %s2589_s1, 256, %s47_s19, [#allocation7], %s2183_s23, %s2183_s23, %s2184_s24  }
  0x12   :  { %s1975_s27 = scalar_lea.vmem %s71_s21, 256  ;;  %p1980_p6 = scmp.lt.s32.totalorder %s71_s21, %s71_s21 }
  0x13   :  { %p1976_p5 = scmp.ne.s32.totalorder %s71_s21, %s1975_s27  ;;  %p1981_p7 = scmp.lt.s32.totalorder %s1975_s27, %s1975_s27 }
  0x15   :  { %p1982_p8 = por %p1981_p7, %p1980_p6 }
  0x17   :  { %p1983_p9 = pnand %p1982_p8, %p1976_p5 }
  0x19   :  { %1986 = shalt.err (!%p1983_p9)
}
  0x1a   :  { %s2185_s28 = smov 128   ;;  %s2186_s29 = smov 8  }
  0x1b   :  { %76 = dma.hbm_to_vmem [thread:$0]  %s2591_s3, 256, %s71_s21, [#allocation10], %s2185_s28, %s2185_s28, %s2186_s29  }
  0x1c   :  { %s2187_s17 = smov [#allocation12]   ;;  %s2188_s20 = smov [#allocation15]  }
  0x1d   :  { %s99_s18 = sshll.u32 %s2187_s17, 4  ;;  %s121_s1 = sshll.u32 %s2188_s20, 4  ;;  %s100_s18 = int_to_ptr.vmem [resolvable:$true] %s99_s18  ;;  %s122_s1 = int_to_ptr.vmem [resolvable:$true] %s121_s1 }
  0x1e   :  { %s1995_s19 = scalar_lea.vmem %s100_s18, 16  ;;  %s1999_s22 = scalar_lea.vmem %s100_s18, 32 }
  0x1f   :  { %p1996_p10 = scmp.ne.s32.totalorder %s100_s18, %s1995_s19  ;;  %p2000_p11 = scmp.lt.s32.totalorder %s100_s18, %s100_s18 }
  0x20   :  { %p2001_p12 = scmp.lt.s32.totalorder %s1999_s22, %s1995_s19 }
  0x22   :  { %p2002_p13 = por %p2001_p12, %p2000_p11 }
  0x24   :  { %p2003_p0 = pnand %p2002_p13, %p1996_p10 }
  0x26   :  { %2006 = shalt.err (!%p2003_p0)
}
  0x27   :  { %102 = dma.hbm_to_vmem [thread:$0]  %s2595_s7, 16, %s100_s18, [#allocation13]  }
  0x28   :  { %s2015_s27 = scalar_lea.vmem %s122_s1, 16  ;;  %s2019_s3 = scalar_lea.vmem %s122_s1, 32 }
  0x29   :  { %p2016_p1 = scmp.ne.s32.totalorder %s122_s1, %s2015_s27  ;;  %p2020_p2 = scmp.lt.s32.totalorder %s122_s1, %s122_s1 }
  0x2a   :  { %p2021_p3 = scmp.lt.s32.totalorder %s2019_s3, %s2015_s27 }
  0x2c   :  { %p2022_p4 = por %p2021_p3, %p2020_p2 }
  0x2e   :  { %p2023_p5 = pnand %p2022_p4, %p2016_p1 }
  0x30   :  { %2026 = shalt.err (!%p2023_p5)
}
  0x31   :  { %124 = dma.hbm_to_vmem [thread:$0]  %s2597_s9, 16, %s122_s1, [#allocation16]  }
  0x32   :  { %s2189_s16 = smov [#allocation3]   ;;  %s2190_s20 = smov [#allocation8]  }
  0x33   :  { %s34_s17 = sshll.u32 %s2189_s16, 4  ;;  %s58_s19 = sshll.u32 %s2190_s20, 4  ;;  %s35_s17 = int_to_ptr.vmem [resolvable:$true] %s34_s17  ;;  %s59_s19 = int_to_ptr.vmem [resolvable:$true] %s58_s19 }
  0x34   :  { %s2035_s22 = scalar_lea.vmem %s35_s17, 128  ;;  %p2040_p7 = scmp.lt.s32.totalorder %s35_s17, %s35_s17 }
  0x35   :  { %p2036_p6 = scmp.ne.s32.totalorder %s35_s17, %s2035_s22  ;;  %p2041_p8 = scmp.lt.s32.totalorder %s2035_s22, %s2035_s22 }
  0x37   :  { %p2042_p9 = por %p2041_p8, %p2040_p7 }
  0x39   :  { %p2043_p10 = pnand %p2042_p9, %p2036_p6 }
  0x3b   :  { %2046 = shalt.err (!%p2043_p10)
}
  0x3c   :  { %40 = dma.hbm_to_vmem [thread:$0]  %s2588_s0, 128, %s35_s17, [#allocation4], %s2183_s23, %s2183_s23, %s2184_s24  }
  0x3d   :  { %s2055_s9 = scalar_lea.vmem %s59_s19, 256  ;;  %p2060_p12 = scmp.lt.s32.totalorder %s59_s19, %s59_s19 }
  0x3e   :  { %p2056_p11 = scmp.ne.s32.totalorder %s59_s19, %s2055_s9  ;;  %p2061_p13 = scmp.lt.s32.totalorder %s2055_s9, %s2055_s9 }
  0x40   :  { %p2062_p0 = por %p2061_p13, %p2060_p12 }
  0x42   :  { %p2063_p1 = pnand %p2062_p0, %p2056_p11 }
  0x44   :  { %2066 = shalt.err (!%p2063_p1)
}
  0x45   :  { %64 = dma.hbm_to_vmem [thread:$0]  %s2590_s2, 256, %s59_s19, [#allocation7], %s2183_s23, %s2183_s23, %s2184_s24  }
  0x46   :  { %s2191_s26 = smov [#allocation11]   ;;  %s2192_s3 = smov [#allocation14]  }
  0x47   :  { %s86_s27 = sshll.u32 %s2191_s26, 4  ;;  %s108_s21 = sshll.u32 %s2192_s3, 4  ;;  %s87_s27 = int_to_ptr.vmem [resolvable:$true] %s86_s27  ;;  %s109_s21 = int_to_ptr.vmem [resolvable:$true] %s108_s21 }
  0x48   :  { %s2075_s0 = scalar_lea.vmem %s87_s27, 256  ;;  %p2080_p3 = scmp.lt.s32.totalorder %s87_s27, %s87_s27 }
  0x49   :  { %p2076_p2 = scmp.ne.s32.totalorder %s87_s27, %s2075_s0  ;;  %p2081_p4 = scmp.lt.s32.totalorder %s2075_s0, %s2075_s0 }
  0x4b   :  { %p2082_p5 = por %p2081_p4, %p2080_p3 }
  0x4d   :  { %p2083_p6 = pnand %p2082_p5, %p2076_p2 }
  0x4f   :  { %2086 = shalt.err (!%p2083_p6)
}
  0x50   :  { %92 = dma.hbm_to_vmem [thread:$0]  %s2594_s6, 256, %s87_s27, [#allocation10], %s2183_s23, %s2183_s23, %s2184_s24  }
  0x51   :  { %s2095_s2 = scalar_lea.vmem %s109_s21, 256  ;;  %p2100_p8 = scmp.lt.s32.totalorder %s109_s21, %s109_s21 }
  0x52   :  { %p2096_p7 = scmp.ne.s32.totalorder %s109_s21, %s2095_s2  ;;  %p2101_p9 = scmp.lt.s32.totalorder %s2095_s2, %s2095_s2 }
  0x54   :  { %p2102_p10 = por %p2101_p9, %p2100_p8 }
  0x56   :  { %p2103_p11 = pnand %p2102_p10, %p2096_p7 }
  0x58   :  { %2106 = shalt.err (!%p2103_p11)
}
  0x59   :  { %114 = dma.hbm_to_vmem [thread:$0]  %s2596_s8, 256, %s109_s21, [#allocation13], %s2183_s23, %s2183_s23, %s2184_s24  }
  0x5a   :  { %s2193_s19 = smov [#allocation17]  }
  0x5b   :  { %s134_s22 = sshll.u32 %s2193_s19, 4  ;;  %s135_s22 = int_to_ptr.vmem [resolvable:$true] %s134_s22 }
  0x5c   :  { %s2115_s7 = scalar_lea.vmem %s135_s22, 256  ;;  %p2120_p13 = scmp.lt.s32.totalorder %s135_s22, %s135_s22 }
  0x5d   :  { %p2116_p12 = scmp.ne.s32.totalorder %s135_s22, %s2115_s7  ;;  %p2121_p0 = scmp.lt.s32.totalorder %s2115_s7, %s2115_s7 }
  0x5f   :  { %p2122_p1 = por %p2121_p0, %p2120_p13 }
  0x61   :  { %p2123_p2 = pnand %p2122_p1, %p2116_p12 }
  0x63   :  { %2126 = shalt.err (!%p2123_p2)
}
  0x64   :  { %140 = dma.hbm_to_vmem [thread:$0]  %s2600_s12, 256, %s135_s22, [#allocation16], %s2183_s23, %s2183_s23, %s2184_s24  }
  0x65   :  { %2167 = dma.done.wait [#allocation4], 128  }
  0x66   :  { %2168 = vsyncadd [#allocation4], 4294967168 }
  0x67   :  { %2169 = dma.done.wait [#allocation7], 512  }
  0x68   :  { %2170 = vsyncadd [#allocation7], 4294966784 }
  0x69   :  { %2171 = dma.done.wait [#allocation10], 512  }
  0x6a   :  { %2172 = vsyncadd [#allocation10], 4294966784 }
  0x6b   :  { %2173 = dma.done.wait [#allocation13], 272  }
  0x6c   :  { %2174 = vsyncadd [#allocation13], 4294967024 }
  0x6d   :  { %2175 = dma.done.wait [#allocation16], 272  }
  0x6e   :  { %2176 = vsyncadd [#allocation16], 4294967024  ;;  %v2194_v0 = vmov 0.0   ;;  %vm2195_vm0 = vmmov 0   ;;  %v1904_v1 = vld [vmem:[#allocation14 + $0x8] sm:$0xff]   ;;  %v1905_v2 = vld [vmem:[#allocation14] sm:$0xff]   ;;  %v455_v45 = vlaneseq }
  0x6f   :  { %1740 = vmatprep.subr.bf16.mxu0 %v2194_v0  ;;  %1744 = vmatprep.mubr.msk.bf16.mxu0 %vm2195_vm0, %v2194_v0  ;;  %vm209_vm1 = vcmask 261120   ;;  %v1906_v3 = vld [vmem:[#allocation6] sm:$0xff]   ;;  %v1908_v4 = vld [vmem:[#allocation11 + $0x8] sm:$0xff]   ;;  %v1907_v5 = vld [vmem:[#allocation6 + $0x8] sm:$0xff]   ;;  %vm465_vm2 = vcmask 64512   ;;  %vm558_vm5 = vcmask 130048  }
  0x70   :  { %1748 = vmatprep.subr.bf16.mxu1 %v1904_v1  ;;  %1752 = vmatprep.mubr.msk.bf16.mxu1 %vm209_vm1, %v1906_v3  ;;  %v1909_v6 = vld [vmem:[#allocation11] sm:$0xff]   ;;  %v1910_v7 = vld [vmem:[#allocation3] sm:$0xff]   ;;  %v1911_v8 = vld [vmem:[%s2598_s10 + $0x8] sm:$0xff]   ;;  %v456_v47 = vshrl.u32 %v455_v45, 7  ;;  %s447_s21 = ssub.f32 1.0, %s2592_s4  ;;  %vm694_vm6 = vcmask 1043456  }
  0x71   :  { %1749 = vmatpush3.bf16.msra.mxu1 %v1904_v1  ;;  %1741 = vmatpush3.bf16.msra.mxu0 %v1908_v4  ;;  %v1912_v9 = vld [vmem:[%s2598_s10] sm:$0xff]   ;;  %v1913_v10 = vld [vmem:[#allocation8] sm:$0xff]   ;;  %v1637_v21 = vld [vmem:[#allocation12] ss:$0 sm:$0xff]  ;;  %s2198_s2 = smov 104   ;;  %s2199_s17 = smov [#allocation19]  }
  0x72   :  { %1750 = vmatprep.subr.bf16.mxu1 %v1905_v2  ;;  %1742 = vmatprep.subr.bf16.mxu0 %v2194_v0  ;;  %v1914_v11 = vld [vmem:[#allocation8 + $0x8] sm:$0xff]   ;;  %v1642_v13 = vld [vmem:[#allocation15] ss:$0 sm:$0xff]  ;;  %v457_v49 = vsub.s32 0, %v456_v47  ;;  %s1617_s20 = sshll.u32 %s2199_s17, 4  ;;  %s1618_s20 = int_to_ptr.vmem [resolvable:$true] %s1617_s20 }
  0x73   :  { %v1649_v35 = vld [vmem:[%s2599_s11] ss:$0 sm:$0xff]  ;;  %v441_v48 = vld [vmem:[%s2593_s5 + $0x1] sm:$0x1]  ;;  %s2127_s19 = scalar_lea.vmem %s1618_s20, 1024  ;;  %p2132_p4 = scmp.lt.s32.totalorder %s1618_s20, %s1618_s20 }
  0x74   :  { %v440_v46 = vld [vmem:[%s2593_s5] sm:$0x1]  ;;  %vm443_vm4 = vcmp.gt.f32.partialorder %v441_v48, 0.5  ;;  %s2196_s5 = smov 120   ;;  %p2128_p3 = scmp.ne.s32.totalorder %s1618_s20, %s2127_s19 }
  0x75   :  { %1751 = vmatpush3.bf16.msra.mxu1 %v1905_v2  ;;  %1743 = vmatpush3.bf16.msra.mxu0 %v1909_v6  ;;  %vm442_vm3 = vcmp.gt.f32.partialorder %v440_v46, 0.5  ;;  %v445_v51 = vsel %vm443_vm4, -inf, %v2194_v0  ;;  %p2133_p5 = scmp.lt.s32.totalorder %s2127_s19, %s2127_s19 }
  0x76   :  { %1764 = vmatprep.subr.bf16.mxu1 %v2194_v0  ;;  %1756 = vmatprep.subr.bf16.mxu0 %v1911_v8  ;;  %v444_v50 = vsel %vm442_vm3, -inf, %v2194_v0  ;;  %v2393_v54 = vrot.slane %v445_v51, %v457_v49 }
  0x77   :  { %v2391_v52 = vrot.slane %v444_v50, %v457_v49  ;;  %p2134_p6 = por %p2133_p5, %p2132_p4 }
  0x78   :  { %1753 = vmatmul.mubr.msk.bf16.vlgmr.msra.gmra.mxu1 %vm209_vm1, %v1907_v5  ;;  %1745 = vmatmul.mubr.msk.bf16.vlgmr.msra.gmra.mxu0 %vm209_vm1, %v1910_v7 }
  0x79   :  { %1766 = vmatprep.mubr.msk.bf16.mxu1 %vm2195_vm0, %v2194_v0  ;;  %1757 = vmatpush3.bf16.msra.mxu0 %v1911_v8  ;;  %p2135_p7 = pnand %p2134_p6, %p2128_p3 }
  0x7a   :  { %1758 = vmatprep.subr.bf16.mxu0 %v1912_v9  ;;  %1760 = vmatprep.mubr.msk.bf16.mxu0 %vm209_vm1, %v1913_v10 }
  0x7d   :  { %1759 = vmatpush3.bf16.msra.mxu0 %v1912_v9 }
  0x7e   :  { %1770 = vmatprep.subr.bf16.mxu0 %v2194_v0 }
  0x80   :  { %1761 = vmatmul.mubr.msk.bf16.vlgmr.msra.gmra.mxu0 %vm209_vm1, %v1914_v11 }
  0x81   :  { %1772 = vmatprep.mubr.msk.bf16.mxu0 %vm2195_vm0, %v2194_v0 }
 0x138   :  { %v1754_v12 = vpop.f32.mrf.mxu1  ;;  %v247_v15 = vpop.f32.mrf.mxu0 }
 0x139   :  { %v336_v17 = vadd.f32 %v1754_v12, %v1642_v13  ;;  %v248_v30 = vadd.f32 %v1637_v21, %v247_v15  ;;  %v448_v15 = vld [vmem:[#allocation9] sm:$0xff] }
 0x13a   :  { %v327_v14 = vpop.f32.mrf.mxu1  ;;  %v1746_v19 = vpop.f32.mrf.mxu0 }
 0x13b   :  { %v328_v22 = vadd.f32 %v1642_v13, %v327_v14  ;;  %v2362_v33 = vpack.c.bf16 %v248_v30, %v248_v30 }
 0x13c   :  { %v1755_v16 = vpop.f32.mrf.mxu1  ;;  %v250_v25 = vpop.f32.mrf.mxu0 }
 0x13d   :  { %v339_v18 = vadd.f32 %v1755_v16, %v1642_v13  ;;  %v251_v28 = vadd.f32 %v1637_v21, %v250_v25  ;;  %v450_v16 = vstv %s2592_s4  ;;  %v449_v21 = vld [vmem:[#allocation9 + $0x8] sm:$0xff] }
 0x13e   :  { %v330_v20 = vpop.f32.mrf.mxu1  ;;  %v1747_v29 = vpop.f32.mrf.mxu0 }
 0x13f   :  { %v2350_v23 = vpack.c.bf16 %v339_v18, %v336_v17  ;;  %v331_v24 = vadd.f32 %v1642_v13, %v330_v20  ;;  %v2359_v32 = vpack.c.bf16 %v251_v28, %v251_v28  ;;  %v2415_v18 = vstv %s447_s21 }
 0x140   :  { %v1762_v34 = vpop.f32.mrf.mxu0  ;;  %v2417_v20 = vmul.f32 %v450_v16, %v448_v15  ;;  %v2421_v28 = vmul.f32 %v450_v16, %v449_v21 }
 0x141   :  { %v2352_v26 = vpack.c.bf16 %v331_v24, %v328_v22  ;;  %v516_v27 = vsel %vm465_vm2, %v2350_v23, 0  ;;  %v424_v37 = vadd.f32 %v1762_v34, %v1649_v35 }
 0x142   :  { %1771 = vmatpush3.bf16.xpose.msra.mxu0 %v516_v27  ;;  %v415_v36 = vpop.f32.mrf.mxu0 }
 0x143   :  { %v470_v31 = vsel %vm465_vm2, %v2352_v26, 0  ;;  %1782 = vmatprep.subr.bf16.mxu0 %v2194_v0  ;;  %v416_v39 = vadd.f32 %v1649_v35, %v415_v36 }
 0x144   :  { %1765 = vmatpush3.bf16.xpose.msra.mxu1 %v470_v31  ;;  %v1763_v38 = vpop.f32.mrf.mxu0 }
 0x145   :  { %1776 = vmatprep.subr.bf16.mxu1 %v2194_v0  ;;  %v427_v40 = vadd.f32 %v1763_v38, %v1649_v35 }
 0x146   :  { %v418_v41 = vpop.f32.mrf.mxu0 }
 0x147   :  { %v2375_v42 = vpack.c.bf16 %v427_v40, %v424_v37  ;;  %v419_v43 = vadd.f32 %v1649_v35, %v418_v41 }
 0x149   :  { %1773 = vmatmul.mubr.msk.bf16.vlgmr.msra.gmra.mxu0 %vm465_vm2, %v2359_v32  ;;  %v2377_v44 = vpack.c.bf16 %v419_v43, %v416_v39  ;;  %v678_v39 = vld [vmem:[#allocation17] sm:$0xf] }
 0x14a   :  { %1784 = vmatprep.mubr.msk.bf16.mxu0 %vm2195_vm0, %v2194_v0  ;;  %1783 = vmatpush3.bf16.msra.mxu0 %v2375_v42  ;;  %v696_v40 = vsel %vm694_vm6, %v678_v39, 0 }
 0x14b   :  { %1767 = vmatmul.mubr.msk.bf16.vlgmr.msra.gmra.mxu1 %vm465_vm2, %v2362_v33  ;;  %1794 = vmatprep.subr.bf16.mxu0 %v2194_v0 }
 0x14c   :  { %1778 = vmatprep.mubr.msk.bf16.mxu1 %vm2195_vm0, %v2194_v0  ;;  %1777 = vmatpush3.bf16.msra.mxu1 %v2377_v44 }
 0x14d   :  { %1788 = vmatprep.subr.bf16.mxu1 %v2194_v0 }
 0x209   :  { %v552_v53 = vpop.f32.mrf.mxu0 }
 0x20a   :  { %v553_v60 = vadd.f32 %v552_v53, %v2393_v54 }
 0x20b   :  { %v506_v55 = vpop.f32.mrf.mxu1  ;;  %v1774_v56 = vpop.f32.mrf.mxu0 }
 0x20c   :  { %v507_v57 = vadd.f32 %v506_v55, %v2391_v52  ;;  %v562_v2 = vsel %vm558_vm5, %v553_v60, -inf }
 0x20d   :  { %v1768_v58 = vpop.f32.mrf.mxu1  ;;  %v555_v59 = vpop.f32.mrf.mxu0 }
 0x20e   :  { %v559_v61 = vsel %vm558_vm5, %v507_v57, -inf }
 0x20f   :  { %560 = vmax.xlane.f32.xlu0 %v559_v61  ;;  %v509_v62 = vpop.f32.mrf.mxu1  ;;  %v1775_v63 = vpop.f32.mrf.mxu0 }
 0x211   :  { %v1769_v1 = vpop.f32.mrf.mxu1 }
 0x213   :  { %563 = vmax.xlane.f32.xlu0 %v562_v2 }
 0x229   :  { %744 = vrot.lane.b32.xlu0 %v2352_v26, %s2196_s5 }
 0x298   :  { %v561_v3 = vpop.xlane.xlu0 %560 }
 0x299   :  { %v565_v4 = vsub.f32 %v507_v57, %v561_v3 }
 0x29b   :  { %v567_v5 = vmul.f32 1.442695, %v565_v4  ;;  %v1662_v4 = vld [vmem:[%s2601_s13] ss:$0 sm:$0xff]  ;;  %s2197_s13 = smov 112  }
 0x29c   :  { %v564_v6 = vpop.xlane.xlu0 %563 }
 0x29d   :  { %1915 = vpow2.f32 %v567_v5  ;;  %v566_v7 = vsub.f32 %v553_v60, %v564_v6 }
 0x29f   :  { %v569_v8 = vmul.f32 1.442695, %v566_v7 }
 0x2a0   :  { %v745_v34 = vpop.permute.xlu0 %744 }
 0x2a1   :  { %1917 = vpow2.f32 %v569_v8  ;;  %v750_v36 = vsel %vm465_vm2, %v745_v34, 0 }
 0x2aa   :  { %v1916_v9 = vpop.eup %1915 }
 0x2ab   :  { %v571_v10 = vsel %vm558_vm5, %v1916_v9, 0.0 }
 0x2ac   :  { %572 = vadd.xlane.f32.xlu1 %v571_v10 }
 0x2ae   :  { %v1918_v11 = vpop.eup %1917 }
 0x2af   :  { %v574_v12 = vsel %vm558_vm5, %v1918_v11, 0.0 }
 0x2b0   :  { %575 = vadd.xlane.f32.xlu1 %v574_v12 }
 0x2c1   :  { %795 = vrot.lane.b32.xlu1 %v2350_v23, %s2196_s5 }
 0x2c5   :  { %741 = vrot.lane.b32.xlu1 %v2362_v33, %s2196_s5 }
 0x2c9   :  { %792 = vrot.lane.b32.xlu1 %v2359_v32, %s2196_s5 }
 0x335   :  { %v573_v13 = vpop.xlane.xlu1 %572 }
 0x336   :  { %1919 = vrcp.f32 %v573_v13 }
 0x339   :  { %v576_v14 = vpop.xlane.xlu1 %575 }
 0x33a   :  { %1921 = vrcp.f32 %v576_v14 }
 0x33d   :  { %v796_v37 = vpop.permute.xlu1 %795 }
 0x33e   :  { %v801_v50 = vsel %vm465_vm2, %v796_v37, 0 }
 0x341   :  { %v742_v38 = vpop.permute.xlu1 %741 }
 0x343   :  { %v1920_v17 = vpop.eup %1919 }
 0x344   :  { %v579_v19 = vmul.f32 %v1920_v17, %v1916_v9 }
 0x345   :  { %v793_v57 = vpop.permute.xlu1 %792 }
 0x346   :  { %v582_v22 = vmul.f32 %v2415_v18, %v579_v19 }
 0x347   :  { %v1922_v24 = vpop.eup %1921 }
 0x348   :  { %v580_v25 = vmul.f32 %v1922_v24, %v1918_v11  ;;  %v584_v27 = vadd.f32 %v582_v22, %v2417_v20 }
 0x34a   :  { %586 = vst.msk [vmem:[#allocation19] sm:$0xff] %vm558_vm5, %v584_v27  ;;  %v588_v29 = vpack.c.bf16 %v584_v27, %v584_v27  ;;  %v583_v30 = vmul.f32 %v2415_v18, %v580_v25 }
 0x34c   :  { %1779 = vmatmul.mubr.msk.bf16.vlgmr.msra.gmra.mxu1 %vm558_vm5, %v588_v29  ;;  %v585_v31 = vadd.f32 %v583_v30, %v2421_v28 }
 0x34d   :  { %1790 = vmatprep.mubr.msk.bf16.mxu1 %vm2195_vm0, %v2194_v0  ;;  %1789 = vmatpush3.bf16.msra.mxu1 %v696_v40 }
 0x34e   :  { %587 = vst.msk [vmem:[#allocation19 + $0x20] sm:$0xff] %vm558_vm5, %v585_v31  ;;  %v589_v35 = vpack.c.bf16 %v585_v31, %v585_v31  ;;  %1800 = vmatprep.subr.bf16.mxu1 %v2194_v0 }
 0x350   :  { %1785 = vmatmul.mubr.msk.bf16.vlgmr.msra.gmra.mxu0 %vm558_vm5, %v589_v35 }
 0x351   :  { %1795 = vmatpush3.bf16.xpose.msra.mxu0 %v750_v36  ;;  %1796 = vmatprep.mubr.msk.bf16.mxu0 %vm2195_vm0, %v2194_v0 }
 0x352   :  { %1806 = vmatprep.subr.bf16.mxu0 %v2194_v0 }
 0x358   :  { %1797 = vmatmul.mubr.msk.bf16.vlgmr.msra.gmra.mxu0 %vm465_vm2, %v742_v38 }
 0x359   :  { %1808 = vmatprep.mubr.msk.bf16.mxu0 %vm2195_vm0, %v2194_v0 }
 0x40c   :  { %v627_v41 = vpop.f32.mrf.mxu1 }
 0x40e   :  { %v1780_v43 = vpop.f32.mrf.mxu1 }
 0x410   :  { %v630_v45 = vpop.f32.mrf.mxu1  ;;  %v670_v46 = vpop.f32.mrf.mxu0 }
 0x411   :  { %v1685_v47 = vpack.c.bf16 %v670_v46, %v627_v41 }
 0x412   :  { %v1781_v48 = vpop.f32.mrf.mxu1  ;;  %v1786_v49 = vpop.f32.mrf.mxu0 }
 0x413   :  { %1791 = vmatmul.mubr.msk.bf16.vlgmr.msra.gmra.mxu1 %vm465_vm2, %v1685_v47  ;;  %v971_v48 = vld [vmem:[#allocation17 + $0x4] sm:$0xf] }
 0x414   :  { %1801 = vmatpush3.bf16.xpose.msra.mxu1 %v801_v50  ;;  %v673_v51 = vpop.f32.mrf.mxu0  ;;  %1802 = vmatprep.mubr.msk.bf16.mxu1 %vm2195_vm0, %v2194_v0  ;;  %v981_v49 = vsel %vm694_vm6, %v971_v48, 0 }
 0x415   :  { %1812 = vmatprep.subr.bf16.mxu1 %v2194_v0 }
 0x416   :  { %v1787_v53 = vpop.f32.mrf.mxu0 }
 0x418   :  { %v786_v55 = vpop.f32.mrf.mxu0 }
 0x419   :  { %v787_v56 = vadd.f32 %v786_v55, %v2391_v52 }
 0x41a   :  { %v1798_v58 = vpop.f32.mrf.mxu0 }
 0x41b   :  { %1803 = vmatmul.mubr.msk.bf16.vlgmr.msra.gmra.mxu1 %vm465_vm2, %v793_v57  ;;  %v843_v59 = vsel %vm558_vm5, %v787_v56, -inf }
 0x41c   :  { %844 = vmax.xlane.f32.xlu0 %v843_v59  ;;  %v789_v60 = vpop.f32.mrf.mxu0  ;;  %1814 = vmatprep.mubr.msk.bf16.mxu1 %vm2195_vm0, %v2194_v0 }
 0x41e   :  { %v1799_v61 = vpop.f32.mrf.mxu0 }
 0x4a5   :  { %v845_v62 = vpop.xlane.xlu0 %844 }
 0x4a6   :  { %v849_v63 = vsub.f32 %v787_v56, %v845_v62 }
 0x4a8   :  { %v851_v1 = vmul.f32 1.442695, %v849_v63 }
 0x4aa   :  { %1923 = vpow2.f32 %v851_v1 }
 0x4b7   :  { %v1924_v2 = vpop.eup %1923 }
 0x4b8   :  { %v855_v3 = vsel %vm558_vm5, %v1924_v2, 0.0 }
 0x4b9   :  { %856 = vadd.xlane.f32.xlu0 %v855_v3 }
 0x4d3   :  { %v732_v5 = vpop.f32.mrf.mxu1 }
 0x4d4   :  { %v733_v6 = vadd.f32 %v1662_v4, %v732_v5 }
 0x4d5   :  { %v1792_v7 = vpop.f32.mrf.mxu1 }
 0x4d6   :  { %739 = vst.msk [vmem:[#allocation18] sm:$0xff] %vm209_vm1, %v733_v6 }
 0x4d7   :  { %v735_v8 = vpop.f32.mrf.mxu1 }
 0x4d8   :  { %v736_v9 = vadd.f32 %v1662_v4, %v735_v8 }
 0x4d9   :  { %v1793_v10 = vpop.f32.mrf.mxu1 }
 0x4da   :  { %740 = vst.msk [vmem:[#allocation18 + $0x8] sm:$0xff] %vm209_vm1, %v736_v9 }
 0x4db   :  { %v837_v11 = vpop.f32.mrf.mxu1 }
 0x4dc   :  { %v838_v12 = vadd.f32 %v837_v11, %v2393_v54 }
 0x4dd   :  { %v1804_v13 = vpop.f32.mrf.mxu1 }
 0x4de   :  { %v846_v14 = vsel %vm558_vm5, %v838_v12, -inf  ;;  %v1024_v13 = vld [vmem:[#allocation18] sm:$0xff] }
 0x4df   :  { %847 = vmax.xlane.f32.xlu1 %v846_v14  ;;  %v840_v15 = vpop.f32.mrf.mxu1 }
 0x4e1   :  { %v1805_v16 = vpop.f32.mrf.mxu1 }
 0x4f0   :  { %922 = vrot.lane.b32.xlu1 %v2375_v42, %s2196_s5 }
 0x4f4   :  { %1032 = vrot.lane.b32.xlu1 %v2352_v26, %s2197_s13 }
 0x4f8   :  { %1082 = vrot.lane.b32.xlu1 %v2350_v23, %s2197_s13 }
 0x4fc   :  { %1080 = vrot.lane.b32.xlu1 %v2359_v32, %s2197_s13 }
 0x542   :  { %v857_v17 = vpop.xlane.xlu0 %856 }
 0x543   :  { %1925 = vrcp.f32 %v857_v17  ;;  %v1025_v17 = vld [vmem:[#allocation18 + $0x8] sm:$0xff] }
 0x550   :  { %v1926_v19 = vpop.eup %1925 }
 0x551   :  { %v863_v21 = vmul.f32 %v1926_v19, %v1924_v2 }
 0x553   :  { %v865_v22 = vmul.f32 %v863_v21, %v2415_v18 }
 0x555   :  { %v867_v24 = vadd.f32 %v865_v22, %v2417_v20 }
 0x557   :  { %870 = vst.msk [vmem:[#allocation19 + $0x8] sm:$0xff] %vm558_vm5, %v867_v24  ;;  %v872_v37 = vpack.c.bf16 %v867_v24, %v867_v24 }
 0x568   :  { %v848_v25 = vpop.xlane.xlu1 %847 }
 0x569   :  { %v850_v27 = vsub.f32 %v838_v12, %v848_v25 }
 0x56b   :  { %v853_v29 = vmul.f32 1.442695, %v850_v27 }
 0x56c   :  { %v923_v30 = vpop.permute.xlu1 %922 }
 0x56d   :  { %1927 = vpow2.f32 %v853_v29  ;;  %1813 = vmatpush3.bf16.msra.mxu1 %v923_v30 }
 0x56e   :  { %1824 = vmatprep.subr.bf16.mxu1 %v2194_v0 }
 0x570   :  { %v1033_v43 = vpop.permute.xlu1 %1032 }
 0x571   :  { %v1038_v46 = vsel %vm465_vm2, %v1033_v43, 0 }
 0x574   :  { %v1083_v56 = vpop.permute.xlu1 %1082 }
 0x575   :  { %v1088_v60 = vsel %vm465_vm2, %v1083_v56, 0 }
 0x578   :  { %v1081_v2 = vpop.permute.xlu1 %1080 }
 0x57a   :  { %v1928_v31 = vpop.eup %1927 }
 0x57b   :  { %v858_v34 = vsel %vm558_vm5, %v1928_v31, 0.0 }
 0x57c   :  { %859 = vadd.xlane.f32.xlu0 %v858_v34 }
 0x592   :  { %875 = vrot.lane.b32.xlu0 %v2377_v44, %s2196_s5 }
 0x596   :  { %1030 = vrot.lane.b32.xlu0 %v2362_v33, %s2197_s13 }
 0x605   :  { %v860_v35 = vpop.xlane.xlu0 %859 }
 0x606   :  { %1929 = vrcp.f32 %v860_v35 }
 0x609   :  { %v876_v36 = vpop.permute.xlu0 %875 }
 0x60a   :  { %1807 = vmatpush3.bf16.msra.mxu0 %v876_v36 }
 0x60b   :  { %1818 = vmatprep.subr.bf16.mxu0 %v2194_v0 }
 0x60d   :  { %1809 = vmatmul.mubr.msk.bf16.vlgmr.msra.gmra.mxu0 %vm558_vm5, %v872_v37  ;;  %v1031_v47 = vpop.permute.xlu0 %1030 }
 0x60e   :  { %1820 = vmatprep.mubr.msk.bf16.mxu0 %vm2195_vm0, %v2194_v0  ;;  %1819 = vmatpush3.bf16.msra.mxu0 %v981_v49 }
 0x60f   :  { %1830 = vmatprep.subr.bf16.mxu0 %v2194_v0 }
 0x613   :  { %v1930_v38 = vpop.eup %1929 }
 0x614   :  { %v864_v39 = vmul.f32 %v1930_v38, %v1928_v31 }
 0x616   :  { %v866_v40 = vmul.f32 %v864_v39, %v2415_v18 }
 0x618   :  { %v868_v41 = vadd.f32 %v866_v40, %v2421_v28 }
 0x61a   :  { %871 = vst.msk [vmem:[#allocation19 + $0x28] sm:$0xff] %vm558_vm5, %v868_v41  ;;  %v873_v45 = vpack.c.bf16 %v868_v41, %v868_v41 }
 0x61c   :  { %1815 = vmatmul.mubr.msk.bf16.vlgmr.msra.gmra.mxu1 %vm558_vm5, %v873_v45 }
 0x61d   :  { %1825 = vmatpush3.bf16.xpose.msra.mxu1 %v1038_v46  ;;  %1826 = vmatprep.mubr.msk.bf16.mxu1 %vm2195_vm0, %v2194_v0 }
 0x61e   :  { %1836 = vmatprep.subr.bf16.mxu1 %v2194_v0 }
 0x624   :  { %1827 = vmatmul.mubr.msk.bf16.vlgmr.msra.gmra.mxu1 %vm465_vm2, %v1031_v47 }
 0x625   :  { %1838 = vmatprep.mubr.msk.bf16.mxu1 %vm2195_vm0, %v2194_v0 }
 0x6cd   :  { %v915_v50 = vpop.f32.mrf.mxu0 }
 0x6cf   :  { %v1810_v51 = vpop.f32.mrf.mxu0 }
 0x6d1   :  { %v918_v53 = vpop.f32.mrf.mxu0 }
 0x6d3   :  { %v1811_v55 = vpop.f32.mrf.mxu0 }
 0x6d4   :  { %v1256_v55 = vld [vmem:[#allocation17 + $0x8] sm:$0xf] }
 0x6d5   :  { %v1266_v56 = vsel %vm694_vm6, %v1256_v55, 0 }
 0x6dc   :  { %v962_v57 = vpop.f32.mrf.mxu1 }
 0x6dd   :  { %v1686_v58 = vpack.c.bf16 %v962_v57, %v915_v50 }
 0x6de   :  { %v1816_v59 = vpop.f32.mrf.mxu1 }
 0x6df   :  { %1821 = vmatmul.mubr.msk.bf16.vlgmr.msra.gmra.mxu0 %vm465_vm2, %v1686_v58 }
 0x6e0   :  { %1831 = vmatpush3.bf16.xpose.msra.mxu0 %v1088_v60  ;;  %v965_v61 = vpop.f32.mrf.mxu1  ;;  %1832 = vmatprep.mubr.msk.bf16.mxu0 %vm2195_vm0, %v2194_v0 }
 0x6e1   :  { %1842 = vmatprep.subr.bf16.mxu0 %v2194_v0 }
 0x6e2   :  { %v1817_v62 = vpop.f32.mrf.mxu1 }
 0x6e4   :  { %v1074_v63 = vpop.f32.mrf.mxu1 }
 0x6e5   :  { %v1075_v1 = vadd.f32 %v1074_v63, %v2391_v52 }
 0x6e6   :  { %v1828_v3 = vpop.f32.mrf.mxu1 }
 0x6e7   :  { %1833 = vmatmul.mubr.msk.bf16.vlgmr.msra.gmra.mxu0 %vm465_vm2, %v1081_v2  ;;  %v1130_v4 = vsel %vm558_vm5, %v1075_v1, -inf }
 0x6e8   :  { %1131 = vmax.xlane.f32.xlu0 %v1130_v4  ;;  %v1077_v5 = vpop.f32.mrf.mxu1  ;;  %1844 = vmatprep.mubr.msk.bf16.mxu0 %vm2195_vm0, %v2194_v0 }
 0x6ea   :  { %v1829_v6 = vpop.f32.mrf.mxu1 }
 0x771   :  { %v1132_v7 = vpop.xlane.xlu0 %1131 }
 0x772   :  { %v1136_v8 = vsub.f32 %v1075_v1, %v1132_v7 }
 0x774   :  { %v1138_v9 = vmul.f32 1.442695, %v1136_v8 }
 0x776   :  { %1931 = vpow2.f32 %v1138_v9 }
 0x783   :  { %v1932_v10 = vpop.eup %1931 }
 0x784   :  { %v1142_v11 = vsel %vm558_vm5, %v1932_v10, 0.0 }
 0x785   :  { %1143 = vadd.xlane.f32.xlu0 %v1142_v11 }
 0x79f   :  { %v1017_v12 = vpop.f32.mrf.mxu0 }
 0x7a0   :  { %v1026_v14 = vadd.f32 %v1024_v13, %v1017_v12 }
 0x7a1   :  { %v1822_v15 = vpop.f32.mrf.mxu0 }
 0x7a2   :  { %1028 = vst.msk [vmem:[#allocation18] sm:$0xff] %vm209_vm1, %v1026_v14 }
 0x7a3   :  { %v1020_v16 = vpop.f32.mrf.mxu0 }
 0x7a4   :  { %v1027_v19 = vadd.f32 %v1025_v17, %v1020_v16 }
 0x7a5   :  { %v1823_v21 = vpop.f32.mrf.mxu0 }
 0x7a6   :  { %1029 = vst.msk [vmem:[#allocation18 + $0x8] sm:$0xff] %vm209_vm1, %v1027_v19 }
 0x7a7   :  { %v1124_v22 = vpop.f32.mrf.mxu0 }
 0x7a8   :  { %v1125_v24 = vadd.f32 %v1124_v22, %v2393_v54 }
 0x7a9   :  { %v1834_v25 = vpop.f32.mrf.mxu0  ;;  %v1309_v17 = vld [vmem:[#allocation18] sm:$0xff] }
 0x7aa   :  { %v1133_v27 = vsel %vm558_vm5, %v1125_v24, -inf }
 0x7ab   :  { %1134 = vmax.xlane.f32.xlu1 %v1133_v27  ;;  %v1127_v29 = vpop.f32.mrf.mxu0 }
 0x7ad   :  { %v1835_v30 = vpop.f32.mrf.mxu0 }
 0x7bc   :  { %1207 = vrot.lane.b32.xlu1 %v2375_v42, %s2197_s13 }
 0x7c0   :  { %1317 = vrot.lane.b32.xlu1 %v2352_v26, %s2198_s2 }
 0x7c4   :  { %1367 = vrot.lane.b32.xlu1 %v2350_v23, %s2198_s2 }
 0x7c8   :  { %1365 = vrot.lane.b32.xlu1 %v2359_v32, %s2198_s2 }
 0x80e   :  { %v1144_v31 = vpop.xlane.xlu0 %1143 }
 0x80f   :  { %1933 = vrcp.f32 %v1144_v31 }
 0x81c   :  { %v1934_v34 = vpop.eup %1933 }
 0x81d   :  { %v1150_v35 = vmul.f32 %v1934_v34, %v1932_v10 }
 0x81f   :  { %v1152_v36 = vmul.f32 %v1150_v35, %v2415_v18 }
 0x821   :  { %v1154_v37 = vadd.f32 %v1152_v36, %v2417_v20 }
 0x823   :  { %1157 = vst.msk [vmem:[#allocation19 + $0x10] sm:$0xff] %vm558_vm5, %v1154_v37  ;;  %v1159_v45 = vpack.c.bf16 %v1154_v37, %v1154_v37 }
 0x834   :  { %v1135_v38 = vpop.xlane.xlu1 %1134 }
 0x835   :  { %v1137_v39 = vsub.f32 %v1125_v24, %v1135_v38  ;;  %v1310_v24 = vld [vmem:[#allocation18 + $0x8] sm:$0xff] }
 0x837   :  { %v1140_v40 = vmul.f32 1.442695, %v1137_v39 }
 0x838   :  { %v1208_v26 = vpop.permute.xlu1 %1207 }
 0x839   :  { %1935 = vpow2.f32 %v1140_v40  ;;  %1843 = vmatpush3.bf16.msra.mxu0 %v1208_v26 }
 0x83a   :  { %1854 = vmatprep.subr.bf16.mxu0 %v2194_v0 }
 0x83c   :  { %v1318_v50 = vpop.permute.xlu1 %1317 }
 0x83d   :  { %v1323_v51 = vsel %vm465_vm2, %v1318_v50, 0 }
 0x840   :  { %v1368_v61 = vpop.permute.xlu1 %1367 }
 0x841   :  { %v1373_v2 = vsel %vm465_vm2, %v1368_v61, 0 }
 0x844   :  { %v1366_v7 = vpop.permute.xlu1 %1365 }
 0x846   :  { %v1936_v23 = vpop.eup %1935 }
 0x847   :  { %v1145_v32 = vsel %vm558_vm5, %v1936_v23, 0.0 }
 0x848   :  { %1146 = vadd.xlane.f32.xlu0 %v1145_v32 }
 0x85e   :  { %1161 = vrot.lane.b32.xlu0 %v2377_v44, %s2197_s13 }
 0x862   :  { %1315 = vrot.lane.b32.xlu0 %v2362_v33, %s2198_s2 }
 0x8d1   :  { %v1147_v41 = vpop.xlane.xlu0 %1146 }
 0x8d2   :  { %1937 = vrcp.f32 %v1147_v41 }
 0x8d5   :  { %v1162_v43 = vpop.permute.xlu0 %1161 }
 0x8d6   :  { %1837 = vmatpush3.bf16.msra.mxu1 %v1162_v43 }
 0x8d7   :  { %1848 = vmatprep.subr.bf16.mxu1 %v2194_v0 }
 0x8d9   :  { %1839 = vmatmul.mubr.msk.bf16.vlgmr.msra.gmra.mxu1 %vm558_vm5, %v1159_v45  ;;  %v1316_v53 = vpop.permute.xlu0 %1315 }
 0x8da   :  { %1850 = vmatprep.mubr.msk.bf16.mxu1 %vm2195_vm0, %v2194_v0  ;;  %1849 = vmatpush3.bf16.msra.mxu1 %v1266_v56 }
 0x8db   :  { %1860 = vmatprep.subr.bf16.mxu1 %v2194_v0 }
 0x8df   :  { %v1938_v46 = vpop.eup %1937 }
 0x8e0   :  { %v1151_v47 = vmul.f32 %v1938_v46, %v1936_v23 }
 0x8e2   :  { %v1153_v48 = vmul.f32 %v1151_v47, %v2415_v18 }
 0x8e4   :  { %v1155_v49 = vadd.f32 %v1153_v48, %v2421_v28 }
 0x8e6   :  { %1158 = vst.msk [vmem:[#allocation19 + $0x30] sm:$0xff] %vm558_vm5, %v1155_v49  ;;  %v1160_v33 = vpack.c.bf16 %v1155_v49, %v1155_v49 }
 0x8e8   :  { %1845 = vmatmul.mubr.msk.bf16.vlgmr.msra.gmra.mxu0 %vm558_vm5, %v1160_v33  ;;  %v1541_v33 = vld [vmem:[#allocation17 + $0xc] sm:$0xf] }
 0x8e9   :  { %1855 = vmatpush3.bf16.xpose.msra.mxu0 %v1323_v51  ;;  %1856 = vmatprep.mubr.msk.bf16.mxu0 %vm2195_vm0, %v2194_v0  ;;  %v1551_v51 = vsel %vm694_vm6, %v1541_v33, 0 }
 0x8ea   :  { %1866 = vmatprep.subr.bf16.mxu0 %v2194_v0 }
 0x8f0   :  { %1857 = vmatmul.mubr.msk.bf16.vlgmr.msra.gmra.mxu0 %vm465_vm2, %v1316_v53 }
 0x8f1   :  { %1868 = vmatprep.mubr.msk.bf16.mxu0 %vm2195_vm0, %v2194_v0 }
 0x999   :  { %v1201_v57 = vpop.f32.mrf.mxu1 }
 0x99b   :  { %v1840_v58 = vpop.f32.mrf.mxu1 }
 0x99d   :  { %v1204_v59 = vpop.f32.mrf.mxu1 }
 0x99f   :  { %v1841_v60 = vpop.f32.mrf.mxu1 }
 0x9a8   :  { %v1247_v62 = vpop.f32.mrf.mxu0 }
 0x9a9   :  { %v1687_v63 = vpack.c.bf16 %v1247_v62, %v1201_v57 }
 0x9aa   :  { %v1846_v1 = vpop.f32.mrf.mxu0 }
 0x9ab   :  { %1851 = vmatmul.mubr.msk.bf16.vlgmr.msra.gmra.mxu1 %vm465_vm2, %v1687_v63 }
 0x9ac   :  { %1861 = vmatpush3.bf16.xpose.msra.mxu1 %v1373_v2  ;;  %v1250_v3 = vpop.f32.mrf.mxu0  ;;  %1862 = vmatprep.mubr.msk.bf16.mxu1 %vm2195_vm0, %v2194_v0 }
 0x9ad   :  { %1872 = vmatprep.subr.bf16.mxu1 %v2194_v0 }
 0x9ae   :  { %v1847_v4 = vpop.f32.mrf.mxu0 }
 0x9b0   :  { %v1359_v5 = vpop.f32.mrf.mxu0 }
 0x9b1   :  { %v1360_v6 = vadd.f32 %v1359_v5, %v2391_v52 }
 0x9b2   :  { %v1858_v8 = vpop.f32.mrf.mxu0 }
 0x9b3   :  { %1863 = vmatmul.mubr.msk.bf16.vlgmr.msra.gmra.mxu1 %vm465_vm2, %v1366_v7  ;;  %v1415_v9 = vsel %vm558_vm5, %v1360_v6, -inf }
 0x9b4   :  { %1416 = vmax.xlane.f32.xlu0 %v1415_v9  ;;  %v1362_v10 = vpop.f32.mrf.mxu0  ;;  %1874 = vmatprep.mubr.msk.bf16.mxu1 %vm2195_vm0, %v2194_v0 }
 0x9b6   :  { %v1859_v11 = vpop.f32.mrf.mxu0 }
 0xa3d   :  { %v1417_v12 = vpop.xlane.xlu0 %1416 }
 0xa3e   :  { %v1421_v13 = vsub.f32 %v1360_v6, %v1417_v12 }
 0xa40   :  { %v1423_v14 = vmul.f32 1.442695, %v1421_v13 }
 0xa42   :  { %1939 = vpow2.f32 %v1423_v14 }
 0xa4f   :  { %v1940_v15 = vpop.eup %1939 }
 0xa50   :  { %v1427_v16 = vsel %vm558_vm5, %v1940_v15, 0.0 }
 0xa51   :  { %1428 = vadd.xlane.f32.xlu0 %v1427_v16 }
 0xa6b   :  { %v1302_v52 = vpop.f32.mrf.mxu1 }
 0xa6c   :  { %v1311_v19 = vadd.f32 %v1309_v17, %v1302_v52 }
 0xa6d   :  { %v1852_v21 = vpop.f32.mrf.mxu1 }
 0xa6e   :  { %1313 = vst.msk [vmem:[#allocation18] sm:$0xff] %vm209_vm1, %v1311_v19 }
 0xa6f   :  { %v1305_v22 = vpop.f32.mrf.mxu1 }
 0xa70   :  { %v1312_v25 = vadd.f32 %v1310_v24, %v1305_v22 }
 0xa71   :  { %v1853_v27 = vpop.f32.mrf.mxu1 }
 0xa72   :  { %1314 = vst.msk [vmem:[#allocation18 + $0x8] sm:$0xff] %vm209_vm1, %v1312_v25 }
 0xa73   :  { %v1409_v29 = vpop.f32.mrf.mxu1 }
 0xa74   :  { %v1410_v30 = vadd.f32 %v1409_v29, %v2393_v54 }
 0xa75   :  { %v1864_v31 = vpop.f32.mrf.mxu1 }
 0xa76   :  { %v1418_v34 = vsel %vm558_vm5, %v1410_v30, -inf }
 0xa77   :  { %1419 = vmax.xlane.f32.xlu1 %v1418_v34  ;;  %v1412_v35 = vpop.f32.mrf.mxu1 }
 0xa79   :  { %v1865_v36 = vpop.f32.mrf.mxu1 }
 0xa88   :  { %1492 = vrot.lane.b32.xlu1 %v2375_v42, %s2198_s2 }
 0xada   :  { %v1429_v37 = vpop.xlane.xlu0 %1428 }
 0xadb   :  { %1941 = vrcp.f32 %v1429_v37 }
 0xae8   :  { %v1942_v38 = vpop.eup %1941 }
 0xae9   :  { %v1435_v39 = vmul.f32 %v1942_v38, %v1940_v15 }
 0xaeb   :  { %v1437_v40 = vmul.f32 %v1435_v39, %v2415_v18 }
 0xaed   :  { %v1439_v26 = vadd.f32 %v1437_v40, %v2417_v20 }
 0xaef   :  { %1442 = vst.msk [vmem:[#allocation19 + $0x18] sm:$0xff] %vm558_vm5, %v1439_v26  ;;  %v1444_v20 = vpack.c.bf16 %v1439_v26, %v1439_v26 }
 0xb00   :  { %v1420_v54 = vpop.xlane.xlu1 %1419 }
 0xb01   :  { %v1422_v23 = vsub.f32 %v1410_v30, %v1420_v54 }
 0xb03   :  { %v1425_v32 = vmul.f32 1.442695, %v1422_v23 }
 0xb04   :  { %v1493_v41 = vpop.permute.xlu1 %1492 }
 0xb05   :  { %1943 = vpow2.f32 %v1425_v32  ;;  %1873 = vmatpush3.bf16.msra.mxu1 %v1493_v41 }
 0xb12   :  { %v1944_v43 = vpop.eup %1943 }
 0xb13   :  { %v1430_v45 = vsel %vm558_vm5, %v1944_v43, 0.0 }
 0xb14   :  { %1431 = vadd.xlane.f32.xlu0 %v1430_v45 }
 0xb2a   :  { %1446 = vrot.lane.b32.xlu0 %v2377_v44, %s2198_s2 }
 0xb9d   :  { %v1432_v42 = vpop.xlane.xlu0 %1431 }
 0xb9e   :  { %1945 = vrcp.f32 %v1432_v42 }
 0xba1   :  { %v1447_v46 = vpop.permute.xlu0 %1446 }
 0xba2   :  { %1867 = vmatpush3.bf16.msra.mxu0 %v1447_v46 }
 0xba3   :  { %1878 = vmatprep.subr.bf16.mxu0 %v2194_v0 }
 0xba5   :  { %1869 = vmatmul.mubr.msk.bf16.vlgmr.msra.gmra.mxu0 %vm558_vm5, %v1444_v20 }
 0xba6   :  { %1880 = vmatprep.mubr.msk.bf16.mxu0 %vm2195_vm0, %v2194_v0  ;;  %1879 = vmatpush3.bf16.msra.mxu0 %v1551_v51 }
 0xbab   :  { %v1946_v47 = vpop.eup %1945 }
 0xbac   :  { %v1436_v48 = vmul.f32 %v1946_v47, %v1944_v43 }
 0xbae   :  { %v1438_v49 = vmul.f32 %v1436_v48, %v2415_v18 }
 0xbb0   :  { %v1440_v50 = vadd.f32 %v1438_v49, %v2421_v28 }
 0xbb2   :  { %1443 = vst.msk [vmem:[#allocation19 + $0x38] sm:$0xff] %vm558_vm5, %v1440_v50  ;;  %v1445_v44 = vpack.c.bf16 %v1440_v50, %v1440_v50 }
 0xbb4   :  { %1875 = vmatmul.mubr.msk.bf16.vlgmr.msra.gmra.mxu1 %vm558_vm5, %v1445_v44 }
 0xc65   :  { %v1486_v53 = vpop.f32.mrf.mxu0 }
 0xc67   :  { %v1870_v55 = vpop.f32.mrf.mxu0 }
 0xc69   :  { %v1489_v56 = vpop.f32.mrf.mxu0 }
 0xc6b   :  { %v1871_v57 = vpop.f32.mrf.mxu0 }
 0xc74   :  { %v1532_v0 = vpop.f32.mrf.mxu1 }
 0xc75   :  { %v1688_v58 = vpack.c.bf16 %v1532_v0, %v1486_v53 }
 0xc76   :  { %v1876_v59 = vpop.f32.mrf.mxu1 }
 0xc77   :  { %1881 = vmatmul.mubr.msk.bf16.vlgmr.msra.gmra.mxu0 %vm465_vm2, %v1688_v58 }
 0xc78   :  { %v1535_v18 = vpop.f32.mrf.mxu1 }
 0xc7a   :  { %v1877_v28 = vpop.f32.mrf.mxu1 }
 0xc7b   :  { %2138 = shalt.err (!%p2135_p7)
}
 0xc7c   :  { %1623 = dma.vmem_to_hbm [thread:$0]  %s1618_s20, 1024, %s2603_s15, [#allocation20], %s2185_s28, %s2185_s28, %s2186_s29   ;;  %v1594_v61 = vld [vmem:[#allocation18] sm:$0xff]  ;;  %v1595_v2 = vld [vmem:[#allocation18 + $0x8] sm:$0xff] }
 0xc7d   :  { %s2200_s6 = smov [#allocation18]  }
 0xc7e   :  { %s1605_s18 = sshll.u32 %s2200_s6, 4  ;;  %s1606_s18 = int_to_ptr.vmem [resolvable:$true] %s1605_s18 }
 0xc7f   :  { %s2147_s8 = scalar_lea.vmem %s1606_s18, 256  ;;  %p2152_p9 = scmp.lt.s32.totalorder %s1606_s18, %s1606_s18 }
 0xc80   :  { %p2148_p8 = scmp.ne.s32.totalorder %s1606_s18, %s2147_s8  ;;  %p2153_p10 = scmp.lt.s32.totalorder %s2147_s8, %s2147_s8 }
 0xc82   :  { %p2154_p11 = por %p2153_p10, %p2152_p9 }
 0xc84   :  { %p2155_p12 = pnand %p2154_p11, %p2148_p8 }
 0xd37   :  { %v1587_v60 = vpop.f32.mrf.mxu0 }
 0xd38   :  { %v1596_v62 = vadd.f32 %v1594_v61, %v1587_v60 }
 0xd39   :  { %v1882_v63 = vpop.f32.mrf.mxu0 }
 0xd3a   :  { %1598 = vst.msk [vmem:[#allocation18] sm:$0xff] %vm209_vm1, %v1596_v62 }
 0xd3b   :  { %v1590_v1 = vpop.f32.mrf.mxu0 }
 0xd3c   :  { %v1597_v3 = vadd.f32 %v1595_v2, %v1590_v1 }
 0xd3d   :  { %v1883_v4 = vpop.f32.mrf.mxu0 }
 0xd3e   :  { %1599 = vst.msk [vmem:[#allocation18 + $0x8] sm:$0xff] %vm209_vm1, %v1597_v3 }
 0xd3f   :  { %2158 = shalt.err (!%p2155_p12)
}
 0xd40   :  { %1611 = dma.vmem_to_hbm [thread:$0]  %s1606_s18, 256, %s2602_s14, [#allocation5], %s2185_s28, %s2185_s28, %s2186_s29  }
 0xd41   :  { %2177 = dma.done.wait [#allocation5], 256  }
 0xd42   :  { %2178 = vsyncadd [#allocation5], 4294967040 }
 0xd43   :  { %2179 = dma.done.wait [#allocation20], 1024  }
 0xd44   :  { %2180 = vsyncadd [#allocation20], 4294966272 }
 0xd45   :  { %1630 = vsyncpa [#allocation4], 1 }
 0xd46   :  { %1631 = vsyncpa [#allocation7], 1 }
 0xd47   :  { %1632 = vsyncpa [#allocation10], 1 }
 0xd48   :  { %1633 = vsyncpa [#allocation13], 1 }
 0xd49   :  { %1634 = vsyncpa [#allocation16], 1 }
 0xd4a   :  { %1635 = vsyncpa [#allocation5], 1 }
 0xd4b   :  { %1636 = vsyncpa [#allocation20], 1 }

// kernel: tpu_custom_call.1
= control target key start
LH: loop header
LB: loop body
LE: loop exit
PB: predicated region body
PF: predicated region fallthrough
CT: control target
= control target key end

     0   :  { %22 = vsyncpa [#allocation4], 0  ;;  %s2588_s0 = inlined_call_operand.hbm [shape: bf16[2,8,32], index: 0, kind: input, shape index: {}]   ;;  %s2589_s1 = inlined_call_operand.hbm [shape: bf16[2,16,32], index: 1, kind: input, shape index: {}]   ;;  %s2590_s2 = inlined_call_operand.hbm [shape: bf16[2,16,32], index: 2, kind: input, shape index: {}]   ;;  %s2591_s3 = inlined_call_operand.hbm [shape: f32[2,8,16], index: 3, kind: input, shape index: {}]   ;;  %s2592_s4 = inlined_call_operand.<no memory space> [shape: f32[1], index: 4, kind: input, shape index: {}]   ;;  %s2593_s5 = inlined_call_operand.vmem [shape: f32[2,1,16], index: 5, kind: input, shape index: {}]   ;;  %s2594_s6 = inlined_call_operand.hbm [shape: bf16[32,32], index: 6, kind: input, shape index: {}]   ;;  %s2595_s7 = inlined_call_operand.hbm [shape: f32[1,32], index: 7, kind: input, shape index: {}]   ;;  %s2596_s8 = inlined_call_operand.hbm [shape: bf16[32,32], index: 8, kind: input, shape index: {}]   ;;  %s2597_s9 = inlined_call_operand.hbm [shape: f32[1,32], index: 9, kind: input, shape index: {}]   ;;  %s2598_s10 = inlined_call_operand.vmem [shape: bf16[32,32], index: 10, kind: input, shape index: {}]   ;;  %s2599_s11 = inlined_call_operand.vmem [shape: f32[1,32], index: 11, kind: input, shape index: {}]   ;;  %s2600_s12 = inlined_call_operand.hbm [shape: bf16[4,8,32], index: 12, kind: input, shape index: {}]   ;;  %s2601_s13 = inlined_call_operand.vmem [shape: f32[1,32], index: 13, kind: input, shape index: {}]   ;;  %s2602_s14 = inlined_call_operand.hbm [shape: f32[2,8,32], index: 14, kind: output, shape index: {0}]   ;;  %s2603_s15 = inlined_call_operand.hbm [shape: f32[2,4,8,16], index: 15, kind: output, shape index: {1}]  }
   0x1   :  { %23 = vsyncpa [#allocation7], 0 }
   0x2   :  { %24 = vsyncpa [#allocation10], 0 }
   0x3   :  { %25 = vsyncpa [#allocation13], 0 }
   0x4   :  { %26 = vsyncpa [#allocation16], 0 }
   0x5   :  { %27 = vsyncpa [#allocation5], 0 }
   0x6   :  { %28 = vsyncpa [#allocation20], 0  ;;  %s2181_s18 = smov [#allocation6]   ;;  %s2182_s20 = smov [#allocation9]  }
   0x7   :  { %s46_s19 = sshll.u32 %s2181_s18, 4  ;;  %s70_s21 = sshll.u32 %s2182_s20, 4  ;;  %s47_s19 = int_to_ptr.vmem [resolvable:$true] %s46_s19  ;;  %s71_s21 = int_to_ptr.vmem [resolvable:$true] %s70_s21 }
   0x8   :  { %s1955_s22 = scalar_lea.vmem %s47_s19, 256  ;;  %p1960_p1 = scmp.lt.s32.totalorder %s47_s19, %s47_s19 }
   0x9   :  { %p1956_p0 = scmp.ne.s32.totalorder %s47_s19, %s1955_s22  ;;  %p1961_p2 = scmp.lt.s32.totalorder %s1955_s22, %s1955_s22 }
   0xb   :  { %p1962_p3 = por %p1961_p2, %p1960_p1 }
   0xd   :  { %p1963_p4 = pnand %p1962_p3, %p1956_p0 }
   0xf   :  { %1966 = shalt.err (!%p1963_p4)
}
  0x10   :  { %s2183_s23 = smov 64   ;;  %s2184_s24 = smov 4  }
  0x11   :  { %52 = dma.hbm_to_vmem [thread:$0]  %s2589_s1, 256, %s47_s19, [#allocation7], %s2183_s23, %s2183_s23, %s2184_s24  }
  0x12   :  { %s1975_s27 = scalar_lea.vmem %s71_s21, 256  ;;  %p1980_p6 = scmp.lt.s32.totalorder %s71_s21, %s71_s21 }
  0x13   :  { %p1976_p5 = scmp.ne.s32.totalorder %s71_s21, %s1975_s27  ;;  %p1981_p7 = scmp.lt.s32.totalorder %s1975_s27, %s1975_s27 }
  0x15   :  { %p1982_p8 = por %p1981_p7, %p1980_p6 }
  0x17   :  { %p1983_p9 = pnand %p1982_p8, %p1976_p5 }
  0x19   :  { %1986 = shalt.err (!%p1983_p9)
}
  0x1a   :  { %s2185_s28 = smov 128   ;;  %s2186_s29 = smov 8  }
  0x1b   :  { %76 = dma.hbm_to_vmem [thread:$0]  %s2591_s3, 256, %s71_s21, [#allocation10], %s2185_s28, %s2185_s28, %s2186_s29  }
  0x1c   :  { %s2187_s17 = smov [#allocation12]   ;;  %s2188_s20 = smov [#allocation15]  }
  0x1d   :  { %s99_s18 = sshll.u32 %s2187_s17, 4  ;;  %s121_s1 = sshll.u32 %s2188_s20, 4  ;;  %s100_s18 = int_to_ptr.vmem [resolvable:$true] %s99_s18  ;;  %s122_s1 = int_to_ptr.vmem [resolvable:$true] %s121_s1 }
  0x1e   :  { %s1995_s19 = scalar_lea.vmem %s100_s18, 16  ;;  %s1999_s22 = scalar_lea.vmem %s100_s18, 32 }
  0x1f   :  { %p1996_p10 = scmp.ne.s32.totalorder %s100_s18, %s1995_s19  ;;  %p2000_p11 = scmp.lt.s32.totalorder %s100_s18, %s100_s18 }
  0x20   :  { %p2001_p12 = scmp.lt.s32.totalorder %s1999_s22, %s1995_s19 }
  0x22   :  { %p2002_p13 = por %p2001_p12, %p2000_p11 }
  0x24   :  { %p2003_p0 = pnand %p2002_p13, %p1996_p10 }
  0x26   :  { %2006 = shalt.err (!%p2003_p0)
}
  0x27   :  { %102 = dma.hbm_to_vmem [thread:$0]  %s2595_s7, 16, %s100_s18, [#allocation13]  }
  0x28   :  { %s2015_s27 = scalar_lea.vmem %s122_s1, 16  ;;  %s2019_s3 = scalar_lea.vmem %s122_s1, 32 }
  0x29   :  { %p2016_p1 = scmp.ne.s32.totalorder %s122_s1, %s2015_s27  ;;  %p2020_p2 = scmp.lt.s32.totalorder %s122_s1, %s122_s1 }
  0x2a   :  { %p2021_p3 = scmp.lt.s32.totalorder %s2019_s3, %s2015_s27 }
  0x2c   :  { %p2022_p4 = por %p2021_p3, %p2020_p2 }
  0x2e   :  { %p2023_p5 = pnand %p2022_p4, %p2016_p1 }
  0x30   :  { %2026 = shalt.err (!%p2023_p5)
}
  0x31   :  { %124 = dma.hbm_to_vmem [thread:$0]  %s2597_s9, 16, %s122_s1, [#allocation16]  }
  0x32   :  { %s2189_s16 = smov [#allocation3]   ;;  %s2190_s20 = smov [#allocation8]  }
  0x33   :  { %s34_s17 = sshll.u32 %s2189_s16, 4  ;;  %s58_s19 = sshll.u32 %s2190_s20, 4  ;;  %s35_s17 = int_to_ptr.vmem [resolvable:$true] %s34_s17  ;;  %s59_s19 = int_to_ptr.vmem [resolvable:$true] %s58_s19 }
  0x34   :  { %s2035_s22 = scalar_lea.vmem %s35_s17, 128  ;;  %p2040_p7 = scmp.lt.s32.totalorder %s35_s17, %s35_s17 }
  0x35   :  { %p2036_p6 = scmp.ne.s32.totalorder %s35_s17, %s2035_s22  ;;  %p2041_p8 = scmp.lt.s32.totalorder %s2035_s22, %s2035_s22 }
  0x37   :  { %p2042_p9 = por %p2041_p8, %p2040_p7 }
  0x39   :  { %p2043_p10 = pnand %p2042_p9, %p2036_p6 }
  0x3b   :  { %2046 = shalt.err (!%p2043_p10)
}
  0x3c   :  { %40 = dma.hbm_to_vmem [thread:$0]  %s2588_s0, 128, %s35_s17, [#allocation4], %s2183_s23, %s2183_s23, %s2184_s24  }
  0x3d   :  { %s2055_s9 = scalar_lea.vmem %s59_s19, 256  ;;  %p2060_p12 = scmp.lt.s32.totalorder %s59_s19, %s59_s19 }
  0x3e   :  { %p2056_p11 = scmp.ne.s32.totalorder %s59_s19, %s2055_s9  ;;  %p2061_p13 = scmp.lt.s32.totalorder %s2055_s9, %s2055_s9 }
  0x40   :  { %p2062_p0 = por %p2061_p13, %p2060_p12 }
  0x42   :  { %p2063_p1 = pnand %p2062_p0, %p2056_p11 }
  0x44   :  { %2066 = shalt.err (!%p2063_p1)
}
  0x45   :  { %64 = dma.hbm_to_vmem [thread:$0]  %s2590_s2, 256, %s59_s19, [#allocation7], %s2183_s23, %s2183_s23, %s2184_s24  }
  0x46   :  { %s2191_s26 = smov [#allocation11]   ;;  %s2192_s3 = smov [#allocation14]  }
  0x47   :  { %s86_s27 = sshll.u32 %s2191_s26, 4  ;;  %s108_s21 = sshll.u32 %s2192_s3, 4  ;;  %s87_s27 = int_to_ptr.vmem [resolvable:$true] %s86_s27  ;;  %s109_s21 = int_to_ptr.vmem [resolvable:$true] %s108_s21 }
  0x48   :  { %s2075_s0 = scalar_lea.vmem %s87_s27, 256  ;;  %p2080_p3 = scmp.lt.s32.totalorder %s87_s27, %s87_s27 }
  0x49   :  { %p2076_p2 = scmp.ne.s32.totalorder %s87_s27, %s2075_s0  ;;  %p2081_p4 = scmp.lt.s32.totalorder %s2075_s0, %s2075_s0 }
  0x4b   :  { %p2082_p5 = por %p2081_p4, %p2080_p3 }
  0x4d   :  { %p2083_p6 = pnand %p2082_p5, %p2076_p2 }
  0x4f   :  { %2086 = shalt.err (!%p2083_p6)
}
  0x50   :  { %92 = dma.hbm_to_vmem [thread:$0]  %s2594_s6, 256, %s87_s27, [#allocation10], %s2183_s23, %s2183_s23, %s2184_s24  }
  0x51   :  { %s2095_s2 = scalar_lea.vmem %s109_s21, 256  ;;  %p2100_p8 = scmp.lt.s32.totalorder %s109_s21, %s109_s21 }
  0x52   :  { %p2096_p7 = scmp.ne.s32.totalorder %s109_s21, %s2095_s2  ;;  %p2101_p9 = scmp.lt.s32.totalorder %s2095_s2, %s2095_s2 }
  0x54   :  { %p2102_p10 = por %p2101_p9, %p2100_p8 }
  0x56   :  { %p2103_p11 = pnand %p2102_p10, %p2096_p7 }
  0x58   :  { %2106 = shalt.err (!%p2103_p11)
}
  0x59   :  { %114 = dma.hbm_to_vmem [thread:$0]  %s2596_s8, 256, %s109_s21, [#allocation13], %s2183_s23, %s2183_s23, %s2184_s24  }
  0x5a   :  { %s2193_s19 = smov [#allocation17]  }
  0x5b   :  { %s134_s22 = sshll.u32 %s2193_s19, 4  ;;  %s135_s22 = int_to_ptr.vmem [resolvable:$true] %s134_s22 }
  0x5c   :  { %s2115_s7 = scalar_lea.vmem %s135_s22, 256  ;;  %p2120_p13 = scmp.lt.s32.totalorder %s135_s22, %s135_s22 }
  0x5d   :  { %p2116_p12 = scmp.ne.s32.totalorder %s135_s22, %s2115_s7  ;;  %p2121_p0 = scmp.lt.s32.totalorder %s2115_s7, %s2115_s7 }
  0x5f   :  { %p2122_p1 = por %p2121_p0, %p2120_p13 }
  0x61   :  { %p2123_p2 = pnand %p2122_p1, %p2116_p12 }
  0x63   :  { %2126 = shalt.err (!%p2123_p2)
}
  0x64   :  { %140 = dma.hbm_to_vmem [thread:$0]  %s2600_s12, 256, %s135_s22, [#allocation16], %s2183_s23, %s2183_s23, %s2184_s24  }
  0x65   :  { %2167 = dma.done.wait [#allocation4], 128  }
  0x66   :  { %2168 = vsyncadd [#allocation4], 4294967168 }
  0x67   :  { %2169 = dma.done.wait [#allocation7], 512  }
  0x68   :  { %2170 = vsyncadd [#allocation7], 4294966784 }
  0x69   :  { %2171 = dma.done.wait [#allocation10], 512  }
  0x6a   :  { %2172 = vsyncadd [#allocation10], 4294966784 }
  0x6b   :  { %2173 = dma.done.wait [#allocation13], 272  }
  0x6c   :  { %2174 = vsyncadd [#allocation13], 4294967024 }
  0x6d   :  { %2175 = dma.done.wait [#allocation16], 272  }
  0x6e   :  { %2176 = vsyncadd [#allocation16], 4294967024  ;;  %v2194_v0 = vmov 0.0   ;;  %vm2195_vm0 = vmmov 0   ;;  %v1904_v1 = vld [vmem:[#allocation14 + $0x8] sm:$0xff]   ;;  %v1905_v2 = vld [vmem:[#allocation14] sm:$0xff]   ;;  %v455_v45 = vlaneseq }
  0x6f   :  { %1740 = vmatprep.subr.bf16.mxu0 %v2194_v0  ;;  %1744 = vmatprep.mubr.msk.bf16.mxu0 %vm2195_vm0, %v2194_v0  ;;  %vm209_vm1 = vcmask 261120   ;;  %v1906_v3 = vld [vmem:[#allocation6] sm:$0xff]   ;;  %v1908_v4 = vld [vmem:[#allocation11 + $0x8] sm:$0xff]   ;;  %v1907_v5 = vld [vmem:[#allocation6 + $0x8] sm:$0xff]   ;;  %vm465_vm2 = vcmask 64512   ;;  %vm558_vm5 = vcmask 130048  }
  0x70   :  { %1748 = vmatprep.subr.bf16.mxu1 %v1904_v1  ;;  %1752 = vmatprep.mubr.msk.bf16.mxu1 %vm209_vm1, %v1906_v3  ;;  %v1909_v6 = vld [vmem:[#allocation11] sm:$0xff]   ;;  %v1910_v7 = vld [vmem:[#allocation3] sm:$0xff]   ;;  %v1911_v8 = vld [vmem:[%s2598_s10 + $0x8] sm:$0xff]   ;;  %v456_v47 = vshrl.u32 %v455_v45, 7  ;;  %s447_s21 = ssub.f32 1.0, %s2592_s4  ;;  %vm694_vm6 = vcmask 1043456  }
  0x71   :  { %1749 = vmatpush3.bf16.msra.mxu1 %v1904_v1  ;;  %1741 = vmatpush3.bf16.msra.mxu0 %v1908_v4  ;;  %v1912_v9 = vld [vmem:[%s2598_s10] sm:$0xff]   ;;  %v1913_v10 = vld [vmem:[#allocation8] sm:$0xff]   ;;  %v1637_v21 = vld [vmem:[#allocation12] ss:$0 sm:$0xff]  ;;  %s2198_s2 = smov 104   ;;  %s2199_s17 = smov [#allocation19]  }
  0x72   :  { %1750 = vmatprep.subr.bf16.mxu1 %v1905_v2  ;;  %1742 = vmatprep.subr.bf16.mxu0 %v2194_v0  ;;  %v1914_v11 = vld [vmem:[#allocation8 + $0x8] sm:$0xff]   ;;  %v1642_v13 = vld [vmem:[#allocation15] ss:$0 sm:$0xff]  ;;  %v457_v49 = vsub.s32 0, %v456_v47  ;;  %s1617_s20 = sshll.u32 %s2199_s17, 4  ;;  %s1618_s20 = int_to_ptr.vmem [resolvable:$true] %s1617_s20 }
  0x73   :  { %v1649_v35 = vld [vmem:[%s2599_s11] ss:$0 sm:$0xff]  ;;  %v441_v48 = vld [vmem:[%s2593_s5 + $0x1] sm:$0x1]  ;;  %s2127_s19 = scalar_lea.vmem %s1618_s20, 1024  ;;  %p2132_p4 = scmp.lt.s32.totalorder %s1618_s20, %s1618_s20 }
  0x74   :  { %v440_v46 = vld [vmem:[%s2593_s5] sm:$0x1]  ;;  %vm443_vm4 = vcmp.gt.f32.partialorder %v441_v48, 0.5  ;;  %s2196_s5 = smov 120   ;;  %p2128_p3 = scmp.ne.s32.totalorder %s1618_s20, %s2127_s19 }
  0x75   :  { %1751 = vmatpush3.bf16.msra.mxu1 %v1905_v2  ;;  %1743 = vmatpush3.bf16.msra.mxu0 %v1909_v6  ;;  %vm442_vm3 = vcmp.gt.f32.partialorder %v440_v46, 0.5  ;;  %v445_v51 = vsel %vm443_vm4, -inf, %v2194_v0  ;;  %p2133_p5 = scmp.lt.s32.totalorder %s2127_s19, %s2127_s19 }
  0x76   :  { %1764 = vmatprep.subr.bf16.mxu1 %v2194_v0  ;;  %1756 = vmatprep.subr.bf16.mxu0 %v1911_v8  ;;  %v444_v50 = vsel %vm442_vm3, -inf, %v2194_v0  ;;  %v2393_v54 = vrot.slane %v445_v51, %v457_v49 }
  0x77   :  { %v2391_v52 = vrot.slane %v444_v50, %v457_v49  ;;  %p2134_p6 = por %p2133_p5, %p2132_p4 }
  0x78   :  { %1753 = vmatmul.mubr.msk.bf16.vlgmr.msra.gmra.mxu1 %vm209_vm1, %v1907_v5  ;;  %1745 = vmatmul.mubr.msk.bf16.vlgmr.msra.gmra.mxu0 %vm209_vm1, %v1910_v7 }
  0x79   :  { %1766 = vmatprep.mubr.msk.bf16.mxu1 %vm2195_vm0, %v2194_v0  ;;  %1757 = vmatpush3.bf16.msra.mxu0 %v1911_v8  ;;  %p2135_p7 = pnand %p2134_p6, %p2128_p3 }
  0x7a   :  { %1758 = vmatprep.subr.bf16.mxu0 %v1912_v9  ;;  %1760 = vmatprep.mubr.msk.bf16.mxu0 %vm209_vm1, %v1913_v10 }
  0x7d   :  { %1759 = vmatpush3.bf16.msra.mxu0 %v1912_v9 }
  0x7e   :  { %1770 = vmatprep.subr.bf16.mxu0 %v2194_v0 }
  0x80   :  { %1761 = vmatmul.mubr.msk.bf16.vlgmr.msra.gmra.mxu0 %vm209_vm1, %v1914_v11 }
  0x81   :  { %1772 = vmatprep.mubr.msk.bf16.mxu0 %vm2195_vm0, %v2194_v0 }
 0x138   :  { %v1754_v12 = vpop.f32.mrf.mxu1  ;;  %v247_v15 = vpop.f32.mrf.mxu0 }
 0x139   :  { %v336_v17 = vadd.f32 %v1754_v12, %v1642_v13  ;;  %v248_v30 = vadd.f32 %v1637_v21, %v247_v15  ;;  %v448_v15 = vld [vmem:[#allocation9] sm:$0xff] }
 0x13a   :  { %v327_v14 = vpop.f32.mrf.mxu1  ;;  %v1746_v19 = vpop.f32.mrf.mxu0 }
 0x13b   :  { %v328_v22 = vadd.f32 %v1642_v13, %v327_v14  ;;  %v2362_v33 = vpack.c.bf16 %v248_v30, %v248_v30 }
 0x13c   :  { %v1755_v16 = vpop.f32.mrf.mxu1  ;;  %v250_v25 = vpop.f32.mrf.mxu0 }
 0x13d   :  { %v339_v18 = vadd.f32 %v1755_v16, %v1642_v13  ;;  %v251_v28 = vadd.f32 %v1637_v21, %v250_v25  ;;  %v450_v16 = vstv %s2592_s4  ;;  %v449_v21 = vld [vmem:[#allocation9 + $0x8] sm:$0xff] }
 0x13e   :  { %v330_v20 = vpop.f32.mrf.mxu1  ;;  %v1747_v29 = vpop.f32.mrf.mxu0 }
 0x13f   :  { %v2350_v23 = vpack.c.bf16 %v339_v18, %v336_v17  ;;  %v331_v24 = vadd.f32 %v1642_v13, %v330_v20  ;;  %v2359_v32 = vpack.c.bf16 %v251_v28, %v251_v28  ;;  %v2415_v18 = vstv %s447_s21 }
 0x140   :  { %v1762_v34 = vpop.f32.mrf.mxu0  ;;  %v2417_v20 = vmul.f32 %v450_v16, %v448_v15  ;;  %v2421_v28 = vmul.f32 %v450_v16, %v449_v21 }
 0x141   :  { %v2352_v26 = vpack.c.bf16 %v331_v24, %v328_v22  ;;  %v516_v27 = vsel %vm465_vm2, %v2350_v23, 0  ;;  %v424_v37 = vadd.f32 %v1762_v34, %v1649_v35 }
 0x142   :  { %1771 = vmatpush3.bf16.xpose.msra.mxu0 %v516_v27  ;;  %v415_v36 = vpop.f32.mrf.mxu0 }
 0x143   :  { %v470_v31 = vsel %vm465_vm2, %v2352_v26, 0  ;;  %1782 = vmatprep.subr.bf16.mxu0 %v2194_v0  ;;  %v416_v39 = vadd.f32 %v1649_v35, %v415_v36 }
 0x144   :  { %1765 = vmatpush3.bf16.xpose.msra.mxu1 %v470_v31  ;;  %v1763_v38 = vpop.f32.mrf.mxu0 }
 0x145   :  { %1776 = vmatprep.subr.bf16.mxu1 %v2194_v0  ;;  %v427_v40 = vadd.f32 %v1763_v38, %v1649_v35 }
 0x146   :  { %v418_v41 = vpop.f32.mrf.mxu0 }
 0x147   :  { %v2375_v42 = vpack.c.bf16 %v427_v40, %v424_v37  ;;  %v419_v43 = vadd.f32 %v1649_v35, %v418_v41 }
 0x149   :  { %1773 = vmatmul.mubr.msk.bf16.vlgmr.msra.gmra.mxu0 %vm465_vm2, %v2359_v32  ;;  %v2377_v44 = vpack.c.bf16 %v419_v43, %v416_v39  ;;  %v678_v39 = vld [vmem:[#allocation17] sm:$0xf] }
 0x14a   :  { %1784 = vmatprep.mubr.msk.bf16.mxu0 %vm2195_vm0, %v2194_v0  ;;  %1783 = vmatpush3.bf16.msra.mxu0 %v2375_v42  ;;  %v696_v40 = vsel %vm694_vm6, %v678_v39, 0 }
 0x14b   :  { %1767 = vmatmul.mubr.msk.bf16.vlgmr.msra.gmra.mxu1 %vm465_vm2, %v2362_v33  ;;  %1794 = vmatprep.subr.bf16.mxu0 %v2194_v0 }
 0x14c   :  { %1778 = vmatprep.mubr.msk.bf16.mxu1 %vm2195_vm0, %v2194_v0  ;;  %1777 = vmatpush3.bf16.msra.mxu1 %v2377_v44 }
 0x14d   :  { %1788 = vmatprep.subr.bf16.mxu1 %v2194_v0 }
 0x209   :  { %v552_v53 = vpop.f32.mrf.mxu0 }
 0x20a   :  { %v553_v60 = vadd.f32 %v552_v53, %v2393_v54 }
 0x20b   :  { %v506_v55 = vpop.f32.mrf.mxu1  ;;  %v1774_v56 = vpop.f32.mrf.mxu0 }
 0x20c   :  { %v507_v57 = vadd.f32 %v506_v55, %v2391_v52  ;;  %v562_v2 = vsel %vm558_vm5, %v553_v60, -inf }
 0x20d   :  { %v1768_v58 = vpop.f32.mrf.mxu1  ;;  %v555_v59 = vpop.f32.mrf.mxu0 }
 0x20e   :  { %v559_v61 = vsel %vm558_vm5, %v507_v57, -inf }
 0x20f   :  { %560 = vmax.xlane.f32.xlu0 %v559_v61  ;;  %v509_v62 = vpop.f32.mrf.mxu1  ;;  %v1775_v63 = vpop.f32.mrf.mxu0 }
 0x211   :  { %v1769_v1 = vpop.f32.mrf.mxu1 }
 0x213   :  { %563 = vmax.xlane.f32.xlu0 %v562_v2 }
 0x229   :  { %744 = vrot.lane.b32.xlu0 %v2352_v26, %s2196_s5 }
 0x298   :  { %v561_v3 = vpop.xlane.xlu0 %560 }
 0x299   :  { %v565_v4 = vsub.f32 %v507_v57, %v561_v3 }
 0x29b   :  { %v567_v5 = vmul.f32 1.442695, %v565_v4  ;;  %v1662_v4 = vld [vmem:[%s2601_s13] ss:$0 sm:$0xff]  ;;  %s2197_s13 = smov 112  }
 0x29c   :  { %v564_v6 = vpop.xlane.xlu0 %563 }
 0x29d   :  { %1915 = vpow2.f32 %v567_v5  ;;  %v566_v7 = vsub.f32 %v553_v60, %v564_v6 }
 0x29f   :  { %v569_v8 = vmul.f32 1.442695, %v566_v7 }
 0x2a0   :  { %v745_v34 = vpop.permute.xlu0 %744 }
 0x2a1   :  { %1917 = vpow2.f32 %v569_v8  ;;  %v750_v36 = vsel %vm465_vm2, %v745_v34, 0 }
 0x2aa   :  { %v1916_v9 = vpop.eup %1915 }
 0x2ab   :  { %v571_v10 = vsel %vm558_vm5, %v1916_v9, 0.0 }
 0x2ac   :  { %572 = vadd.xlane.f32.xlu1 %v571_v10 }
 0x2ae   :  { %v1918_v11 = vpop.eup %1917 }
 0x2af   :  { %v574_v12 = vsel %vm558_vm5, %v1918_v11, 0.0 }
 0x2b0   :  { %575 = vadd.xlane.f32.xlu1 %v574_v12 }
 0x2c1   :  { %795 = vrot.lane.b32.xlu1 %v2350_v23, %s2196_s5 }
 0x2c5   :  { %741 = vrot.lane.b32.xlu1 %v2362_v33, %s2196_s5 }
 0x2c9   :  { %792 = vrot.lane.b32.xlu1 %v2359_v32, %s2196_s5 }
 0x335   :  { %v573_v13 = vpop.xlane.xlu1 %572 }
 0x336   :  { %1919 = vrcp.f32 %v573_v13 }
 0x339   :  { %v576_v14 = vpop.xlane.xlu1 %575 }
 0x33a   :  { %1921 = vrcp.f32 %v576_v14 }
 0x33d   :  { %v796_v37 = vpop.permute.xlu1 %795 }
 0x33e   :  { %v801_v50 = vsel %vm465_vm2, %v796_v37, 0 }
 0x341   :  { %v742_v38 = vpop.permute.xlu1 %741 }
 0x343   :  { %v1920_v17 = vpop.eup %1919 }
 0x344   :  { %v579_v19 = vmul.f32 %v1920_v17, %v1916_v9 }
 0x345   :  { %v793_v57 = vpop.permute.xlu1 %792 }
 0x346   :  { %v582_v22 = vmul.f32 %v2415_v18, %v579_v19 }
 0x347   :  { %v1922_v24 = vpop.eup %1921 }
 0x348   :  { %v580_v25 = vmul.f32 %v1922_v24, %v1918_v11  ;;  %v584_v27 = vadd.f32 %v582_v22, %v2417_v20 }
 0x34a   :  { %586 = vst.msk [vmem:[#allocation19] sm:$0xff] %vm558_vm5, %v584_v27  ;;  %v588_v29 = vpack.c.bf16 %v584_v27, %v584_v27  ;;  %v583_v30 = vmul.f32 %v2415_v18, %v580_v25 }
 0x34c   :  { %1779 = vmatmul.mubr.msk.bf16.vlgmr.msra.gmra.mxu1 %vm558_vm5, %v588_v29  ;;  %v585_v31 = vadd.f32 %v583_v30, %v2421_v28 }
 0x34d   :  { %1790 = vmatprep.mubr.msk.bf16.mxu1 %vm2195_vm0, %v2194_v0  ;;  %1789 = vmatpush3.bf16.msra.mxu1 %v696_v40 }
 0x34e   :  { %587 = vst.msk [vmem:[#allocation19 + $0x20] sm:$0xff] %vm558_vm5, %v585_v31  ;;  %v589_v35 = vpack.c.bf16 %v585_v31, %v585_v31  ;;  %1800 = vmatprep.subr.bf16.mxu1 %v2194_v0 }
 0x350   :  { %1785 = vmatmul.mubr.msk.bf16.vlgmr.msra.gmra.mxu0 %vm558_vm5, %v589_v35 }
 0x351   :  { %1795 = vmatpush3.bf16.xpose.msra.mxu0 %v750_v36  ;;  %1796 = vmatprep.mubr.msk.bf16.mxu0 %vm2195_vm0, %v2194_v0 }
 0x352   :  { %1806 = vmatprep.subr.bf16.mxu0 %v2194_v0 }
 0x358   :  { %1797 = vmatmul.mubr.msk.bf16.vlgmr.msra.gmra.mxu0 %vm465_vm2, %v742_v38 }
 0x359   :  { %1808 = vmatprep.mubr.msk.bf16.mxu0 %vm2195_vm0, %v2194_v0 }
 0x40c   :  { %v627_v41 = vpop.f32.mrf.mxu1 }
 0x40e   :  { %v1780_v43 = vpop.f32.mrf.mxu1 }
 0x410   :  { %v630_v45 = vpop.f32.mrf.mxu1  ;;  %v670_v46 = vpop.f32.mrf.mxu0 }
 0x411   :  { %v1685_v47 = vpack.c.bf16 %v670_v46, %v627_v41 }
 0x412   :  { %v1781_v48 = vpop.f32.mrf.mxu1  ;;  %v1786_v49 = vpop.f32.mrf.mxu0 }
 0x413   :  { %1791 = vmatmul.mubr.msk.bf16.vlgmr.msra.gmra.mxu1 %vm465_vm2, %v1685_v47  ;;  %v971_v48 = vld [vmem:[#allocation17 + $0x4] sm:$0xf] }
 0x414   :  { %1801 = vmatpush3.bf16.xpose.msra.mxu1 %v801_v50  ;;  %v673_v51 = vpop.f32.mrf.mxu0  ;;  %1802 = vmatprep.mubr.msk.bf16.mxu1 %vm2195_vm0, %v2194_v0  ;;  %v981_v49 = vsel %vm694_vm6, %v971_v48, 0 }
 0x415   :  { %1812 = vmatprep.subr.bf16.mxu1 %v2194_v0 }
 0x416   :  { %v1787_v53 = vpop.f32.mrf.mxu0 }
 0x418   :  { %v786_v55 = vpop.f32.mrf.mxu0 }
 0x419   :  { %v787_v56 = vadd.f32 %v786_v55, %v2391_v52 }
 0x41a   :  { %v1798_v58 = vpop.f32.mrf.mxu0 }
 0x41b   :  { %1803 = vmatmul.mubr.msk.bf16.vlgmr.msra.gmra.mxu1 %vm465_vm2, %v793_v57  ;;  %v843_v59 = vsel %vm558_vm5, %v787_v56, -inf }
 0x41c   :  { %844 = vmax.xlane.f32.xlu0 %v843_v59  ;;  %v789_v60 = vpop.f32.mrf.mxu0  ;;  %1814 = vmatprep.mubr.msk.bf16.mxu1 %vm2195_vm0, %v2194_v0 }
 0x41e   :  { %v1799_v61 = vpop.f32.mrf.mxu0 }
 0x4a5   :  { %v845_v62 = vpop.xlane.xlu0 %844 }
 0x4a6   :  { %v849_v63 = vsub.f32 %v787_v56, %v845_v62 }
 0x4a8   :  { %v851_v1 = vmul.f32 1.442695, %v849_v63 }
 0x4aa   :  { %1923 = vpow2.f32 %v851_v1 }
 0x4b7   :  { %v1924_v2 = vpop.eup %1923 }
 0x4b8   :  { %v855_v3 = vsel %vm558_vm5, %v1924_v2, 0.0 }
 0x4b9   :  { %856 = vadd.xlane.f32.xlu0 %v855_v3 }
 0x4d3   :  { %v732_v5 = vpop.f32.mrf.mxu1 }
 0x4d4   :  { %v733_v6 = vadd.f32 %v1662_v4, %v732_v5 }
 0x4d5   :  { %v1792_v7 = vpop.f32.mrf.mxu1 }
 0x4d6   :  { %739 = vst.msk [vmem:[#allocation18] sm:$0xff] %vm209_vm1, %v733_v6 }
 0x4d7   :  { %v735_v8 = vpop.f32.mrf.mxu1 }
 0x4d8   :  { %v736_v9 = vadd.f32 %v1662_v4, %v735_v8 }
 0x4d9   :  { %v1793_v10 = vpop.f32.mrf.mxu1 }
 0x4da   :  { %740 = vst.msk [vmem:[#allocation18 + $0x8] sm:$0xff] %vm209_vm1, %v736_v9 }
 0x4db   :  { %v837_v11 = vpop.f32.mrf.mxu1 }
 0x4dc   :  { %v838_v12 = vadd.f32 %v837_v11, %v2393_v54 }
 0x4dd   :  { %v1804_v13 = vpop.f32.mrf.mxu1 }
 0x4de   :  { %v846_v14 = vsel %vm558_vm5, %v838_v12, -inf  ;;  %v1024_v13 = vld [vmem:[#allocation18] sm:$0xff] }
 0x4df   :  { %847 = vmax.xlane.f32.xlu1 %v846_v14  ;;  %v840_v15 = vpop.f32.mrf.mxu1 }
 0x4e1   :  { %v1805_v16 = vpop.f32.mrf.mxu1 }
 0x4f0   :  { %922 = vrot.lane.b32.xlu1 %v2375_v42, %s2196_s5 }
 0x4f4   :  { %1032 = vrot.lane.b32.xlu1 %v2352_v26, %s2197_s13 }
 0x4f8   :  { %1082 = vrot.lane.b32.xlu1 %v2350_v23, %s2197_s13 }
 0x4fc   :  { %1080 = vrot.lane.b32.xlu1 %v2359_v32, %s2197_s13 }
 0x542   :  { %v857_v17 = vpop.xlane.xlu0 %856 }
 0x543   :  { %1925 = vrcp.f32 %v857_v17  ;;  %v1025_v17 = vld [vmem:[#allocation18 + $0x8] sm:$0xff] }
 0x550   :  { %v1926_v19 = vpop.eup %1925 }
 0x551   :  { %v863_v21 = vmul.f32 %v1926_v19, %v1924_v2 }
 0x553   :  { %v865_v22 = vmul.f32 %v863_v21, %v2415_v18 }
 0x555   :  { %v867_v24 = vadd.f32 %v865_v22, %v2417_v20 }
 0x557   :  { %870 = vst.msk [vmem:[#allocation19 + $0x8] sm:$0xff] %vm558_vm5, %v867_v24  ;;  %v872_v37 = vpack.c.bf16 %v867_v24, %v867_v24 }
 0x568   :  { %v848_v25 = vpop.xlane.xlu1 %847 }
 0x569   :  { %v850_v27 = vsub.f32 %v838_v12, %v848_v25 }
 0x56b   :  { %v853_v29 = vmul.f32 1.442695, %v850_v27 }
 0x56c   :  { %v923_v30 = vpop.permute.xlu1 %922 }
 0x56d   :  { %1927 = vpow2.f32 %v853_v29  ;;  %1813 = vmatpush3.bf16.msra.mxu1 %v923_v30 }
 0x56e   :  { %1824 = vmatprep.subr.bf16.mxu1 %v2194_v0 }
 0x570   :  { %v1033_v43 = vpop.permute.xlu1 %1032 }
 0x571   :  { %v1038_v46 = vsel %vm465_vm2, %v1033_v43, 0 }
 0x574   :  { %v1083_v56 = vpop.permute.xlu1 %1082 }
 0x575   :  { %v1088_v60 = vsel %vm465_vm2, %v1083_v56, 0 }
 0x578   :  { %v1081_v2 = vpop.permute.xlu1 %1080 }
 0x57a   :  { %v1928_v31 = vpop.eup %1927 }
 0x57b   :  { %v858_v34 = vsel %vm558_vm5, %v1928_v31, 0.0 }
 0x57c   :  { %859 = vadd.xlane.f32.xlu0 %v858_v34 }
 0x592   :  { %875 = vrot.lane.b32.xlu0 %v2377_v44, %s2196_s5 }
 0x596   :  { %1030 = vrot.lane.b32.xlu0 %v2362_v33, %s2197_s13 }
 0x605   :  { %v860_v35 = vpop.xlane.xlu0 %859 }
 0x606   :  { %1929 = vrcp.f32 %v860_v35 }
 0x609   :  { %v876_v36 = vpop.permute.xlu0 %875 }
 0x60a   :  { %1807 = vmatpush3.bf16.msra.mxu0 %v876_v36 }
 0x60b   :  { %1818 = vmatprep.subr.bf16.mxu0 %v2194_v0 }
 0x60d   :  { %1809 = vmatmul.mubr.msk.bf16.vlgmr.msra.gmra.mxu0 %vm558_vm5, %v872_v37  ;;  %v1031_v47 = vpop.permute.xlu0 %1030 }
 0x60e   :  { %1820 = vmatprep.mubr.msk.bf16.mxu0 %vm2195_vm0, %v2194_v0  ;;  %1819 = vmatpush3.bf16.msra.mxu0 %v981_v49 }
 0x60f   :  { %1830 = vmatprep.subr.bf16.mxu0 %v2194_v0 }
 0x613   :  { %v1930_v38 = vpop.eup %1929 }
 0x614   :  { %v864_v39 = vmul.f32 %v1930_v38, %v1928_v31 }
 0x616   :  { %v866_v40 = vmul.f32 %v864_v39, %v2415_v18 }
 0x618   :  { %v868_v41 = vadd.f32 %v866_v40, %v2421_v28 }
 0x61a   :  { %871 = vst.msk [vmem:[#allocation19 + $0x28] sm:$0xff] %vm558_vm5, %v868_v41  ;;  %v873_v45 = vpack.c.bf16 %v868_v41, %v868_v41 }
 0x61c   :  { %1815 = vmatmul.mubr.msk.bf16.vlgmr.msra.gmra.mxu1 %vm558_vm5, %v873_v45 }
 0x61d   :  { %1825 = vmatpush3.bf16.xpose.msra.mxu1 %v1038_v46  ;;  %1826 = vmatprep.mubr.msk.bf16.mxu1 %vm2195_vm0, %v2194_v0 }
 0x61e   :  { %1836 = vmatprep.subr.bf16.mxu1 %v2194_v0 }
 0x624   :  { %1827 = vmatmul.mubr.msk.bf16.vlgmr.msra.gmra.mxu1 %vm465_vm2, %v1031_v47 }
 0x625   :  { %1838 = vmatprep.mubr.msk.bf16.mxu1 %vm2195_vm0, %v2194_v0 }
 0x6cd   :  { %v915_v50 = vpop.f32.mrf.mxu0 }
 0x6cf   :  { %v1810_v51 = vpop.f32.mrf.mxu0 }
 0x6d1   :  { %v918_v53 = vpop.f32.mrf.mxu0 }
 0x6d3   :  { %v1811_v55 = vpop.f32.mrf.mxu0 }
 0x6d4   :  { %v1256_v55 = vld [vmem:[#allocation17 + $0x8] sm:$0xf] }
 0x6d5   :  { %v1266_v56 = vsel %vm694_vm6, %v1256_v55, 0 }
 0x6dc   :  { %v962_v57 = vpop.f32.mrf.mxu1 }
 0x6dd   :  { %v1686_v58 = vpack.c.bf16 %v962_v57, %v915_v50 }
 0x6de   :  { %v1816_v59 = vpop.f32.mrf.mxu1 }
 0x6df   :  { %1821 = vmatmul.mubr.msk.bf16.vlgmr.msra.gmra.mxu0 %vm465_vm2, %v1686_v58 }
 0x6e0   :  { %1831 = vmatpush3.bf16.xpose.msra.mxu0 %v1088_v60  ;;  %v965_v61 = vpop.f32.mrf.mxu1  ;;  %1832 = vmatprep.mubr.msk.bf16.mxu0 %vm2195_vm0, %v2194_v0 }
 0x6e1   :  { %1842 = vmatprep.subr.bf16.mxu0 %v2194_v0 }
 0x6e2   :  { %v1817_v62 = vpop.f32.mrf.mxu1 }
 0x6e4   :  { %v1074_v63 = vpop.f32.mrf.mxu1 }
 0x6e5   :  { %v1075_v1 = vadd.f32 %v1074_v63, %v2391_v52 }
 0x6e6   :  { %v1828_v3 = vpop.f32.mrf.mxu1 }
 0x6e7   :  { %1833 = vmatmul.mubr.msk.bf16.vlgmr.msra.gmra.mxu0 %vm465_vm2, %v1081_v2  ;;  %v1130_v4 = vsel %vm558_vm5, %v1075_v1, -inf }
 0x6e8   :  { %1131 = vmax.xlane.f32.xlu0 %v1130_v4  ;;  %v1077_v5 = vpop.f32.mrf.mxu1  ;;  %1844 = vmatprep.mubr.msk.bf16.mxu0 %vm2195_vm0, %v2194_v0 }
 0x6ea   :  { %v1829_v6 = vpop.f32.mrf.mxu1 }
 0x771   :  { %v1132_v7 = vpop.xlane.xlu0 %1131 }
 0x772   :  { %v1136_v8 = vsub.f32 %v1075_v1, %v1132_v7 }
 0x774   :  { %v1138_v9 = vmul.f32 1.442695, %v1136_v8 }
 0x776   :  { %1931 = vpow2.f32 %v1138_v9 }
 0x783   :  { %v1932_v10 = vpop.eup %1931 }
 0x784   :  { %v1142_v11 = vsel %vm558_vm5, %v1932_v10, 0.0 }
 0x785   :  { %1143 = vadd.xlane.f32.xlu0 %v1142_v11 }
 0x79f   :  { %v1017_v12 = vpop.f32.mrf.mxu0 }
 0x7a0   :  { %v1026_v14 = vadd.f32 %v1024_v13, %v1017_v12 }
 0x7a1   :  { %v1822_v15 = vpop.f32.mrf.mxu0 }
 0x7a2   :  { %1028 = vst.msk [vmem:[#allocation18] sm:$0xff] %vm209_vm1, %v1026_v14 }
 0x7a3   :  { %v1020_v16 = vpop.f32.mrf.mxu0 }
 0x7a4   :  { %v1027_v19 = vadd.f32 %v1025_v17, %v1020_v16 }
 0x7a5   :  { %v1823_v21 = vpop.f32.mrf.mxu0 }
 0x7a6   :  { %1029 = vst.msk [vmem:[#allocation18 + $0x8] sm:$0xff] %vm209_vm1, %v1027_v19 }
 0x7a7   :  { %v1124_v22 = vpop.f32.mrf.mxu0 }
 0x7a8   :  { %v1125_v24 = vadd.f32 %v1124_v22, %v2393_v54 }
 0x7a9   :  { %v1834_v25 = vpop.f32.mrf.mxu0  ;;  %v1309_v17 = vld [vmem:[#allocation18] sm:$0xff] }
 0x7aa   :  { %v1133_v27 = vsel %vm558_vm5, %v1125_v24, -inf }
 0x7ab   :  { %1134 = vmax.xlane.f32.xlu1 %v1133_v27  ;;  %v1127_v29 = vpop.f32.mrf.mxu0 }
 0x7ad   :  { %v1835_v30 = vpop.f32.mrf.mxu0 }
 0x7bc   :  { %1207 = vrot.lane.b32.xlu1 %v2375_v42, %s2197_s13 }
 0x7c0   :  { %1317 = vrot.lane.b32.xlu1 %v2352_v26, %s2198_s2 }
 0x7c4   :  { %1367 = vrot.lane.b32.xlu1 %v2350_v23, %s2198_s2 }
 0x7c8   :  { %1365 = vrot.lane.b32.xlu1 %v2359_v32, %s2198_s2 }
 0x80e   :  { %v1144_v31 = vpop.xlane.xlu0 %1143 }
 0x80f   :  { %1933 = vrcp.f32 %v1144_v31 }
 0x81c   :  { %v1934_v34 = vpop.eup %1933 }
 0x81d   :  { %v1150_v35 = vmul.f32 %v1934_v34, %v1932_v10 }
 0x81f   :  { %v1152_v36 = vmul.f32 %v1150_v35, %v2415_v18 }
 0x821   :  { %v1154_v37 = vadd.f32 %v1152_v36, %v2417_v20 }
 0x823   :  { %1157 = vst.msk [vmem:[#allocation19 + $0x10] sm:$0xff] %vm558_vm5, %v1154_v37  ;;  %v1159_v45 = vpack.c.bf16 %v1154_v37, %v1154_v37 }
 0x834   :  { %v1135_v38 = vpop.xlane.xlu1 %1134 }
 0x835   :  { %v1137_v39 = vsub.f32 %v1125_v24, %v1135_v38  ;;  %v1310_v24 = vld [vmem:[#allocation18 + $0x8] sm:$0xff] }
 0x837   :  { %v1140_v40 = vmul.f32 1.442695, %v1137_v39 }
 0x838   :  { %v1208_v26 = vpop.permute.xlu1 %1207 }
 0x839   :  { %1935 = vpow2.f32 %v1140_v40  ;;  %1843 = vmatpush3.bf16.msra.mxu0 %v1208_v26 }
 0x83a   :  { %1854 = vmatprep.subr.bf16.mxu0 %v2194_v0 }
 0x83c   :  { %v1318_v50 = vpop.permute.xlu1 %1317 }
 0x83d   :  { %v1323_v51 = vsel %vm465_vm2, %v1318_v50, 0 }
 0x840   :  { %v1368_v61 = vpop.permute.xlu1 %1367 }
 0x841   :  { %v1373_v2 = vsel %vm465_vm2, %v1368_v61, 0 }
 0x844   :  { %v1366_v7 = vpop.permute.xlu1 %1365 }
 0x846   :  { %v1936_v23 = vpop.eup %1935 }
 0x847   :  { %v1145_v32 = vsel %vm558_vm5, %v1936_v23, 0.0 }
 0x848   :  { %1146 = vadd.xlane.f32.xlu0 %v1145_v32 }
 0x85e   :  { %1161 = vrot.lane.b32.xlu0 %v2377_v44, %s2197_s13 }
 0x862   :  { %1315 = vrot.lane.b32.xlu0 %v2362_v33, %s2198_s2 }
 0x8d1   :  { %v1147_v41 = vpop.xlane.xlu0 %1146 }
 0x8d2   :  { %1937 = vrcp.f32 %v1147_v41 }
 0x8d5   :  { %v1162_v43 = vpop.permute.xlu0 %1161 }
 0x8d6   :  { %1837 = vmatpush3.bf16.msra.mxu1 %v1162_v43 }
 0x8d7   :  { %1848 = vmatprep.subr.bf16.mxu1 %v2194_v0 }
 0x8d9   :  { %1839 = vmatmul.mubr.msk.bf16.vlgmr.msra.gmra.mxu1 %vm558_vm5, %v1159_v45  ;;  %v1316_v53 = vpop.permute.xlu0 %1315 }
 0x8da   :  { %1850 = vmatprep.mubr.msk.bf16.mxu1 %vm2195_vm0, %v2194_v0  ;;  %1849 = vmatpush3.bf16.msra.mxu1 %v1266_v56 }
 0x8db   :  { %1860 = vmatprep.subr.bf16.mxu1 %v2194_v0 }
 0x8df   :  { %v1938_v46 = vpop.eup %1937 }
 0x8e0   :  { %v1151_v47 = vmul.f32 %v1938_v46, %v1936_v23 }
 0x8e2   :  { %v1153_v48 = vmul.f32 %v1151_v47, %v2415_v18 }
 0x8e4   :  { %v1155_v49 = vadd.f32 %v1153_v48, %v2421_v28 }
 0x8e6   :  { %1158 = vst.msk [vmem:[#allocation19 + $0x30] sm:$0xff] %vm558_vm5, %v1155_v49  ;;  %v1160_v33 = vpack.c.bf16 %v1155_v49, %v1155_v49 }
 0x8e8   :  { %1845 = vmatmul.mubr.msk.bf16.vlgmr.msra.gmra.mxu0 %vm558_vm5, %v1160_v33  ;;  %v1541_v33 = vld [vmem:[#allocation17 + $0xc] sm:$0xf] }
 0x8e9   :  { %1855 = vmatpush3.bf16.xpose.msra.mxu0 %v1323_v51  ;;  %1856 = vmatprep.mubr.msk.bf16.mxu0 %vm2195_vm0, %v2194_v0  ;;  %v1551_v51 = vsel %vm694_vm6, %v1541_v33, 0 }
 0x8ea   :  { %1866 = vmatprep.subr.bf16.mxu0 %v2194_v0 }
 0x8f0   :  { %1857 = vmatmul.mubr.msk.bf16.vlgmr.msra.gmra.mxu0 %vm465_vm2, %v1316_v53 }
 0x8f1   :  { %1868 = vmatprep.mubr.msk.bf16.mxu0 %vm2195_vm0, %v2194_v0 }
 0x999   :  { %v1201_v57 = vpop.f32.mrf.mxu1 }
 0x99b   :  { %v1840_v58 = vpop.f32.mrf.mxu1 }
 0x99d   :  { %v1204_v59 = vpop.f32.mrf.mxu1 }
 0x99f   :  { %v1841_v60 = vpop.f32.mrf.mxu1 }
 0x9a8   :  { %v1247_v62 = vpop.f32.mrf.mxu0 }
 0x9a9   :  { %v1687_v63 = vpack.c.bf16 %v1247_v62, %v1201_v57 }
 0x9aa   :  { %v1846_v1 = vpop.f32.mrf.mxu0 }
 0x9ab   :  { %1851 = vmatmul.mubr.msk.bf16.vlgmr.msra.gmra.mxu1 %vm465_vm2, %v1687_v63 }
 0x9ac   :  { %1861 = vmatpush3.bf16.xpose.msra.mxu1 %v1373_v2  ;;  %v1250_v3 = vpop.f32.mrf.mxu0  ;;  %1862 = vmatprep.mubr.msk.bf16.mxu1 %vm2195_vm0, %v2194_v0 }
 0x9ad   :  { %1872 = vmatprep.subr.bf16.mxu1 %v2194_v0 }
 0x9ae   :  { %v1847_v4 = vpop.f32.mrf.mxu0 }
 0x9b0   :  { %v1359_v5 = vpop.f32.mrf.mxu0 }
 0x9b1   :  { %v1360_v6 = vadd.f32 %v1359_v5, %v2391_v52 }
 0x9b2   :  { %v1858_v8 = vpop.f32.mrf.mxu0 }
 0x9b3   :  { %1863 = vmatmul.mubr.msk.bf16.vlgmr.msra.gmra.mxu1 %vm465_vm2, %v1366_v7  ;;  %v1415_v9 = vsel %vm558_vm5, %v1360_v6, -inf }
 0x9b4   :  { %1416 = vmax.xlane.f32.xlu0 %v1415_v9  ;;  %v1362_v10 = vpop.f32.mrf.mxu0  ;;  %1874 = vmatprep.mubr.msk.bf16.mxu1 %vm2195_vm0, %v2194_v0 }
 0x9b6   :  { %v1859_v11 = vpop.f32.mrf.mxu0 }
 0xa3d   :  { %v1417_v12 = vpop.xlane.xlu0 %1416 }
 0xa3e   :  { %v1421_v13 = vsub.f32 %v1360_v6, %v1417_v12 }
 0xa40   :  { %v1423_v14 = vmul.f32 1.442695, %v1421_v13 }
 0xa42   :  { %1939 = vpow2.f32 %v1423_v14 }
 0xa4f   :  { %v1940_v15 = vpop.eup %1939 }
 0xa50   :  { %v1427_v16 = vsel %vm558_vm5, %v1940_v15, 0.0 }
 0xa51   :  { %1428 = vadd.xlane.f32.xlu0 %v1427_v16 }
 0xa6b   :  { %v1302_v52 = vpop.f32.mrf.mxu1 }
 0xa6c   :  { %v1311_v19 = vadd.f32 %v1309_v17, %v1302_v52 }
 0xa6d   :  { %v1852_v21 = vpop.f32.mrf.mxu1 }
 0xa6e   :  { %1313 = vst.msk [vmem:[#allocation18] sm:$0xff] %vm209_vm1, %v1311_v19 }
 0xa6f   :  { %v1305_v22 = vpop.f32.mrf.mxu1 }
 0xa70   :  { %v1312_v25 = vadd.f32 %v1310_v24, %v1305_v22 }
 0xa71   :  { %v1853_v27 = vpop.f32.mrf.mxu1 }
 0xa72   :  { %1314 = vst.msk [vmem:[#allocation18 + $0x8] sm:$0xff] %vm209_vm1, %v1312_v25 }
 0xa73   :  { %v1409_v29 = vpop.f32.mrf.mxu1 }
 0xa74   :  { %v1410_v30 = vadd.f32 %v1409_v29, %v2393_v54 }
 0xa75   :  { %v1864_v31 = vpop.f32.mrf.mxu1 }
 0xa76   :  { %v1418_v34 = vsel %vm558_vm5, %v1410_v30, -inf }
 0xa77   :  { %1419 = vmax.xlane.f32.xlu1 %v1418_v34  ;;  %v1412_v35 = vpop.f32.mrf.mxu1 }
 0xa79   :  { %v1865_v36 = vpop.f32.mrf.mxu1 }
 0xa88   :  { %1492 = vrot.lane.b32.xlu1 %v2375_v42, %s2198_s2 }
 0xada   :  { %v1429_v37 = vpop.xlane.xlu0 %1428 }
 0xadb   :  { %1941 = vrcp.f32 %v1429_v37 }
 0xae8   :  { %v1942_v38 = vpop.eup %1941 }
 0xae9   :  { %v1435_v39 = vmul.f32 %v1942_v38, %v1940_v15 }
 0xaeb   :  { %v1437_v40 = vmul.f32 %v1435_v39, %v2415_v18 }
 0xaed   :  { %v1439_v26 = vadd.f32 %v1437_v40, %v2417_v20 }
 0xaef   :  { %1442 = vst.msk [vmem:[#allocation19 + $0x18] sm:$0xff] %vm558_vm5, %v1439_v26  ;;  %v1444_v20 = vpack.c.bf16 %v1439_v26, %v1439_v26 }
 0xb00   :  { %v1420_v54 = vpop.xlane.xlu1 %1419 }
 0xb01   :  { %v1422_v23 = vsub.f32 %v1410_v30, %v1420_v54 }
 0xb03   :  { %v1425_v32 = vmul.f32 1.442695, %v1422_v23 }
 0xb04   :  { %v1493_v41 = vpop.permute.xlu1 %1492 }
 0xb05   :  { %1943 = vpow2.f32 %v1425_v32  ;;  %1873 = vmatpush3.bf16.msra.mxu1 %v1493_v41 }
 0xb12   :  { %v1944_v43 = vpop.eup %1943 }
 0xb13   :  { %v1430_v45 = vsel %vm558_vm5, %v1944_v43, 0.0 }
 0xb14   :  { %1431 = vadd.xlane.f32.xlu0 %v1430_v45 }
 0xb2a   :  { %1446 = vrot.lane.b32.xlu0 %v2377_v44, %s2198_s2 }
 0xb9d   :  { %v1432_v42 = vpop.xlane.xlu0 %1431 }
 0xb9e   :  { %1945 = vrcp.f32 %v1432_v42 }
 0xba1   :  { %v1447_v46 = vpop.permute.xlu0 %1446 }
 0xba2   :  { %1867 = vmatpush3.bf16.msra.mxu0 %v1447_v46 }
 0xba3   :  { %1878 = vmatprep.subr.bf16.mxu0 %v2194_v0 }
 0xba5   :  { %1869 = vmatmul.mubr.msk.bf16.vlgmr.msra.gmra.mxu0 %vm558_vm5, %v1444_v20 }
 0xba6   :  { %1880 = vmatprep.mubr.msk.bf16.mxu0 %vm2195_vm0, %v2194_v0  ;;  %1879 = vmatpush3.bf16.msra.mxu0 %v1551_v51 }
 0xbab   :  { %v1946_v47 = vpop.eup %1945 }
 0xbac   :  { %v1436_v48 = vmul.f32 %v1946_v47, %v1944_v43 }
 0xbae   :  { %v1438_v49 = vmul.f32 %v1436_v48, %v2415_v18 }
 0xbb0   :  { %v1440_v50 = vadd.f32 %v1438_v49, %v2421_v28 }
 0xbb2   :  { %1443 = vst.msk [vmem:[#allocation19 + $0x38] sm:$0xff] %vm558_vm5, %v1440_v50  ;;  %v1445_v44 = vpack.c.bf16 %v1440_v50, %v1440_v50 }
 0xbb4   :  { %1875 = vmatmul.mubr.msk.bf16.vlgmr.msra.gmra.mxu1 %vm558_vm5, %v1445_v44 }
 0xc65   :  { %v1486_v53 = vpop.f32.mrf.mxu0 }
 0xc67   :  { %v1870_v55 = vpop.f32.mrf.mxu0 }
 0xc69   :  { %v1489_v56 = vpop.f32.mrf.mxu0 }
 0xc6b   :  { %v1871_v57 = vpop.f32.mrf.mxu0 }
 0xc74   :  { %v1532_v0 = vpop.f32.mrf.mxu1 }
 0xc75   :  { %v1688_v58 = vpack.c.bf16 %v1532_v0, %v1486_v53 }
 0xc76   :  { %v1876_v59 = vpop.f32.mrf.mxu1 }
 0xc77   :  { %1881 = vmatmul.mubr.msk.bf16.vlgmr.msra.gmra.mxu0 %vm465_vm2, %v1688_v58 }
 0xc78   :  { %v1535_v18 = vpop.f32.mrf.mxu1 }
 0xc7a   :  { %v1877_v28 = vpop.f32.mrf.mxu1 }
 0xc7b   :  { %2138 = shalt.err (!%p2135_p7)
}
 0xc7c   :  { %1623 = dma.vmem_to_hbm [thread:$0]  %s1618_s20, 1024, %s2603_s15, [#allocation20], %s2185_s28, %s2185_s28, %s2186_s29   ;;  %v1594_v61 = vld [vmem:[#allocation18] sm:$0xff]  ;;  %v1595_v2 = vld [vmem:[#allocation18 + $0x8] sm:$0xff] }
 0xc7d   :  { %s2200_s6 = smov [#allocation18]  }
 0xc7e   :  { %s1605_s18 = sshll.u32 %s2200_s6, 4  ;;  %s1606_s18 = int_to_ptr.vmem [resolvable:$true] %s1605_s18 }
 0xc7f   :  { %s2147_s8 = scalar_lea.vmem %s1606_s18, 256  ;;  %p2152_p9 = scmp.lt.s32.totalorder %s1606_s18, %s1606_s18 }
 0xc80   :  { %p2148_p8 = scmp.ne.s32.totalorder %s1606_s18, %s2147_s8  ;;  %p2153_p10 = scmp.lt.s32.totalorder %s2147_s8, %s2147_s8 }
 0xc82   :  { %p2154_p11 = por %p2153_p10, %p2152_p9 }
 0xc84   :  { %p2155_p12 = pnand %p2154_p11, %p2148_p8 }
 0xd37   :  { %v1587_v60 = vpop.f32.mrf.mxu0 }
 0xd38   :  { %v1596_v62 = vadd.f32 %v1594_v61, %v1587_v60 }
 0xd39   :  { %v1882_v63 = vpop.f32.mrf.mxu0 }
 0xd3a   :  { %1598 = vst.msk [vmem:[#allocation18] sm:$0xff] %vm209_vm1, %v1596_v62 }
 0xd3b   :  { %v1590_v1 = vpop.f32.mrf.mxu0 }
 0xd3c   :  { %v1597_v3 = vadd.f32 %v1595_v2, %v1590_v1 }
 0xd3d   :  { %v1883_v4 = vpop.f32.mrf.mxu0 }
 0xd3e   :  { %1599 = vst.msk [vmem:[#allocation18 + $0x8] sm:$0xff] %vm209_vm1, %v1597_v3 }
 0xd3f   :  { %2158 = shalt.err (!%p2155_p12)
}
 0xd40   :  { %1611 = dma.vmem_to_hbm [thread:$0]  %s1606_s18, 256, %s2602_s14, [#allocation5], %s2185_s28, %s2185_s28, %s2186_s29  }
 0xd41   :  { %2177 = dma.done.wait [#allocation5], 256  }
 0xd42   :  { %2178 = vsyncadd [#allocation5], 4294967040 }
 0xd43   :  { %2179 = dma.done.wait [#allocation20], 1024  }
 0xd44   :  { %2180 = vsyncadd [#allocation20], 4294966272 }
 0xd45   :  { %1630 = vsyncpa [#allocation4], 1 }
 0xd46   :  { %1631 = vsyncpa [#allocation7], 1 }
 0xd47   :  { %1632 = vsyncpa [#allocation10], 1 }
 0xd48   :  { %1633 = vsyncpa [#allocation13], 1 }
 0xd49   :  { %1634 = vsyncpa [#allocation16], 1 }
 0xd4a   :  { %1635 = vsyncpa [#allocation5], 1 }
 0xd4b   :  { %1636 = vsyncpa [#allocation20], 1 }

</bundles_post_ra>
